<compile_context>
chip_gen: v6e
topology: v6e:2x2x1
jax: 0.10.0
libtpu: 0.0.40
codegen_flags: <defaults>
</compile_context>

<pallas_src>
import functools

import jax
import jax.numpy as jnp
from jax import lax
from jax.experimental import pallas as pl
from jax.experimental.pallas import tpu as pltpu

NEG_SLOPE = 0.01  # F.leaky_relu default


def _leaky_relu(x):
    return jnp.where(x > 0, x, NEG_SLOPE * x)


def _round_up(a, b):
    return ((a + b - 1) // b) * b


def _cores_per_chip():
    """TensorCores sharing one device's grid ("parallel" axis): 2 on v7x."""
    try:
        kind = str(jax.devices()[0].device_kind).lower()
        if "v7" in kind:
            return 2
    except Exception:  # defensive: never let detection break the kernel
        pass
    return 1


def _pick_tile(N, tm_req, num_cores):
    """Row-tile size: multiple of 128 (it is also the output lane width)."""
    tm = max(128, min(_round_up(tm_req, 128), _round_up(N, 128)))
    if num_cores >= 2 and N > 128:
        # v7x: keep an even number of grid steps so both TensorCores get work.
        steps = max(2, pl.cdiv(N, tm))
        if steps % 2:
            steps += 1
        tm = max(128, _round_up(pl.cdiv(N, steps), 128))
    return tm


def _local_estimator_kernel(x_ref, w1_ref, b1_ref, w2_ref, b2_ref,
                            w3_ref, b3_ref, o_ref, *, mm_dtype, precision):
    # NOTE: the last grid step's x tile may contain undefined tail rows (no
    # wrapper pad).  Each output row depends only on its own input row, and the
    # tail rows of the output are discarded in the wrapper, so this is safe.
    x = x_ref[...].astype(mm_dtype)

    # input2hidden: (tm, D) @ (D, 64) + (1, 64)   (weights already mm_dtype)
    h = jnp.dot(x, w1_ref[...], preferred_element_type=jnp.float32,
                precision=precision) + b1_ref[...]
    h = _leaky_relu(h).astype(mm_dtype)          # keep intermediates narrow

    # hidden2hidden: (tm, 64) @ (64, 32) + (1, 32)
    h = jnp.dot(h, w2_ref[...], preferred_element_type=jnp.float32,
                precision=precision) + b2_ref[...]
    h = _leaky_relu(h).astype(mm_dtype)

    # hidden2out, computed transposed so batch rows land on the lane axis:
    #   (1, 32) . (tm, 32)^T -> (1, tm)   (lane-dense store)
    out_row = lax.dot_general(
        w3_ref[...], h,
        dimension_numbers=(((1,), (1,)), ((), ())),
        preferred_element_type=jnp.float32,
        precision=precision) + b3_ref[...]

    o_ref[...] = out_row.astype(o_ref.dtype)


def local_estimator_forward(x, params, *, tm=4096, use_bf16=True):
    """x: (N, input_size) float32 -> (N, 1) float32."""
    N, D = x.shape
    w1, b1, w2, b2, w3, b3 = params

    num_cores = _cores_per_chip()
    tm = _pick_tile(N, tm, num_cores)
    num_tiles = pl.cdiv(N, tm)
    grid = (num_tiles,)

    if use_bf16:
        mm_dtype = jnp.bfloat16
        precision = None
        # One-time cast in the wrapper: weights are grid-resident (constant
        # index_map), so this removes per-step VPU re-packing inside the kernel
        # and halves their (tiny) DMA.  Biases stay f32 (added to f32 accum).
        w1, w2, w3 = (w.astype(jnp.bfloat16) for w in (w1, w2, w3))
    else:
        mm_dtype = jnp.float32
        precision = lax.Precision.HIGHEST

    kernel = functools.partial(_local_estimator_kernel,
                               mm_dtype=mm_dtype, precision=precision)

    # Weights/biases are tiny: pass them whole to every grid step (constant
    # index_map -> no re-DMA between steps).
    full = lambda a: pl.BlockSpec(a.shape, lambda i: (0, 0))

    weights = (w1, b1, w2, b2, w3, b3)
    param_bytes = sum(int(p.size) * p.dtype.itemsize for p in weights)
    cost = pl.CostEstimate(
        flops=2 * num_tiles * tm * (D * 64 + 64 * 32 + 32 * 1),
        transcendentals=0,
        bytes_accessed=4 * N * D + 4 * num_tiles * tm + param_bytes,
    )

    out2d = pl.pallas_call(
        kernel,
        out_shape=jax.ShapeDtypeStruct((num_tiles, tm), jnp.float32),
        grid_spec=pltpu.PrefetchScalarGridSpec(
            num_scalar_prefetch=0,
            grid=grid,
            in_specs=[
                pl.BlockSpec((tm, D), lambda i: (i, 0)),   # x row tile (partial tail OK)
                full(w1), full(b1),                        # input2hidden
                full(w2), full(b2),                        # hidden2hidden
                full(w3), full(b3),                        # hidden2out
            ],
            # Lane-dense output: one (1, tm) row per grid step.
            out_specs=pl.BlockSpec((1, tm), lambda i: (i, 0)),
        ),
        compiler_params=pltpu.CompilerParams(
            dimension_semantics=("parallel",)),
        cost_estimate=cost,
    )(x, w1, b1, w2, b2, w3, b3)

    return out2d.reshape(num_tiles * tm, 1)[:N]


def init_params(key, input_size):
    """nn.Linear-style init (uniform +/- 1/sqrt(fan_in)).

    w1/w2 are stored transposed vs PyTorch ((in, out)) so the kernel does
    x @ W + b; w3 keeps the PyTorch (out=1, in=32) layout since the kernel
    contracts it against h's feature axis directly. Biases are 2D (1, out).
    """
    def uniform(k, shape, fan_in):
        bound = 1.0 / jnp.sqrt(jnp.float32(fan_in))
        return jax.random.uniform(k, shape, jnp.float32, -bound, bound)

    k = jax.random.split(key, 6)
    w1 = uniform(k[0], (input_size, 64), input_size)
    b1 = uniform(k[1], (1, 64), input_size)
    w2 = uniform(k[2], (64, 32), 64)
    b2 = uniform(k[3], (1, 32), 64)
    w3 = uniform(k[4], (1, 32), 32)   # PyTorch layout (out_features, in_features)
    b3 = uniform(k[5], (1, 1), 32)
    return w1, b1, w2, b2, w3, b3


def reference_forward(x, params):
    w1, b1, w2, b2, w3, b3 = params
    h = jax.nn.leaky_relu(x @ w1 + b1, NEG_SLOPE)
    h = jax.nn.leaky_relu(h @ w2 + b2, NEG_SLOPE)
    return h @ w3.T + b3


# TODO(synk): eval_on_batch (pack_padded_sequence + masked MAPE loss) is a
# training-time loss helper, not part of the forward pass; not implemented here.


if __name__ == "__main__":
    key = jax.random.PRNGKey(0)
    k_x, k_p = jax.random.split(key)

    # sptm_s in DeepTTE is a packed sequence: (total_timesteps, input_size).
    # Deliberately NOT a multiple of 128/tm to exercise the un-padded tail block.
    N, INPUT_SIZE = 300, 16
    x = jax.random.normal(k_x, (N, INPUT_SIZE), dtype=jnp.float32)
    params = init_params(k_p, INPUT_SIZE)

    ref = reference_forward(x, params)

    # Exact-ish path (f32 operands, HIGHEST precision matmuls).
    out_f32 = jax.block_until_ready(
        local_estimator_forward(x, params, use_bf16=False))
    assert out_f32.shape == (N, 1)
    assert jnp.allclose(out_f32, ref, atol=1e-5, rtol=1e-5), "f32 path mismatch"

    # Default perf path (bf16 MXU operands/intermediates, f32 accumulation).
    # NOTE: tolerance intentionally loose; fine for inference, training-loss
    # sensitivity of DeepTTE's local loss should use use_bf16=False.
    out = jax.block_until_ready(local_estimator_forward(x, params))
    assert out.shape == (N, 1)
    assert jnp.allclose(out, ref, atol=3e-2, rtol=3e-2), "bf16 path mismatch"

    print("KERNEL_OK")
</pallas_src>

<mosaic_0001>
module attributes {stable_mosaic.version = 11 : i64} {
  func.func @_local_estimator_kernel(%arg0: i32, %arg1: memref<384x16xf32, #tpu.memory_space<vmem>>, %arg2: memref<16x64xf32, #tpu.memory_space<vmem>>, %arg3: memref<1x64xf32, #tpu.memory_space<vmem>>, %arg4: memref<64x32xf32, #tpu.memory_space<vmem>>, %arg5: memref<1x32xf32, #tpu.memory_space<vmem>>, %arg6: memref<1x32xf32, #tpu.memory_space<vmem>>, %arg7: memref<1x1xf32, #tpu.memory_space<vmem>>, %arg8: memref<1x384xf32, #tpu.memory_space<vmem>>) attributes {dimension_semantics = [#tpu.dimension_semantics<parallel>], iteration_bounds = array<i64: 1>, scalar_prefetch = 0 : i64, scratch_operands = 0 : i64, tpu.core_type = #tpu.core_type<tc>, window_params = [{transform_indices = @transform_0, window_bounds = array<i64: 384, 16>}, {pipeline_mode = #tpu.pipeline_mode<synchronous>, transform_indices = @transform_1, window_bounds = array<i64: 16, 64>}, {pipeline_mode = #tpu.pipeline_mode<synchronous>, transform_indices = @transform_2, window_bounds = array<i64: 1, 64>}, {pipeline_mode = #tpu.pipeline_mode<synchronous>, transform_indices = @transform_3, window_bounds = array<i64: 64, 32>}, {pipeline_mode = #tpu.pipeline_mode<synchronous>, transform_indices = @transform_4, window_bounds = array<i64: 1, 32>}, {pipeline_mode = #tpu.pipeline_mode<synchronous>, transform_indices = @transform_5, window_bounds = array<i64: 1, 32>}, {pipeline_mode = #tpu.pipeline_mode<synchronous>, transform_indices = @transform_6, window_bounds = array<i64: 1, 1>}, {transform_indices = @transform_7, window_bounds = array<i64: 1, 384>}]} {
    %c0 = arith.constant 0 : index
    %c0_0 = arith.constant 0 : index
    %0 = vector.load %arg1[%c0, %c0_0] : memref<384x16xf32, #tpu.memory_space<vmem>>, vector<384x16xf32>
    %c0_1 = arith.constant 0 : index
    %c0_2 = arith.constant 0 : index
    %1 = vector.load %arg2[%c0_1, %c0_2] : memref<16x64xf32, #tpu.memory_space<vmem>>, vector<16x64xf32>
    %cst = arith.constant dense<0.000000e+00> : vector<384x64xf32>
    %2 = tpu.matmul %0, %1, %cst {dimension_numbers = #tpu.dot_dimension_numbers<[1], [0], [0], [1], [0, 0, 1, 1], [], []>, precision = #tpu.contract_precision<fp32>} : vector<384x16xf32>, vector<16x64xf32>, vector<384x64xf32> -> vector<384x64xf32>
    %c0_3 = arith.constant 0 : index
    %c0_4 = arith.constant 0 : index
    %3 = vector.load %arg3[%c0_3, %c0_4] : memref<1x64xf32, #tpu.memory_space<vmem>>, vector<1x64xf32>
    %4 = vector.broadcast %3 : vector<1x64xf32> to vector<384x64xf32>
    %5 = arith.addf %2, %4 : vector<384x64xf32>
    %cst_5 = arith.constant 0.000000e+00 : f32
    %6 = vector.broadcast %cst_5 : f32 to vector<384x64xf32>
    %7 = arith.cmpf ogt, %5, %6 : vector<384x64xf32>
    %cst_6 = arith.constant 0.00999999977 : f32
    %8 = vector.broadcast %cst_6 : f32 to vector<384x64xf32>
    %9 = arith.mulf %8, %5 : vector<384x64xf32>
    %10 = arith.select %7, %5, %9 : vector<384x64xi1>, vector<384x64xf32>
    %c0_7 = arith.constant 0 : index
    %c0_8 = arith.constant 0 : index
    %11 = vector.load %arg4[%c0_7, %c0_8] : memref<64x32xf32, #tpu.memory_space<vmem>>, vector<64x32xf32>
    %cst_9 = arith.constant dense<0.000000e+00> : vector<384x32xf32>
    %12 = tpu.matmul %10, %11, %cst_9 {dimension_numbers = #tpu.dot_dimension_numbers<[1], [0], [0], [1], [0, 0, 1, 1], [], []>, precision = #tpu.contract_precision<fp32>} : vector<384x64xf32>, vector<64x32xf32>, vector<384x32xf32> -> vector<384x32xf32>
    %c0_10 = arith.constant 0 : index
    %c0_11 = arith.constant 0 : index
    %13 = vector.load %arg5[%c0_10, %c0_11] : memref<1x32xf32, #tpu.memory_space<vmem>>, vector<1x32xf32>
    %14 = vector.broadcast %13 : vector<1x32xf32> to vector<384x32xf32>
    %15 = arith.addf %12, %14 : vector<384x32xf32>
    %cst_12 = arith.constant 0.000000e+00 : f32
    %16 = vector.broadcast %cst_12 : f32 to vector<384x32xf32>
    %17 = arith.cmpf ogt, %15, %16 : vector<384x32xf32>
    %cst_13 = arith.constant 0.00999999977 : f32
    %18 = vector.broadcast %cst_13 : f32 to vector<384x32xf32>
    %19 = arith.mulf %18, %15 : vector<384x32xf32>
    %20 = arith.select %17, %15, %19 : vector<384x32xi1>, vector<384x32xf32>
    %c0_14 = arith.constant 0 : index
    %c0_15 = arith.constant 0 : index
    %21 = vector.load %arg6[%c0_14, %c0_15] : memref<1x32xf32, #tpu.memory_space<vmem>>, vector<1x32xf32>
    %cst_16 = arith.constant dense<0.000000e+00> : vector<1x384xf32>
    %22 = tpu.matmul %21, %20, %cst_16 {dimension_numbers = #tpu.dot_dimension_numbers<[1], [1], [0], [0], [0, 0, 1, 0], [], []>, precision = #tpu.contract_precision<fp32>} : vector<1x32xf32>, vector<384x32xf32>, vector<1x384xf32> -> vector<1x384xf32>
    %c0_17 = arith.constant 0 : index
    %c0_18 = arith.constant 0 : index
    %23 = vector.load %arg7[%c0_17, %c0_18] : memref<1x1xf32, #tpu.memory_space<vmem>>, vector<1x1xf32>
    %24 = vector.broadcast %23 : vector<1x1xf32> to vector<1x384xf32>
    %25 = arith.addf %22, %24 : vector<1x384xf32>
    %c0_19 = arith.constant 0 : index
    %c0_20 = arith.constant 0 : index
    %26 = vector.load %arg8[%c0_19, %c0_20] : memref<1x384xf32, #tpu.memory_space<vmem>>, vector<1x384xf32>
    tpu.vector_store %arg8[%c0_19, %c0_20], %25 {strides = array<i32>} : memref<1x384xf32, #tpu.memory_space<vmem>>, vector<1x384xf32>,
    return
  }
  func.func @transform_0(%arg0: i32) -> (i32, i32) {
    %c0_i32 = arith.constant 0 : i32
    %c0_i32_0 = arith.constant 0 : i32
    return %arg0, %c0_i32 : i32, i32
  }
  func.func @transform_1(%arg0: i32) -> (i32, i32) {
    %c0_i32 = arith.constant 0 : i32
    %c0_i32_0 = arith.constant 0 : i32
    %c0_i32_1 = arith.constant 0 : i32
    return %c0_i32, %c0_i32_0 : i32, i32
  }
  func.func @transform_2(%arg0: i32) -> (i32, i32) {
    %c0_i32 = arith.constant 0 : i32
    %c0_i32_0 = arith.constant 0 : i32
    %c0_i32_1 = arith.constant 0 : i32
    return %c0_i32, %c0_i32_0 : i32, i32
  }
  func.func @transform_3(%arg0: i32) -> (i32, i32) {
    %c0_i32 = arith.constant 0 : i32
    %c0_i32_0 = arith.constant 0 : i32
    %c0_i32_1 = arith.constant 0 : i32
    return %c0_i32, %c0_i32_0 : i32, i32
  }
  func.func @transform_4(%arg0: i32) -> (i32, i32) {
    %c0_i32 = arith.constant 0 : i32
    %c0_i32_0 = arith.constant 0 : i32
    %c0_i32_1 = arith.constant 0 : i32
    return %c0_i32, %c0_i32_0 : i32, i32
  }
  func.func @transform_5(%arg0: i32) -> (i32, i32) {
    %c0_i32 = arith.constant 0 : i32
    %c0_i32_0 = arith.constant 0 : i32
    %c0_i32_1 = arith.constant 0 : i32
    return %c0_i32, %c0_i32_0 : i32, i32
  }
  func.func @transform_6(%arg0: i32) -> (i32, i32) {
    %c0_i32 = arith.constant 0 : i32
    %c0_i32_0 = arith.constant 0 : i32
    %c0_i32_1 = arith.constant 0 : i32
    return %c0_i32, %c0_i32_0 : i32, i32
  }
  func.func @transform_7(%arg0: i32) -> (i32, i32) {
    %c0_i32 = arith.constant 0 : i32
    %c0_i32_0 = arith.constant 0 : i32
    return %arg0, %c0_i32 : i32, i32
  }
}

</mosaic_0001>

<bundles_post_ra>
// kernel: tpu_custom_call.1
= control target key start
LH: loop header
LB: loop body
LE: loop exit
PB: predicated region body
PF: predicated region fallthrough
CT: control target
= control target key end

     0   :  { %s13776_s0 = inlined_call_operand.vmem [shape: f32[300,16], index: 0, kind: input, shape index: {}]   ;;  %s13777_s1 = inlined_call_operand.vmem [shape: f32[16,64], index: 1, kind: input, shape index: {}]   ;;  %s13778_s2 = inlined_call_operand.vmem [shape: f32[1,64], index: 2, kind: input, shape index: {}]   ;;  %s13779_s3 = inlined_call_operand.vmem [shape: f32[64,32], index: 3, kind: input, shape index: {}]   ;;  %s13780_s4 = inlined_call_operand.vmem [shape: f32[1,32], index: 4, kind: input, shape index: {}]   ;;  %s13781_s5 = inlined_call_operand.vmem [shape: f32[1,32], index: 5, kind: input, shape index: {}]   ;;  %s13782_s6 = inlined_call_operand.<no memory space> [shape: f32[1,1], index: 6, kind: input, shape index: {}]   ;;  %s13783_s7 = inlined_call_operand.hbm [shape: f32[1,384], index: 7, kind: output, shape index: {}]  }
   0x1   :  { %v12_v0 = vstv %s13782_s6 }
   0x2   :  { %13 = vst [vmem:[#allocation2] sm:$0x1] %v12_v0 }
   0x3   :  { %v78_v1 = vld [vmem:[%s13777_s1 + $0x8] sm:$0xff]  ;;  %v77_v2 = vld [vmem:[%s13777_s1] sm:$0xff]  ;;  %vm86_vm0 = vcmask 130048   ;;  %v31_v8 = vld [vmem:[%s13776_s0 + $0x10] sm:$0xff] }
   0x4   :  { %v29_v3 = vld [vmem:[%s13776_s0] sm:$0xff]  ;;  %v9641_v4 = vand.u32 4294901760, %v78_v1  ;;  %v9643_v5 = vand.u32 4294901760, %v77_v2  ;;  %v30_v7 = vld [vmem:[%s13776_s0 + $0x8] sm:$0xff]  ;;  %v32_v9 = vld [vmem:[%s13776_s0 + $0x18] sm:$0xff]  ;;  %v94_v12 = vsel %vm86_vm0, %v31_v8, 0 }
   0x5   :  { %v88_v6 = vsel %vm86_vm0, %v29_v3, 0  ;;  %v91_v11 = vsel %vm86_vm0, %v30_v7, 0  ;;  %v97_v13 = vsel %vm86_vm0, %v32_v9, 0  ;;  %v33_v14 = vld [vmem:[%s13776_s0 + $0x20] sm:$0xff]  ;;  %v34_v15 = vld [vmem:[%s13776_s0 + $0x28] sm:$0xff]  ;;  %v9675_v19 = vand.u32 4294901760, %v94_v12 }
   0x6   :  { %v9655_v10 = vand.u32 4294901760, %v88_v6  ;;  %8362 = vmatprep.subr.mxu0 %v9641_v4  ;;  %v9668_v16 = vsub.f32 %v78_v1, %v9641_v4  ;;  %v9670_v17 = vand.u32 4294901760, %v91_v11  ;;  %v9673_v18 = vsub.f32 %v77_v2, %v9643_v5  ;;  %v35_v40 = vld [vmem:[%s13776_s0 + $0x30] sm:$0xff]  ;;  %v36_v41 = vld [vmem:[%s13776_s0 + $0x38] sm:$0xff]  ;;  %v37_v50 = vld [vmem:[%s13776_s0 + $0x40] sm:$0xff] }
   0x7   :  { %14174 = vst [vmem:[#allocation8_spill] sm:$0xff] %v9675_v19  ;;  %8363 = vmatpush3.msra.mxu0 %v9641_v4  ;;  %v9682_v21 = vand.u32 4294901760, %v97_v13  ;;  %v100_v22 = vsel %vm86_vm0, %v33_v14, 0  ;;  %v103_v23 = vsel %vm86_vm0, %v34_v15, 0  ;;  %v9697_v27 = vsub.f32 %v94_v12, %v9675_v19  ;;  %v38_v51 = vld [vmem:[%s13776_s0 + $0x48] sm:$0xff]  ;;  %v39_v52 = vld [vmem:[%s13776_s0 + $0x50] sm:$0xff] }
   0x8   :  { %14172 = vst [vmem:[#allocation6_spill] sm:$0xff] %v9655_v10  ;;  %14173 = vst [vmem:[#allocation7_spill] sm:$0xff] %v9670_v17  ;;  %v9679_v20 = vsub.f32 %v88_v6, %v9655_v10  ;;  %8442 = vmatprep.mubr.f32.mxu1 %v9655_v10  ;;  %8364 = vmatprep.subr.mxu0 %v9643_v5  ;;  %v9688_v24 = vand.u32 4294901760, %v9668_v16  ;;  %v9691_v25 = vsub.f32 %v91_v11, %v9670_v17  ;;  %v40_v61 = vld [vmem:[%s13776_s0 + $0x58] sm:$0xff]  ;;  %v41_v2 = vld [vmem:[%s13776_s0 + $0x60] sm:$0xff] }
   0x9   :  { %14175 = vst [vmem:[#allocation9_spill] sm:$0xff] %v9682_v21  ;;  %v9694_v26 = vand.u32 4294901760, %v9673_v18  ;;  %8365 = vmatpush3.msra.mxu0 %v9643_v5  ;;  %v9702_v29 = vsub.f32 %v97_v13, %v9682_v21  ;;  %v9704_v30 = vand.u32 4294901760, %v100_v22  ;;  %v9706_v31 = vand.u32 4294901760, %v103_v23  ;;  %v42_v14 = vld [vmem:[%s13776_s0 + $0x68] sm:$0xff] }
   0xa   :  { %v13800_v28 = vand.u32 4294901760, %v9679_v20  ;;  %v810_v32 = vsub.f32 %v9668_v16, %v9688_v24  ;;  %v13799_v33 = vand.u32 4294901760, %v9691_v25  ;;  %v13797_v35 = vand.u32 4294901760, %v9697_v27  ;;  %8514 = vmatprep.subr.mxu0 %v9668_v16 }
   0xb   :  { %14176 = vst [vmem:[#allocation10_spill] sm:$0xff] %v9704_v30  ;;  %14177 = vst [vmem:[#allocation11_spill] sm:$0xff] %v9706_v31  ;;  %v817_v34 = vsub.f32 %v9673_v18, %v9694_v26  ;;  %v13795_v37 = vand.u32 4294901760, %v9702_v29  ;;  %v9720_v38 = vsub.f32 %v100_v22, %v9704_v30  ;;  %v9723_v39 = vsub.f32 %v103_v23, %v9706_v31 }
   0xc   :  { %v301_v36 = vsub.f32 %v9679_v20, %v13800_v28  ;;  %v811_v42 = vand.u32 4294901760, %v810_v32  ;;  %v311_v43 = vsub.f32 %v9691_v25, %v13799_v33  ;;  %v321_v45 = vsub.f32 %v9697_v27, %v13797_v35 }
   0xd   :  { %v818_v44 = vand.u32 4294901760, %v817_v34  ;;  %v331_v47 = vsub.f32 %v9702_v29, %v13795_v37  ;;  %v13794_v48 = vand.u32 4294901760, %v9720_v38  ;;  %v13791_v49 = vand.u32 4294901760, %v9723_v39 }
   0xe   :  { %v302_v46 = vand.u32 4294901760, %v301_v36  ;;  %8438 = vmatprep.subr.mxu1 %v811_v42  ;;  %v312_v53 = vand.u32 4294901760, %v311_v43  ;;  %v322_v54 = vand.u32 4294901760, %v321_v45  ;;  %v106_v55 = vsel %vm86_vm0, %v35_v40, 0 }
   0xf   :  { %v109_v56 = vsel %vm86_vm0, %v36_v41, 0  ;;  %8439 = vmatpush3.msra.mxu1 %v811_v42  ;;  %v332_v57 = vand.u32 4294901760, %v331_v47  ;;  %v341_v58 = vsub.f32 %v9720_v38, %v13794_v48  ;;  %v351_v59 = vsub.f32 %v9723_v39, %v13791_v49 }
  0x10   :  { %8366 = vmatprep.mubr.f32.mxu0 %v302_v46  ;;  %v9759_v60 = vand.u32 4294901760, %v106_v55  ;;  %8440 = vmatprep.subr.mxu1 %v818_v44  ;;  %v9764_v62 = vand.u32 4294901760, %v109_v56  ;;  %v112_v63 = vsel %vm86_vm0, %v37_v50, 0  ;;  %v115_v0 = vsel %vm86_vm0, %v38_v51, 0 }
  0x11   :  { %8367 = vmatmul.mubr.f32.vlgmr.msra.gmra.mxu0 %v312_v53  ;;  %v118_v1 = vsel %vm86_vm0, %v39_v52, 0  ;;  %8441 = vmatpush3.msra.mxu1 %v818_v44  ;;  %v342_v3 = vand.u32 4294901760, %v341_v58  ;;  %v352_v6 = vand.u32 4294901760, %v351_v59  ;;  %v9775_v8 = vand.u32 4294901760, %v112_v63 }
  0x12   :  { %14178 = vst [vmem:[#allocation12_spill] sm:$0xff] %v9759_v60  ;;  %14179 = vst [vmem:[#allocation13_spill] sm:$0xff] %v9764_v62  ;;  %8369 = vmatprep.mubr.f32.mxu0 %v322_v54  ;;  %v9773_v7 = vsub.f32 %v106_v55, %v9759_v60  ;;  %8443 = vmatmul.mubr.f32.vlgmr.msra.gmra.mxu1 %v9670_v17  ;;  %v9779_v9 = vsub.f32 %v109_v56, %v9764_v62  ;;  %v9781_v11 = vand.u32 4294901760, %v115_v0 }
  0x13   :  { %14180 = vst [vmem:[#allocation14_spill] sm:$0xff] %v9775_v8  ;;  %v9783_v12 = vand.u32 4294901760, %v118_v1  ;;  %v121_v13 = vsel %vm86_vm0, %v40_v61, 0  ;;  %8515 = vmatpush3.msra.mxu0 %v9668_v16  ;;  %8445 = vmatprep.mubr.f32.mxu1 %v9675_v19  ;;  %v9793_v22 = vsub.f32 %v112_v63, %v9775_v8  ;;  %v124_v32 = vsel %vm86_vm0, %v41_v2, 0 }
  0x14   :  { %14181 = vst [vmem:[#allocation15_spill] sm:$0xff] %v9781_v11  ;;  %v13790_v15 = vand.u32 4294901760, %v9773_v7  ;;  %v9795_v23 = vand.u32 4294901760, %v121_v13  ;;  %8590 = vmatprep.subr.mxu1 %v9641_v4  ;;  %v13789_v34 = vand.u32 4294901760, %v9779_v9  ;;  %v9801_v36 = vsub.f32 %v115_v0, %v9781_v11 }
  0x15   :  { %14182 = vst [vmem:[#allocation16_spill] sm:$0xff] %v9783_v12  ;;  %8370 = vmatmul.mubr.f32.gmra.mxu0 %v332_v57  ;;  %v9804_v16 = vsub.f32 %v118_v1, %v9783_v12  ;;  %v9806_v40 = vand.u32 4294901760, %v124_v32  ;;  %8591 = vmatpush3.msra.mxu1 %v9641_v4 }
  0x16   :  { %14183 = vst [vmem:[#allocation17_spill] sm:$0xff] %v9795_v23 }
  0x17   :  { %14184 = vst [vmem:[#allocation18_spill] sm:$0xff] %v9806_v40 }
  0x18   :  { %14 = vsyncpa [#allocation4], 0  ;;  %8372 = vmatprep.mubr.f32.mxu0 %v342_v3  ;;  %v361_v41 = vsub.f32 %v9773_v7, %v13790_v15  ;;  %v13788_v42 = vand.u32 4294901760, %v9793_v22  ;;  %v9814_v43 = vsub.f32 %v121_v13, %v9795_v23  ;;  %v127_v44 = vsel %vm86_vm0, %v42_v14, 0  ;;  %8516 = vmatprep.subr.mxu0 %v9673_v18  ;;  %v43_v51 = vld [vmem:[%s13776_s0 + $0x70] sm:$0xff]  ;;  %v44_v59 = vld [vmem:[%s13776_s0 + $0x78] sm:$0xff] }
  0x19   :  { %8446 = vmatmul.mubr.f32.gmra.mxu1 %v9682_v21  ;;  %v371_v45 = vsub.f32 %v9779_v9, %v13789_v34  ;;  %v13787_v46 = vand.u32 4294901760, %v9801_v36  ;;  %v13786_v47 = vand.u32 4294901760, %v9804_v16  ;;  %v9825_v50 = vsub.f32 %v124_v32, %v9806_v40  ;;  %8517 = vmatpush3.msra.mxu0 %v9673_v18  ;;  %v45_v61 = vld [vmem:[%s13776_s0 + $0x80] sm:$0xff]  ;;  %v46_v13 = vld [vmem:[%s13776_s0 + $0x88] sm:$0xff]  ;;  %v47_v14 = vld [vmem:[%s13776_s0 + $0x90] sm:$0xff] }
  0x1a   :  { %8448 = vmatprep.mubr.f32.mxu1 %v9704_v30  ;;  %v362_v52 = vand.u32 4294901760, %v361_v41  ;;  %v381_v53 = vsub.f32 %v9793_v22, %v13788_v42  ;;  %v13784_v54 = vand.u32 4294901760, %v9814_v43  ;;  %v9836_v55 = vand.u32 4294901760, %v127_v44  ;;  %8592 = vmatprep.subr.mxu1 %v9643_v5  ;;  %v48_v32 = vld [vmem:[%s13776_s0 + $0x98] sm:$0xff]  ;;  %v53_v48 = vld [vmem:[%s13776_s0 + $0xc0] sm:$0xff]  ;;  %v54_v28 = vld [vmem:[%s13776_s0 + $0xc8] sm:$0xff] }
  0x1b   :  { %8373 = vmatmul.mubr.f32.gmra.mxu0 %v352_v6  ;;  %v372_v56 = vand.u32 4294901760, %v371_v45  ;;  %v391_v57 = vsub.f32 %v9801_v36, %v13787_v46  ;;  %v401_v18 = vsub.f32 %v9804_v16, %v13786_v47  ;;  %v13785_v58 = vand.u32 4294901760, %v9825_v50  ;;  %8593 = vmatpush3.msra.mxu1 %v9643_v5 }
  0x1c   :  { %14185 = vst [vmem:[#allocation19_spill] sm:$0xff] %v9836_v55  ;;  %8375 = vmatprep.mubr.f32.mxu0 %v362_v52  ;;  %v382_v63 = vand.u32 4294901760, %v381_v53  ;;  %v411_v0 = vsub.f32 %v9814_v43, %v13784_v54  ;;  %v9857_v1 = vsub.f32 %v127_v44, %v9836_v55  ;;  %v130_v2 = vsel %vm86_vm0, %v43_v51, 0  ;;  %8666 = vmatprep.subr.mxu0 %v9688_v24 }
  0x1d   :  { %8449 = vmatmul.mubr.f32.gmra.mxu1 %v9706_v31  ;;  %v392_v3 = vand.u32 4294901760, %v391_v57  ;;  %v9862_v6 = vand.u32 4294901760, %v130_v2  ;;  %8742 = vmatprep.subr.mxu1 %v9641_v4  ;;  %v402_v41 = vand.u32 4294901760, %v401_v18  ;;  %v421_v44 = vsub.f32 %v9825_v50, %v13785_v58  ;;  %v49_v18 = vld [vmem:[%s13776_s0 + $0xa0] sm:$0xff] }
  0x1e   :  { %8451 = vmatprep.mubr.f32.mxu1 %v9759_v60  ;;  %v133_v45 = vsel %vm86_vm0, %v44_v59, 0  ;;  %v136_v51 = vsel %vm86_vm0, %v45_v61, 0  ;;  %v13792_v52 = vand.u32 4294901760, %v9857_v1  ;;  %v412_v58 = vand.u32 4294901760, %v411_v0 }
  0x1f   :  { %14186 = vst [vmem:[#allocation20_spill] sm:$0xff] %v9862_v6  ;;  %8376 = vmatmul.mubr.f32.gmra.mxu0 %v372_v56  ;;  %v9882_v53 = vsub.f32 %v130_v2, %v9862_v6  ;;  %v9884_v57 = vand.u32 4294901760, %v133_v45  ;;  %v9886_v54 = vand.u32 4294901760, %v136_v51  ;;  %v139_v59 = vsel %vm86_vm0, %v46_v13, 0 }
  0x20   :  { %8378 = vmatprep.mubr.f32.mxu0 %v382_v63  ;;  %v142_v61 = vsel %vm86_vm0, %v47_v14, 0  ;;  %v145_v56 = vsel %vm86_vm0, %v48_v32, 0  ;;  %v9902_v42 = vand.u32 4294901760, %v139_v59  ;;  %v50_v63 = vld [vmem:[%s13776_s0 + $0xa8] sm:$0xff]  ;;  %v422_v0 = vand.u32 4294901760, %v421_v44 }
  0x21   :  { %14187 = vst [vmem:[#allocation21_spill] sm:$0xff] %v9884_v57  ;;  %14188 = vst [vmem:[#allocation22_spill] sm:$0xff] %v9886_v54  ;;  %8452 = vmatmul.mubr.f32.gmra.mxu1 %v9764_v62  ;;  %v13793_v2 = vand.u32 4294901760, %v9882_v53  ;;  %v9897_v47 = vsub.f32 %v133_v45, %v9884_v57  ;;  %v9900_v46 = vsub.f32 %v136_v51, %v9886_v54  ;;  %v9908_v13 = vand.u32 4294901760, %v142_v61 }
  0x22   :  { %14189 = vst [vmem:[#allocation23_spill] sm:$0xff] %v9902_v42  ;;  %8454 = vmatprep.mubr.f32.mxu1 %v9775_v8  ;;  %v9910_v14 = vand.u32 4294901760, %v145_v56  ;;  %v148_v32 = vsel %vm86_vm0, %v49_v18, 0  ;;  %v431_v45 = vsub.f32 %v9857_v1, %v13792_v52  ;;  %v9919_v15 = vsub.f32 %v139_v59, %v9902_v42  ;;  %v51_v52 = vld [vmem:[%s13776_s0 + $0xb0] sm:$0xff] }
  0x23   :  { %14190 = vst [vmem:[#allocation24_spill] sm:$0xff] %v9908_v13  ;;  %8379 = vmatmul.mubr.f32.gmra.mxu0 %v392_v3  ;;  %v13796_v51 = vand.u32 4294901760, %v9897_v47  ;;  %v13798_v34 = vand.u32 4294901760, %v9900_v46  ;;  %v441_v44 = vsub.f32 %v9882_v53, %v13793_v2  ;;  %v9925_v49 = vsub.f32 %v142_v61, %v9908_v13  ;;  %v52_v2 = vld [vmem:[%s13776_s0 + $0xb8] sm:$0xff] }
  0x24   :  { %14191 = vst [vmem:[#allocation25_spill] sm:$0xff] %v9910_v14  ;;  %8381 = vmatprep.mubr.f32.mxu0 %v402_v41  ;;  %v9927_v3 = vand.u32 4294901760, %v148_v32  ;;  %v151_v18 = vsel %vm86_vm0, %v50_v63, 0  ;;  %v9942_v61 = vsub.f32 %v145_v56, %v9910_v14  ;;  %v432_v37 = vand.u32 4294901760, %v431_v45 }
  0x25   :  { %8455 = vmatmul.mubr.f32.gmra.mxu1 %v9781_v11  ;;  %v451_v41 = vsub.f32 %v9897_v47, %v13796_v51  ;;  %v461_v59 = vsub.f32 %v9900_v46, %v13798_v34  ;;  %v9944_v63 = vand.u32 4294901760, %v151_v18  ;;  %v13809_v51 = vand.u32 4294901760, %v9919_v15 }
  0x26   :  { %14192 = vst [vmem:[#allocation26_spill] sm:$0xff] %v9927_v3  ;;  %8457 = vmatprep.mubr.f32.mxu1 %v9783_v12  ;;  %v154_v34 = vsel %vm86_vm0, %v51_v52, 0  ;;  %v442_v56 = vand.u32 4294901760, %v441_v44  ;;  %v9956_v33 = vsub.f32 %v148_v32, %v9927_v3  ;;  %v160_v45 = vsel %vm86_vm0, %v53_v48, 0  ;;  %v55_v52 = vld [vmem:[%s13776_s0 + $0xd0] sm:$0xff] }
  0x27   :  { %14193 = vst [vmem:[#allocation27_spill] sm:$0xff] %v9944_v63  ;;  %8382 = vmatmul.mubr.f32.gmra.mxu0 %v412_v58  ;;  %v9962_v12 = vand.u32 4294901760, %v154_v34  ;;  %v157_v58 = vsel %vm86_vm0, %v52_v2, 0  ;;  %v462_v32 = vand.u32 4294901760, %v461_v59  ;;  %v13816_v44 = vand.u32 4294901760, %v9942_v61 }
  0x28   :  { %8384 = vmatprep.mubr.f32.mxu0 %v422_v0  ;;  %v452_v0 = vand.u32 4294901760, %v451_v41  ;;  %v9972_v35 = vsub.f32 %v151_v18, %v9944_v63  ;;  %v471_v2 = vsub.f32 %v9919_v15, %v13809_v51  ;;  %v14195_v48 = vand.u32 4294901760, %v9925_v49  ;;  %v56_v51 = vld [vmem:[%s13776_s0 + $0xd8] sm:$0xff] }
  0x29   :  { %8458 = vmatmul.mubr.f32.gmra.mxu1 %v9795_v23  ;;  %14194 = vst [vmem:[#allocation28_spill] sm:$0xff] %v9962_v12  ;;  %v9980_v11 = vand.u32 4294901760, %v157_v58  ;;  %v9985_v59 = vsub.f32 %v154_v34, %v9962_v12  ;;  %v9987_v18 = vand.u32 4294901760, %v160_v45  ;;  %vm2870_vm1 = vcmask 523264  }
  0x2a   :  { %8460 = vmatprep.mubr.f32.mxu1 %v9806_v40  ;;  %v481_v23 = vsub.f32 %v9925_v49, %v14195_v48  ;;  %v163_v40 = vsel %vm86_vm0, %v54_v28, 0  ;;  %v491_v28 = vsub.f32 %v9942_v61, %v13816_v44  ;;  %v472_v48 = vand.u32 4294901760, %v471_v2 }
  0x2b   :  { %8385 = vmatmul.mubr.f32.gmra.mxu0 %v432_v37  ;;  %14196 = vst [vmem:[#allocation29_spill] sm:$0xff] %v9980_v11  ;;  %14197 = vst [vmem:[#allocation30_spill] sm:$0xff] %v9987_v18  ;;  %v166_v37 = vsel %vm86_vm0, %v55_v52, 0  ;;  %v9999_v34 = vand.u32 4294901760, %v163_v40  ;;  %v57_v52 = vld [vmem:[%s13776_s0 + $0xe0] sm:$0xff]  ;;  %v10005_v41 = vsub.f32 %v157_v58, %v9980_v11  ;;  %v14200_v44 = vand.u32 4294901760, %v9956_v33 }
  0x2c   :  { %8387 = vmatprep.mubr.f32.mxu0 %v442_v56  ;;  %v482_v8 = vand.u32 4294901760, %v481_v23  ;;  %v10015_v60 = vsub.f32 %v160_v45, %v9987_v18  ;;  %v58_v58 = vld [vmem:[%s13776_s0 + $0xe8] sm:$0xff]  ;;  %v172_v23 = vsel %vm86_vm0, %v57_v52, 0 }
  0x2d   :  { %8461 = vmatmul.mubr.f32.gmra.mxu1 %v9836_v55  ;;  %14198 = vst [vmem:[#allocation31_spill] sm:$0xff] %v9999_v34  ;;  %v10007_v55 = vand.u32 4294901760, %v166_v37  ;;  %v501_v56 = vsub.f32 %v9956_v33, %v14200_v44  ;;  %v10030_v44 = vsub.f32 %v163_v40, %v9999_v34  ;;  %v13837_v62 = vand.u32 4294901760, %v10005_v41 }
  0x2e   :  { %8463 = vmatprep.mubr.f32.mxu1 %v9862_v6  ;;  %v169_v6 = vsel %vm86_vm0, %v56_v51, 0  ;;  %v492_v51 = vand.u32 4294901760, %v491_v28  ;;  %v175_v52 = vsel %vm86_vm0, %v58_v58, 0  ;;  %v10044_v30 = vand.u32 4294901760, %v172_v23 }
  0x2f   :  { %8388 = vmatmul.mubr.f32.gmra.mxu0 %v452_v0  ;;  %14199 = vst [vmem:[#allocation32_spill] sm:$0xff] %v10007_v55  ;;  %v59_v0 = vld [vmem:[%s13776_s0 + $0xf0] sm:$0xff]  ;;  %14202 = vst [vmem:[#allocation33_spill] sm:$0xff] %v10030_v44  ;;  %v10032_v2 = vand.u32 4294901760, %v169_v6  ;;  %v10036_v31 = vsub.f32 %v166_v37, %v10007_v55  ;;  %v502_v28 = vand.u32 4294901760, %v501_v56  ;;  %v10054_v56 = vand.u32 4294901760, %v175_v52 }
  0x30   :  { %8390 = vmatprep.mubr.f32.mxu0 %v462_v32  ;;  %v14201_v32 = vand.u32 4294901760, %v9972_v35  ;;  %14206 = vst [vmem:[#allocation36_spill] sm:$0xff] %v10044_v30  ;;  %v13844_v40 = vand.u32 4294901760, %v10030_v44  ;;  %v10071_v19 = vsub.f32 %v172_v23, %v10044_v30 }
  0x31   :  { %8464 = vmatmul.mubr.f32.gmra.mxu1 %v9884_v57  ;;  %14203 = vst [vmem:[#allocation34_spill] sm:$0xff] %v10032_v2  ;;  %14204 = vst [vmem:[#allocation35_spill] sm:$0xff] %v10036_v31  ;;  %v14205_v57 = vand.u32 4294901760, %v9985_v59 }
  0x32   :  { %8466 = vmatprep.mubr.f32.mxu1 %v9886_v54  ;;  %v511_v45 = vsub.f32 %v9972_v35, %v14201_v32  ;;  %v178_v54 = vsel %vm86_vm0, %v59_v0, 0  ;;  %14208 = vst [vmem:[#allocation38_spill] sm:$0xff] %v10054_v56  ;;  %v531_v0 = vsub.f32 %v10005_v41, %v13837_v62  ;;  %14211 = vst [vmem:[#allocation40_spill] sm:$0xff] %v10071_v19  ;;  %v62_v62 = vld [vmem:[%s13776_s0 + $0x108] sm:$0xff] }
  0x33   :  { %8391 = vmatmul.mubr.f32.gmra.mxu0 %v472_v48  ;;  %v521_v32 = vsub.f32 %v9985_v59, %v14205_v57  ;;  %v60_v48 = vld [vmem:[%s13776_s0 + $0xf8] sm:$0xff]  ;;  %v10056_v58 = vand.u32 4294901760, %v178_v54  ;;  %v61_v57 = vld [vmem:[%s13776_s0 + $0x100] sm:$0xff]  ;;  %v187_v17 = vsel %vm86_vm0, %v62_v62, 0 }
  0x34   :  { %8393 = vmatprep.mubr.f32.mxu0 %v482_v8  ;;  %v512_v37 = vand.u32 4294901760, %v511_v45  ;;  %v10052_v8 = vsub.f32 %v169_v6, %v10032_v2  ;;  %v181_v6 = vsel %vm86_vm0, %v60_v48, 0  ;;  %v63_v48 = vld [vmem:[%s13776_s0 + $0x110] sm:$0xff]  ;;  %v551_v45 = vsub.f32 %v10030_v44, %v13844_v40 }
  0x35   :  { %8467 = vmatmul.mubr.f32.gmra.mxu1 %v9902_v42  ;;  %14209 = vst [vmem:[#allocation39_spill] sm:$0xff] %v10056_v58  ;;  %v14210_v42 = vand.u32 4294901760, %v10015_v60  ;;  %v10086_v23 = vand.u32 4294901760, %v181_v6  ;;  %v10118_v10 = vand.u32 4294901760, %v187_v17 }
  0x36   :  { %8469 = vmatprep.mubr.f32.mxu1 %v9908_v13  ;;  %14207 = vst [vmem:[#allocation37_spill] sm:$0xff] %v10052_v8  ;;  %v522_v13 = vand.u32 4294901760, %v521_v32  ;;  %v10081_v32 = vsub.f32 %v175_v52, %v10054_v56 }
  0x37   :  { %8394 = vmatmul.mubr.f32.gmra.mxu0 %v492_v51  ;;  %v541_v21 = vsub.f32 %v10015_v60, %v14210_v42  ;;  %v184_v51 = vsel %vm86_vm0, %v61_v57, 0  ;;  %v10084_v42 = vsub.f32 %v178_v54, %v10056_v58  ;;  %14214 = vst [vmem:[#allocation43_spill] sm:$0xff] %v10086_v23  ;;  %v532_v57 = vand.u32 4294901760, %v531_v0  ;;  %v64_v0 = vld [vmem:[%s13776_s0 + $0x118] sm:$0xff]  ;;  %14219 = vst [vmem:[#allocation46_spill] sm:$0xff] %v10118_v10 }
  0x38   :  { %8396 = vmatprep.mubr.f32.mxu0 %v502_v28  ;;  %14212 = vst [vmem:[#allocation41_spill] sm:$0xff] %v10081_v32  ;;  %v14215_v28 = vand.u32 4294901760, %v10036_v31  ;;  %v10113_v62 = vsub.f32 %v181_v6, %v10086_v23  ;;  %v552_v54 = vand.u32 4294901760, %v551_v45  ;;  %v193_v6 = vsel %vm86_vm0, %v64_v0, 0  ;;  %v67_v45 = vld [vmem:[%s13776_s0 + $0x130] sm:$0xff] }
  0x39   :  { %8470 = vmatmul.mubr.f32.gmra.mxu1 %v9910_v14  ;;  %14213 = vst [vmem:[#allocation42_spill] sm:$0xff] %v10084_v42  ;;  %v10098_v14 = vand.u32 4294901760, %v184_v51  ;;  %v14224_v0 = vand.u32 4294901760, %v10084_v42 }
  0x3a   :  { %8472 = vmatprep.mubr.f32.mxu1 %v9927_v3  ;;  %v561_v52 = vsub.f32 %v10036_v31, %v14215_v28  ;;  %v542_v3 = vand.u32 4294901760, %v541_v21  ;;  %v14217_v28 = vand.u32 4294901760, %v10052_v8  ;;  %14218 = vst [vmem:[#allocation45_spill] sm:$0xff] %v10113_v62  ;;  %v10146_v31 = vsub.f32 %v187_v17, %v10118_v10  ;;  %v68_v17 = vld [vmem:[%s13776_s0 + $0x138] sm:$0xff] }
  0x3b   :  { %8397 = vmatmul.mubr.f32.gmra.mxu0 %v512_v37  ;;  %14216 = vst [vmem:[#allocation44_spill] sm:$0xff] %v10098_v14  ;;  %v190_v37 = vsel %vm86_vm0, %v63_v48, 0  ;;  %v65_v48 = vld [vmem:[%s13776_s0 + $0x120] sm:$0xff] }
  0x3c   :  { %8399 = vmatprep.mubr.f32.mxu0 %v522_v13  ;;  %v571_v21 = vsub.f32 %v10052_v8, %v14217_v28  ;;  %v10124_v13 = vsub.f32 %v184_v51, %v10098_v14  ;;  %v10126_v40 = vand.u32 4294901760, %v190_v37  ;;  %v14223_v51 = vand.u32 4294901760, %v10081_v32 }
  0x3d   :  { %8473 = vmatmul.mubr.f32.gmra.mxu1 %v9944_v63  ;;  %v562_v63 = vand.u32 4294901760, %v561_v52  ;;  %v13869_v8 = vand.u32 4294901760, %v10113_v62 }
  0x3e   :  { %8475 = vmatprep.mubr.f32.mxu1 %v9962_v12  ;;  %v14220_v12 = vand.u32 4294901760, %v10071_v19  ;;  %14221 = vst [vmem:[#allocation47_spill] sm:$0xff] %v10124_v13  ;;  %14222 = vst [vmem:[#allocation48_spill] sm:$0xff] %v10126_v40  ;;  %v591_v52 = vsub.f32 %v10081_v32, %v14223_v51  ;;  %v10154_v32 = vsub.f32 %v190_v37, %v10126_v40  ;;  %v13880_v51 = vand.u32 4294901760, %v10146_v31 }
  0x3f   :  { %8400 = vmatmul.mubr.f32.gmra.mxu0 %v532_v57  ;;  %v66_v57 = vld [vmem:[%s13776_s0 + $0x128] sm:$0xff]  ;;  %v611_v37 = vsub.f32 %v10113_v62, %v13869_v8 }
  0x40   :  { %8402 = vmatprep.mubr.f32.mxu0 %v542_v3  ;;  %v581_v28 = vsub.f32 %v10071_v19, %v14220_v12  ;;  %v196_v3 = vsel %vm86_vm0, %v65_v48, 0  ;;  %v572_v12 = vand.u32 4294901760, %v571_v21  ;;  %v601_v19 = vsub.f32 %v10084_v42, %v14224_v0 }
  0x41   :  { %8476 = vmatmul.mubr.f32.gmra.mxu1 %v9980_v11  ;;  %v10148_v11 = vand.u32 4294901760, %v193_v6  ;;  %v199_v48 = vsel %vm86_vm0, %v66_v57, 0  ;;  %v202_v21 = vsel %vm86_vm0, %v67_v45, 0  ;;  %v10156_v0 = vand.u32 4294901760, %v196_v3 }
  0x42   :  { %8478 = vmatprep.mubr.f32.mxu1 %v9987_v18  ;;  %v582_v18 = vand.u32 4294901760, %v581_v28  ;;  %v10169_v28 = vand.u32 4294901760, %v199_v48  ;;  %v10171_v57 = vand.u32 4294901760, %v202_v21  ;;  %v602_v45 = vand.u32 4294901760, %v601_v19  ;;  %v70_v19 = vld [vmem:[%s13776_s0 + $0x148] sm:$0xff] }
  0x43   :  { %8403 = vmatmul.mubr.f32.gmra.mxu0 %v552_v54  ;;  %14225 = vst [vmem:[#allocation49_spill] sm:$0xff] %v10148_v11  ;;  %v69_v54 = vld [vmem:[%s13776_s0 + $0x140] sm:$0xff]  ;;  %v205_v42 = vsel %vm86_vm0, %v68_v17, 0  ;;  %v10183_v62 = vsub.f32 %v196_v3, %v10156_v0  ;;  %v71_v3 = vld [vmem:[%s13776_s0 + $0x150] sm:$0xff]  ;;  %v211_v44 = vsel %vm86_vm0, %v70_v19, 0 }
  0x44   :  { %8405 = vmatprep.mubr.f32.mxu0 %v562_v63  ;;  %v592_v63 = vand.u32 4294901760, %v591_v52  ;;  %14226 = vst [vmem:[#allocation50_spill] sm:$0xff] %v10169_v28  ;;  %v14228_v52 = vand.u32 4294901760, %v10124_v13  ;;  %v10197_v17 = vand.u32 4294901760, %v205_v42  ;;  %v73_v19 = vld [vmem:[%s13776_s0 + $0x160] sm:$0xff] }
  0x45   :  { %8479 = vmatmul.mubr.f32.gmra.mxu1 %v9999_v34  ;;  %v10175_v34 = vsub.f32 %v193_v6, %v10148_v11  ;;  %14229 = vst [vmem:[#allocation52_spill] sm:$0xff] %v10183_v62  ;;  %v10195_v6 = vsub.f32 %v202_v21, %v10171_v57  ;;  %v14232_v21 = vand.u32 4294901760, %v10154_v32 }
  0x46   :  { %8481 = vmatprep.mubr.f32.mxu1 %v10007_v55  ;;  %v621_v55 = vsub.f32 %v10124_v13, %v14228_v52  ;;  %v631_v52 = vsub.f32 %v10146_v31, %v13880_v51 }
  0x47   :  { %8406 = vmatmul.mubr.f32.gmra.mxu0 %v572_v12  ;;  %14227 = vst [vmem:[#allocation51_spill] sm:$0xff] %v10175_v34  ;;  %v208_v12 = vsel %vm86_vm0, %v69_v54, 0  ;;  %14231 = vst [vmem:[#allocation54_spill] sm:$0xff] %v10195_v6  ;;  %v612_v54 = vand.u32 4294901760, %v611_v37  ;;  %v13885_v8 = vand.u32 4294901760, %v10175_v34  ;;  %v72_v37 = vld [vmem:[%s13776_s0 + $0x158] sm:$0xff] }
  0x48   :  { %8408 = vmatprep.mubr.f32.mxu0 %v582_v18  ;;  %v10192_v18 = vsub.f32 %v199_v48, %v10169_v28  ;;  %v622_v48 = vand.u32 4294901760, %v621_v55  ;;  %v632_v51 = vand.u32 4294901760, %v631_v52  ;;  %v220_v52 = vsel %vm86_vm0, %v73_v19, 0  ;;  %v75_v19 = vld [vmem:[%s13776_s0 + $0x170] sm:$0xff] }
  0x49   :  { %8482 = vmatmul.mubr.f32.gmra.mxu1 %v10032_v2  ;;  %v641_v2 = vsub.f32 %v10154_v32, %v14232_v21  ;;  %v10222_v21 = vsub.f32 %v205_v42, %v10197_v17  ;;  %v14233_v42 = vand.u32 4294901760, %v10183_v62 }
  0x4a   :  { %8484 = vmatprep.mubr.f32.mxu1 %v10044_v30  ;;  %14230 = vst [vmem:[#allocation53_spill] sm:$0xff] %v10192_v18  ;;  %v10206_v30 = vand.u32 4294901760, %v208_v12 }
  0x4b   :  { %8409 = vmatmul.mubr.f32.gmra.mxu0 %v592_v63  ;;  %v214_v63 = vsel %vm86_vm0, %v71_v3, 0  ;;  %v651_v3 = vsub.f32 %v10175_v34, %v13885_v8  ;;  %v661_v55 = vsub.f32 %v10183_v62, %v14233_v42  ;;  %v14235_v42 = vand.u32 4294901760, %v10195_v6 }
  0x4c   :  { %8411 = vmatprep.mubr.f32.mxu0 %v602_v45  ;;  %v10231_v13 = vsub.f32 %v208_v12, %v10206_v30  ;;  %v642_v45 = vand.u32 4294901760, %v641_v2  ;;  %v74_v12 = vld [vmem:[%s13776_s0 + $0x168] sm:$0xff]  ;;  %v14234_v2 = vand.u32 4294901760, %v10192_v18 }
  0x4d   :  { %8485 = vmatmul.mubr.f32.gmra.mxu1 %v10054_v56  ;;  %v10238_v56 = vand.u32 4294901760, %v214_v63  ;;  %v681_v8 = vsub.f32 %v10195_v6, %v14235_v42  ;;  %v10266_v42 = vand.u32 4294901760, %v220_v52 }
  0x4e   :  { %8487 = vmatprep.mubr.f32.mxu1 %v10056_v58  ;;  %v10233_v58 = vand.u32 4294901760, %v211_v44  ;;  %v13902_v62 = vand.u32 4294901760, %v10231_v13 }
  0x4f   :  { %8412 = vmatmul.mubr.f32.gmra.mxu0 %v612_v54  ;;  %v217_v54 = vsel %vm86_vm0, %v72_v37, 0  ;;  %v223_v37 = vsel %vm86_vm0, %v74_v12, 0 }
  0x50   :  { %8414 = vmatprep.mubr.f32.mxu0 %v622_v48  ;;  %v671_v48 = vsub.f32 %v10192_v18, %v14234_v2  ;;  %v10261_v34 = vand.u32 4294901760, %v217_v54  ;;  %v662_v2 = vand.u32 4294901760, %v661_v55  ;;  %v10264_v18 = vsub.f32 %v214_v63, %v10238_v56 }
  0x51   :  { %8488 = vmatmul.mubr.f32.gmra.mxu1 %v10086_v23  ;;  %v652_v23 = vand.u32 4294901760, %v651_v3  ;;  %v14236_v55 = vand.u32 4294901760, %v10222_v21  ;;  %v701_v12 = vsub.f32 %v10231_v13, %v13902_v62  ;;  %v10285_v6 = vand.u32 4294901760, %v223_v37 }
  0x52   :  { %8490 = vmatprep.mubr.f32.mxu1 %v10098_v14  ;;  %v10259_v14 = vsub.f32 %v211_v44, %v10233_v58  ;;  %v76_v44 = vld [vmem:[%s13776_s0 + $0x178] sm:$0xff]  ;;  %v672_v3 = vand.u32 4294901760, %v671_v48 }
  0x53   :  { %8415 = vmatmul.mubr.f32.gmra.mxu0 %v632_v51  ;;  %v226_v51 = vsel %vm86_vm0, %v75_v19, 0  ;;  %v691_v63 = vsub.f32 %v10222_v21, %v14236_v55  ;;  %v10283_v19 = vsub.f32 %v217_v54, %v10261_v34  ;;  %v10301_v62 = vsub.f32 %v223_v37, %v10285_v6 }
  0x54   :  { %8417 = vmatprep.mubr.f32.mxu0 %v642_v45  ;;  %v682_v45 = vand.u32 4294901760, %v681_v8  ;;  %v10289_v8 = vsub.f32 %v220_v52, %v10266_v42  ;;  %v702_v48 = vand.u32 4294901760, %v701_v12 }
  0x55   :  { %8491 = vmatmul.mubr.f32.gmra.mxu1 %v10118_v10  ;;  %v13905_v10 = vand.u32 4294901760, %v10259_v14  ;;  %v692_v55 = vand.u32 4294901760, %v691_v63  ;;  %v750_v12 = vand.u32 4294901760, %v10301_v62 }
  0x56   :  { %8493 = vmatprep.mubr.f32.mxu1 %v10126_v40  ;;  %v10291_v40 = vand.u32 4294901760, %v226_v51  ;;  %v13908_v63 = vand.u32 4294901760, %v10289_v8 }
  0x57   :  { %8418 = vmatmul.mubr.f32.gmra.mxu0 %v652_v23  ;;  %v229_v23 = vsel %vm86_vm0, %v76_v44, 0  ;;  %v711_v54 = vsub.f32 %v10259_v14, %v13905_v10  ;;  %v14237_v44 = vand.u32 4294901760, %v10264_v18 }
  0x58   :  { %8420 = vmatprep.mubr.f32.mxu0 %v662_v2  ;;  %v730_v2 = vand.u32 4294901760, %v10283_v19  ;;  %v10303_v52 = vand.u32 4294901760, %v229_v23 }
  0x59   :  { %8494 = vmatmul.mubr.f32.gmra.mxu1 %v10148_v11  ;;  %v721_v11 = vsub.f32 %v10264_v18, %v14237_v44  ;;  %v712_v37 = vand.u32 4294901760, %v711_v54  ;;  %v751_v54 = vsub.f32 %v10301_v62, %v750_v12 }
  0x5a   :  { %8496 = vmatprep.mubr.f32.mxu1 %v10156_v0  ;;  %v10319_v10 = vsub.f32 %v229_v23, %v10303_v52 }
  0x5b   :  { %8421 = vmatmul.mubr.f32.gmra.mxu0 %v672_v3  ;;  %v10310_v3 = vsub.f32 %v226_v51, %v10291_v40  ;;  %v722_v44 = vand.u32 4294901760, %v721_v11  ;;  %v741_v51 = vsub.f32 %v10289_v8, %v13908_v63  ;;  %v752_v63 = vand.u32 4294901760, %v751_v54  ;;  %v14268_v54 = vld [vmem:[#allocation40_spill] sm:$0xff] }
  0x5c   :  { %8423 = vmatprep.mubr.f32.mxu0 %v682_v45  ;;  %v731_v45 = vsub.f32 %v10283_v19, %v730_v2  ;;  %v770_v23 = vand.u32 4294901760, %v10319_v10 }
  0x5d   :  { %8497 = vmatmul.mubr.f32.gmra.mxu1 %v10169_v28  ;;  %v760_v28 = vand.u32 4294901760, %v10310_v3  ;;  %v742_v11 = vand.u32 4294901760, %v741_v51  ;;  %v14238_v51 = vand.u32 4294901760, %v9679_v20 }
  0x5e   :  { %8499 = vmatprep.mubr.f32.mxu1 %v10171_v57 }
  0x5f   :  { %8424 = vmatmul.mubr.f32.gmra.mxu0 %v692_v55  ;;  %v732_v55 = vand.u32 4294901760, %v731_v45 }
  0x60   :  { %8426 = vmatprep.mubr.f32.mxu0 %v702_v48  ;;  %v761_v48 = vsub.f32 %v10310_v3, %v760_v28 }
  0x61   :  { %8500 = vmatmul.mubr.f32.gmra.mxu1 %v10197_v17 }
  0x62   :  { %8502 = vmatprep.mubr.f32.mxu1 %v10206_v30  ;;  %v762_v45 = vand.u32 4294901760, %v761_v48  ;;  %v14272_v48 = vld [vmem:[#allocation42_spill] sm:$0xff] }
  0x63   :  { %8427 = vmatmul.mubr.f32.gmra.mxu0 %v712_v37  ;;  %v771_v37 = vsub.f32 %v10319_v10, %v770_v23 }
  0x64   :  { %8429 = vmatprep.mubr.f32.mxu0 %v722_v44 }
  0x65   :  { %8503 = vmatmul.mubr.f32.gmra.mxu1 %v10233_v58  ;;  %v772_v44 = vand.u32 4294901760, %v771_v37 }
  0x66   :  { %8505 = vmatprep.mubr.f32.mxu1 %v10238_v56 }
  0x67   :  { %8430 = vmatmul.mubr.f32.gmra.mxu0 %v732_v55  ;;  %v14240_v55 = vand.u32 4294901760, %v9697_v27 }
  0x68   :  { %8432 = vmatprep.mubr.f32.mxu0 %v742_v11  ;;  %v14271_v11 = vld [vmem:[#allocation41_spill] sm:$0xff] }
  0x69   :  { %8506 = vmatmul.mubr.f32.gmra.mxu1 %v10261_v34  ;;  %v14273_v37 = vand.u32 4294901760, %v14271_v11 }
  0x6a   :  { %8508 = vmatprep.mubr.f32.mxu1 %v10266_v42 }
  0x6b   :  { %8433 = vmatmul.mubr.f32.gmra.mxu0 %v752_v63  ;;  %v14239_v63 = vand.u32 4294901760, %v9691_v25 }
  0x6c   :  { %8435 = vmatprep.mubr.f32.mxu0 %v762_v45  ;;  %v14274_v45 = vand.u32 4294901760, %v14272_v48 }
  0x6d   :  { %8509 = vmatmul.mubr.f32.gmra.mxu1 %v10285_v6 }
  0x6e   :  { %8511 = vmatprep.mubr.f32.mxu1 %v10291_v40 }
  0x6f   :  { %8436 = vmatmul.mubr.f32.gmra.mxu0 %v772_v44  ;;  %v14275_v44 = vld [vmem:[#allocation45_spill] sm:$0xff] }
  0x70   :  { %8518 = vmatprep.mubr.f32.mxu0 %v9679_v20  ;;  %v14241_v20 = vand.u32 4294901760, %v9702_v29 }
  0x71   :  { %8512 = vmatmul.mubr.f32.gmra.mxu1 %v10303_v52 }
  0x72   :  { %8594 = vmatprep.mubr.f32.mxu1 %v14238_v51  ;;  %v14276_v51 = vld [vmem:[#allocation47_spill] sm:$0xff] }
  0x73   :  { %8519 = vmatmul.mubr.f32.vlgmr.msra.gmra.mxu0 %v9691_v25  ;;  %v14244_v25 = vand.u32 4294901760, %v9773_v7 }
  0x74   :  { %8521 = vmatprep.mubr.f32.mxu0 %v9697_v27  ;;  %8667 = vmatpush3.msra.mxu0 %v9688_v24  ;;  %v14242_v24 = vand.u32 4294901760, %v9720_v38  ;;  %v14246_v27 = vand.u32 4294901760, %v9793_v22 }
  0x75   :  { %8595 = vmatmul.mubr.f32.vlgmr.msra.gmra.mxu1 %v14239_v63  ;;  %8668 = vmatprep.subr.mxu0 %v9694_v26  ;;  %v14277_v63 = vand.u32 4294901760, %v14275_v44 }
  0x76   :  { %8597 = vmatprep.mubr.f32.mxu1 %v14240_v55  ;;  %8743 = vmatpush3.msra.mxu1 %v9641_v4  ;;  %v14243_v4 = vand.u32 4294901760, %v9723_v39  ;;  %v14278_v55 = vand.u32 4294901760, %v14276_v51 }
  0x77   :  { %8522 = vmatmul.mubr.f32.gmra.mxu0 %v9702_v29  ;;  %8744 = vmatprep.subr.mxu1 %v9643_v5  ;;  %v14248_v29 = vand.u32 4294901760, %v9804_v16 }
  0x78   :  { %8524 = vmatprep.mubr.f32.mxu0 %v9720_v38  ;;  %8669 = vmatpush3.msra.mxu0 %v9694_v26  ;;  %v14245_v26 = vand.u32 4294901760, %v9779_v9  ;;  %v14249_v38 = vand.u32 4294901760, %v9814_v43 }
  0x79   :  { %8598 = vmatmul.mubr.f32.gmra.mxu1 %v14241_v20  ;;  %v14279_v20 = vand.u32 4294901760, %v10146_v31 }
  0x7a   :  { %8600 = vmatprep.mubr.f32.mxu1 %v14242_v24  ;;  %8745 = vmatpush3.msra.mxu1 %v9643_v5  ;;  %v14247_v5 = vand.u32 4294901760, %v9801_v36  ;;  %v14280_v24 = vand.u32 4294901760, %v10154_v32 }
  0x7b   :  { %8525 = vmatmul.mubr.f32.gmra.mxu0 %v9723_v39  ;;  %v14250_v39 = vand.u32 4294901760, %v9825_v50 }
  0x7c   :  { %8527 = vmatprep.mubr.f32.mxu0 %v9773_v7  ;;  %v14251_v7 = vand.u32 4294901760, %v9857_v1 }
  0x7d   :  { %8601 = vmatmul.mubr.f32.gmra.mxu1 %v14243_v4  ;;  %v14281_v4 = vld [vmem:[#allocation51_spill] sm:$0xff] }
  0x7e   :  { %8603 = vmatprep.mubr.f32.mxu1 %v14244_v25  ;;  %v14282_v25 = vld [vmem:[#allocation52_spill] sm:$0xff] }
  0x7f   :  { %8528 = vmatmul.mubr.f32.gmra.mxu0 %v9779_v9  ;;  %v14252_v9 = vand.u32 4294901760, %v9882_v53 }
  0x80   :  { %8530 = vmatprep.mubr.f32.mxu0 %v9793_v22  ;;  %v14253_v22 = vand.u32 4294901760, %v9897_v47 }
  0x81   :  { %8604 = vmatmul.mubr.f32.gmra.mxu1 %v14245_v26  ;;  %v14283_v26 = vand.u32 4294901760, %v14281_v4 }
  0x82   :  { %8606 = vmatprep.mubr.f32.mxu1 %v14246_v27  ;;  %v14284_v27 = vand.u32 4294901760, %v14282_v25 }
  0x83   :  { %8531 = vmatmul.mubr.f32.gmra.mxu0 %v9801_v36  ;;  %v14254_v36 = vand.u32 4294901760, %v9900_v46 }
  0x84   :  { %8533 = vmatprep.mubr.f32.mxu0 %v9804_v16  ;;  %v14255_v16 = vand.u32 4294901760, %v9919_v15 }
  0x85   :  { %8607 = vmatmul.mubr.f32.gmra.mxu1 %v14247_v5  ;;  %v14285_v5 = vld [vmem:[#allocation53_spill] sm:$0xff] }
  0x86   :  { %8609 = vmatprep.mubr.f32.mxu1 %v14248_v29  ;;  %v14286_v29 = vld [vmem:[#allocation54_spill] sm:$0xff] }
  0x87   :  { %8534 = vmatmul.mubr.f32.gmra.mxu0 %v9814_v43  ;;  %v14256_v43 = vand.u32 4294901760, %v9925_v49 }
  0x88   :  { %8536 = vmatprep.mubr.f32.mxu0 %v9825_v50  ;;  %v14261_v50 = vand.u32 4294901760, %v10005_v41 }
  0x89   :  { %8610 = vmatmul.mubr.f32.gmra.mxu1 %v14249_v38  ;;  %v14289_v38 = vand.u32 4294901760, %v10222_v21 }
  0x8a   :  { %8612 = vmatprep.mubr.f32.mxu1 %v14250_v39  ;;  %v14290_v39 = vand.u32 4294901760, %v10231_v13 }
  0x8b   :  { %8537 = vmatmul.mubr.f32.gmra.mxu0 %v9857_v1  ;;  %v14263_v1 = vld [vmem:[#allocation33_spill] sm:$0xff] }
  0x8c   :  { %8539 = vmatprep.mubr.f32.mxu0 %v9882_v53  ;;  %v14264_v53 = vld [vmem:[#allocation35_spill] sm:$0xff] }
  0x8d   :  { %8613 = vmatmul.mubr.f32.gmra.mxu1 %v14251_v7  ;;  %v14291_v7 = vand.u32 4294901760, %v10259_v14 }
  0x8e   :  { %8615 = vmatprep.mubr.f32.mxu1 %v14252_v9  ;;  %v14292_v9 = vand.u32 4294901760, %v10264_v18 }
  0x8f   :  { %8540 = vmatmul.mubr.f32.gmra.mxu0 %v9897_v47  ;;  %v14257_v47 = vand.u32 4294901760, %v9942_v61 }
  0x90   :  { %8542 = vmatprep.mubr.f32.mxu0 %v9900_v46  ;;  %v14258_v46 = vand.u32 4294901760, %v9956_v33 }
  0x91   :  { %8616 = vmatmul.mubr.f32.gmra.mxu1 %v14253_v22  ;;  %v14297_v22 = vld [vmem:[#allocation9_spill] sm:$0xff] }
  0x92   :  { %8618 = vmatprep.mubr.f32.mxu1 %v14254_v36 }
  0x93   :  { %8543 = vmatmul.mubr.f32.gmra.mxu0 %v9919_v15  ;;  %v14259_v15 = vand.u32 4294901760, %v9972_v35 }
  0x94   :  { %8545 = vmatprep.mubr.f32.mxu0 %v9925_v49  ;;  %v14260_v49 = vand.u32 4294901760, %v9985_v59 }
  0x95   :  { %8619 = vmatmul.mubr.f32.gmra.mxu1 %v14255_v16 }
  0x96   :  { %8621 = vmatprep.mubr.f32.mxu1 %v14256_v43  ;;  %v14298_v43 = vld [vmem:[#allocation10_spill] sm:$0xff] }
  0x97   :  { %8546 = vmatmul.mubr.f32.gmra.mxu0 %v9942_v61  ;;  %v14266_v61 = vand.u32 4294901760, %v14264_v53 }
  0x98   :  { %8548 = vmatprep.mubr.f32.mxu0 %v9956_v33  ;;  %v14262_v33 = vand.u32 4294901760, %v10015_v60 }
  0x99   :  { %8622 = vmatmul.mubr.f32.gmra.mxu1 %v14257_v47 }
  0x9a   :  { %8624 = vmatprep.mubr.f32.mxu1 %v14258_v46 }
  0x9b   :  { %8549 = vmatmul.mubr.f32.gmra.mxu0 %v9972_v35  ;;  %v14265_v35 = vand.u32 4294901760, %v14263_v1 }
  0x9c   :  { %8551 = vmatprep.mubr.f32.mxu0 %v9985_v59  ;;  %v14267_v59 = vld [vmem:[#allocation37_spill] sm:$0xff] }
  0x9d   :  { %8625 = vmatmul.mubr.f32.gmra.mxu1 %v14259_v15 }
  0x9e   :  { %8627 = vmatprep.mubr.f32.mxu1 %v14260_v49 }
  0x9f   :  { %8552 = vmatmul.mubr.f32.gmra.mxu0 %v10005_v41  ;;  %v14269_v41 = vand.u32 4294901760, %v14267_v59 }
  0xa0   :  { %8554 = vmatprep.mubr.f32.mxu0 %v10015_v60  ;;  %v14270_v60 = vand.u32 4294901760, %v14268_v54 }
  0xa1   :  { %8628 = vmatmul.mubr.f32.gmra.mxu1 %v14261_v50 }
  0xa2   :  { %8630 = vmatprep.mubr.f32.mxu1 %v14262_v33 }
  0xa3   :  { %8555 = vmatmul.mubr.f32.gmra.mxu0 %v14263_v1  ;;  %v14299_v1 = vld [vmem:[#allocation11_spill] sm:$0xff] }
  0xa4   :  { %8557 = vmatprep.mubr.f32.mxu0 %v14264_v53 }
  0xa5   :  { %8631 = vmatmul.mubr.f32.gmra.mxu1 %v14265_v35 }
  0xa6   :  { %8633 = vmatprep.mubr.f32.mxu1 %v14266_v61  ;;  %v14300_v61 = vld [vmem:[#allocation12_spill] sm:$0xff] }
  0xa7   :  { %8558 = vmatmul.mubr.f32.gmra.mxu0 %v14267_v59 }
  0xa8   :  { %8560 = vmatprep.mubr.f32.mxu0 %v14268_v54 }
  0xa9   :  { %8634 = vmatmul.mubr.f32.gmra.mxu1 %v14269_v41 }
  0xaa   :  { %8636 = vmatprep.mubr.f32.mxu1 %v14270_v60 }
  0xab   :  { %8561 = vmatmul.mubr.f32.gmra.mxu0 %v14271_v11 }
  0xac   :  { %8563 = vmatprep.mubr.f32.mxu0 %v14272_v48 }
  0xad   :  { %8637 = vmatmul.mubr.f32.gmra.mxu1 %v14273_v37  ;;  %v14301_v37 = vld [vmem:[#allocation13_spill] sm:$0xff] }
  0xae   :  { %8639 = vmatprep.mubr.f32.mxu1 %v14274_v45 }
  0xaf   :  { %8564 = vmatmul.mubr.f32.gmra.mxu0 %v14275_v44 }
  0xb0   :  { %8566 = vmatprep.mubr.f32.mxu0 %v14276_v51  ;;  %v14302_v51 = vld [vmem:[#allocation14_spill] sm:$0xff] }
  0xb1   :  { %8640 = vmatmul.mubr.f32.gmra.mxu1 %v14277_v63 }
  0xb2   :  { %8642 = vmatprep.mubr.f32.mxu1 %v14278_v55 }
  0xb3   :  { %8567 = vmatmul.mubr.f32.gmra.mxu0 %v10146_v31  ;;  %v14287_v31 = vand.u32 4294901760, %v14285_v5 }
  0xb4   :  { %8569 = vmatprep.mubr.f32.mxu0 %v10154_v32  ;;  %v14288_v32 = vand.u32 4294901760, %v14286_v29 }
  0xb5   :  { %8643 = vmatmul.mubr.f32.gmra.mxu1 %v14279_v20 }
  0xb6   :  { %8645 = vmatprep.mubr.f32.mxu1 %v14280_v24 }
  0xb7   :  { %8570 = vmatmul.mubr.f32.gmra.mxu0 %v14281_v4 }
  0xb8   :  { %8572 = vmatprep.mubr.f32.mxu0 %v14282_v25 }
  0xb9   :  { %8646 = vmatmul.mubr.f32.gmra.mxu1 %v14283_v26  ;;  %v14303_v26 = vld [vmem:[#allocation15_spill] sm:$0xff] }
  0xba   :  { %8648 = vmatprep.mubr.f32.mxu1 %v14284_v27 }
  0xbb   :  { %8573 = vmatmul.mubr.f32.gmra.mxu0 %v14285_v5 }
  0xbc   :  { %8575 = vmatprep.mubr.f32.mxu0 %v14286_v29  ;;  %v14304_v29 = vld [vmem:[#allocation16_spill] sm:$0xff] }
  0xbd   :  { %8649 = vmatmul.mubr.f32.gmra.mxu1 %v14287_v31 }
  0xbe   :  { %8651 = vmatprep.mubr.f32.mxu1 %v14288_v32 }
  0xbf   :  { %8576 = vmatmul.mubr.f32.gmra.mxu0 %v10222_v21 }
  0xc0   :  { %8578 = vmatprep.mubr.f32.mxu0 %v10231_v13  ;;  %v14293_v13 = vand.u32 4294901760, %v10289_v8 }
  0xc1   :  { %8652 = vmatmul.mubr.f32.gmra.mxu1 %v14289_v38 }
  0xc2   :  { %8654 = vmatprep.mubr.f32.mxu1 %v14290_v39 }
  0xc3   :  { %8579 = vmatmul.mubr.f32.gmra.mxu0 %v10259_v14  ;;  %v14294_v14 = vld [vmem:[#allocation6_spill] sm:$0xff] }
  0xc4   :  { %8581 = vmatprep.mubr.f32.mxu0 %v10264_v18  ;;  %v10498_v18 = vld [vmem:[%s13778_s2] ss:$0 sm:$0xff] }
  0xc5   :  { %8655 = vmatmul.mubr.f32.gmra.mxu1 %v14291_v7 }
  0xc6   :  { %8657 = vmatprep.mubr.f32.mxu1 %v14292_v9 }
  0xc7   :  { %8582 = vmatmul.mubr.f32.gmra.mxu0 %v10283_v19 }
  0xc8   :  { %8584 = vmatprep.mubr.f32.mxu0 %v10289_v8 }
  0xc9   :  { %8658 = vmatmul.mubr.f32.gmra.mxu1 %v730_v2 }
  0xca   :  { %8660 = vmatprep.mubr.f32.mxu1 %v14293_v13  ;;  %v14305_v13 = vld [vmem:[#allocation17_spill] sm:$0xff] }
  0xcb   :  { %8585 = vmatmul.mubr.f32.gmra.mxu0 %v10301_v62  ;;  %v14295_v62 = vld [vmem:[#allocation7_spill] sm:$0xff] }
  0xcc   :  { %8587 = vmatprep.mubr.f32.mxu0 %v10310_v3 }
  0xcd   :  { %8661 = vmatmul.mubr.f32.gmra.mxu1 %v750_v12 }
  0xce   :  { %8663 = vmatprep.mubr.f32.mxu1 %v760_v28  ;;  %v14296_v28 = vld [vmem:[#allocation8_spill] sm:$0xff] }
  0xcf   :  { %8588 = vmatmul.mubr.f32.gmra.mxu0 %v10319_v10 }
  0xd0   :  { %8670 = vmatprep.mubr.f32.mxu0 %v14294_v14 }
  0xd1   :  { %8664 = vmatmul.mubr.f32.gmra.mxu1 %v770_v23  ;;  %v8368_v21 = vpop.f32.mrf.mxu0 }
  0xd2   :  { %8746 = vmatprep.mubr.f32.mxu1 %v14294_v14  ;;  %v315_v19 = vadd.f32 %v8368_v21, %v10498_v18  ;;  %v8444_v2 = vpop.f32.mrf.mxu1 }
  0xd3   :  { %8671 = vmatmul.mubr.f32.vlgmr.msra.gmra.mxu0 %v14295_v62  ;;  %v304_v8 = vpop.f32.mrf.mxu0 }
  0xd4   :  { %8673 = vmatprep.mubr.f32.mxu0 %v14296_v28  ;;  %v305_v10 = vadd.f32 %v10498_v18, %v304_v8  ;;  %v10506_v3 = vadd.f32 %v8444_v2, %v315_v19  ;;  %v855_v23 = vpop.f32.mrf.mxu1  ;;  %v2862_v19 = vld [vmem:[%s13779_s3 + $0x38] sm:$0xff] }
  0xd5   :  { %8747 = vmatmul.mubr.f32.vlgmr.msra.gmra.mxu1 %v14295_v62  ;;  %v8371_v12 = vpop.f32.mrf.mxu0  ;;  %v14306_v62 = vld [vmem:[#allocation18_spill] sm:$0xff]  ;;  %v10558_v2 = vand.u32 4294901760, %v2862_v19 }
  0xd6   :  { %8749 = vmatprep.mubr.f32.mxu1 %v14296_v28  ;;  %v335_v36 = vadd.f32 %v8371_v12, %v10498_v18  ;;  %v10511_v16 = vadd.f32 %v855_v23, %v305_v10 }
  0xd7   :  { %8674 = vmatmul.mubr.f32.gmra.mxu0 %v14297_v22  ;;  %v324_v47 = vpop.f32.mrf.mxu0  ;;  %14307 = vst [vmem:[#allocation33_spill] sm:$0xff] %v10558_v2  ;;  %8818 = vmatprep.subr.mxu0 %v10558_v2 }
  0xd8   :  { %8676 = vmatprep.mubr.f32.mxu0 %v14298_v43  ;;  %v325_v15 = vadd.f32 %v10498_v18, %v324_v47  ;;  %8819 = vmatpush3.msra.mxu0 %v10558_v2 }
  0xd9   :  { %v8447_v46 = vpop.f32.mrf.mxu1  ;;  %8750 = vmatmul.mubr.f32.gmra.mxu1 %v14297_v22 }
  0xda   :  { %v10516_v49 = vadd.f32 %v8447_v46, %v335_v36  ;;  %8752 = vmatprep.mubr.f32.mxu1 %v14298_v43  ;;  %v14308_v36 = vld [vmem:[#allocation19_spill] sm:$0xff]  ;;  %v10567_v43 = vsub.f32 %v2862_v19, %v10558_v2 }
  0xdb   :  { %v8374_v50 = vpop.f32.mrf.mxu0  ;;  %v867_v33 = vpop.f32.mrf.mxu1  ;;  %8677 = vmatmul.mubr.f32.gmra.mxu0 %v14299_v1 }
  0xdc   :  { %v355_v53 = vadd.f32 %v8374_v50, %v10498_v18  ;;  %v10521_v35 = vadd.f32 %v867_v33, %v325_v15  ;;  %8679 = vmatprep.mubr.f32.mxu0 %v14300_v61  ;;  %14309 = vst [vmem:[#allocation35_spill] sm:$0xff] %v10567_v43  ;;  %v14310_v15 = vld [vmem:[#allocation20_spill] sm:$0xff] }
  0xdd   :  { %v344_v59 = vpop.f32.mrf.mxu0  ;;  %v8450_v54 = vpop.f32.mrf.mxu1  ;;  %8753 = vmatmul.mubr.f32.gmra.mxu1 %v14299_v1  ;;  %v10576_v1 = vand.u32 4294901760, %v10567_v43 }
  0xde   :  { %v345_v41 = vadd.f32 %v10498_v18, %v344_v59  ;;  %v10526_v60 = vadd.f32 %v8450_v54, %v355_v53  ;;  %8755 = vmatprep.mubr.f32.mxu1 %v14300_v61 }
  0xdf   :  { %v8377_v11 = vpop.f32.mrf.mxu0  ;;  %v879_v48 = vpop.f32.mrf.mxu1  ;;  %8680 = vmatmul.mubr.f32.gmra.mxu0 %v14301_v37  ;;  %14311 = vst [vmem:[#allocation37_spill] sm:$0xff] %v10576_v1 }
  0xe0   :  { %v375_v45 = vadd.f32 %v8377_v11, %v10498_v18  ;;  %v10531_v44 = vadd.f32 %v879_v48, %v345_v41  ;;  %8682 = vmatprep.mubr.f32.mxu0 %v14302_v51  ;;  %v14312_v41 = vld [vmem:[#allocation21_spill] sm:$0xff]  ;;  %v3588_v11 = vsub.f32 %v10567_v43, %v10576_v1 }
  0xe1   :  { %v364_v63 = vpop.f32.mrf.mxu0  ;;  %v8453_v55 = vpop.f32.mrf.mxu1  ;;  %8756 = vmatmul.mubr.f32.gmra.mxu1 %v14301_v37 }
  0xe2   :  { %v365_v20 = vadd.f32 %v10498_v18, %v364_v63  ;;  %v10536_v24 = vadd.f32 %v8453_v55, %v375_v45  ;;  %8758 = vmatprep.mubr.f32.mxu1 %v14302_v51  ;;  %v14313_v45 = vld [vmem:[#allocation22_spill] sm:$0xff]  ;;  %v3589_v55 = vand.u32 4294901760, %v3588_v11 }
  0xe3   :  { %v8380_v4 = vpop.f32.mrf.mxu0  ;;  %v891_v25 = vpop.f32.mrf.mxu1  ;;  %8683 = vmatmul.mubr.f32.gmra.mxu0 %v14303_v26 }
  0xe4   :  { %v395_v27 = vadd.f32 %v8380_v4, %v10498_v18  ;;  %v10541_v5 = vadd.f32 %v891_v25, %v365_v20  ;;  %8685 = vmatprep.mubr.f32.mxu0 %v14304_v29  ;;  %8906 = vmatprep.subr.mxu1 %v3589_v55 }
  0xe5   :  { %v384_v31 = vpop.f32.mrf.mxu0  ;;  %v8456_v32 = vpop.f32.mrf.mxu1  ;;  %8759 = vmatmul.mubr.f32.gmra.mxu1 %v14303_v26 }
  0xe6   :  { %v385_v38 = vadd.f32 %v10498_v18, %v384_v31  ;;  %v10546_v39 = vadd.f32 %v8456_v32, %v395_v27  ;;  %8761 = vmatprep.mubr.f32.mxu1 %v14304_v29  ;;  %v14314_v27 = vld [vmem:[#allocation23_spill] sm:$0xff]  ;;  %v14315_v32 = vld [vmem:[#allocation24_spill] sm:$0xff]  ;;  %8907 = vmatpush3.msra.mxu1 %v3589_v55 }
  0xe7   :  { %v8383_v7 = vpop.f32.mrf.mxu0  ;;  %v903_v9 = vpop.f32.mrf.mxu1  ;;  %8686 = vmatmul.mubr.f32.gmra.mxu0 %v14305_v13 }
  0xe8   :  { %v415_v14 = vadd.f32 %v8383_v7, %v10498_v18  ;;  %v10551_v21 = vadd.f32 %v903_v9, %v385_v38  ;;  %8688 = vmatprep.mubr.f32.mxu0 %v14306_v62  ;;  %v2861_v38 = vld [vmem:[%s13779_s3 + $0x30] sm:$0xff] }
  0xe9   :  { %v404_v28 = vpop.f32.mrf.mxu0  ;;  %v8459_v8 = vpop.f32.mrf.mxu1  ;;  %8762 = vmatmul.mubr.f32.gmra.mxu1 %v14305_v13  ;;  %v10603_v13 = vand.u32 4294901760, %v2861_v38 }
  0xea   :  { %v405_v10 = vadd.f32 %v10498_v18, %v404_v28  ;;  %v10561_v12 = vadd.f32 %v8459_v8, %v415_v14  ;;  %8764 = vmatprep.mubr.f32.mxu1 %v14306_v62  ;;  %v14317_v8 = vld [vmem:[#allocation25_spill] sm:$0xff] }
  0xeb   :  { %v8386_v23 = vpop.f32.mrf.mxu0  ;;  %v915_v22 = vpop.f32.mrf.mxu1  ;;  %8689 = vmatmul.mubr.f32.gmra.mxu0 %v14308_v36  ;;  %14316 = vst [vmem:[#allocation40_spill] sm:$0xff] %v10603_v13  ;;  %8820 = vmatprep.subr.mxu0 %v10603_v13 }
  0xec   :  { %v435_v47 = vadd.f32 %v8386_v23, %v10498_v18  ;;  %v10570_v46 = vadd.f32 %v915_v22, %v405_v10  ;;  %8691 = vmatprep.mubr.f32.mxu0 %v14310_v15  ;;  %v10612_v10 = vsub.f32 %v2861_v38, %v10603_v13  ;;  %8821 = vmatpush3.msra.mxu0 %v10603_v13  ;;  %v14356_v13 = vld [vmem:[#allocation49_spill] sm:$0xff] }
  0xed   :  { %v424_v50 = vpop.f32.mrf.mxu0  ;;  %v8462_v33 = vpop.f32.mrf.mxu1  ;;  %8765 = vmatmul.mubr.f32.gmra.mxu1 %v14308_v36  ;;  %v14320_v36 = vld [vmem:[#allocation26_spill] sm:$0xff] }
  0xee   :  { %v425_v53 = vadd.f32 %v10498_v18, %v424_v50  ;;  %v10579_v61 = vadd.f32 %v8462_v33, %v435_v47  ;;  %8767 = vmatprep.mubr.f32.mxu1 %v14310_v15  ;;  %14318 = vst [vmem:[#allocation41_spill] sm:$0xff] %v10612_v10  ;;  %v10621_v50 = vand.u32 4294901760, %v10612_v10 }
  0xef   :  { %v8389_v59 = vpop.f32.mrf.mxu0  ;;  %v927_v54 = vpop.f32.mrf.mxu1  ;;  %8692 = vmatmul.mubr.f32.gmra.mxu0 %v14312_v41 }
  0xf0   :  { %v455_v48 = vadd.f32 %v8389_v59, %v10498_v18  ;;  %v10586_v37 = vadd.f32 %v927_v54, %v425_v53  ;;  %8694 = vmatprep.mubr.f32.mxu0 %v14313_v45  ;;  %14321 = vst [vmem:[#allocation45_spill] sm:$0xff] %v10621_v50  ;;  %v3595_v11 = vsub.f32 %v10612_v10, %v10621_v50 }
  0xf1   :  { %v444_v51 = vpop.f32.mrf.mxu0  ;;  %v8465_v63 = vpop.f32.mrf.mxu1  ;;  %8768 = vmatmul.mubr.f32.gmra.mxu1 %v14312_v41  ;;  %v14322_v41 = vld [vmem:[#allocation27_spill] sm:$0xff] }
  0xf2   :  { %v445_v20 = vadd.f32 %v10498_v18, %v444_v51  ;;  %v10591_v4 = vadd.f32 %v8465_v63, %v455_v48  ;;  %8770 = vmatprep.mubr.f32.mxu1 %v14313_v45  ;;  %v14324_v51 = vld [vmem:[#allocation28_spill] sm:$0xff] }
  0xf3   :  { %v8392_v25 = vpop.f32.mrf.mxu0  ;;  %v939_v26 = vpop.f32.mrf.mxu1  ;;  %8695 = vmatmul.mubr.f32.gmra.mxu0 %v14314_v27 }
  0xf4   :  { %v475_v29 = vadd.f32 %v8392_v25, %v10498_v18  ;;  %v10596_v31 = vadd.f32 %v939_v26, %v445_v20  ;;  %8697 = vmatprep.mubr.f32.mxu0 %v14315_v32  ;;  %v3596_v20 = vand.u32 4294901760, %v3595_v11  ;;  %v14332_v11 = vld [vmem:[#allocation32_spill] sm:$0xff] }
  0xf5   :  { %v464_v7 = vpop.f32.mrf.mxu0  ;;  %v8468_v9 = vpop.f32.mrf.mxu1  ;;  %8771 = vmatmul.mubr.f32.gmra.mxu1 %v14314_v27 }
  0xf6   :  { %v465_v14 = vadd.f32 %v10498_v18, %v464_v7  ;;  %v10606_v62 = vadd.f32 %v8468_v9, %v475_v29  ;;  %8773 = vmatprep.mubr.f32.mxu1 %v14315_v32  ;;  %v14325_v32 = vld [vmem:[#allocation29_spill] sm:$0xff]  ;;  %8908 = vmatprep.subr.mxu1 %v3596_v20  ;;  %v14327_v9 = vld [vmem:[#allocation30_spill] sm:$0xff] }
  0xf7   :  { %v8395_v19 = vpop.f32.mrf.mxu0  ;;  %v951_v28 = vpop.f32.mrf.mxu1  ;;  %8698 = vmatmul.mubr.f32.gmra.mxu0 %v14317_v8  ;;  %8909 = vmatpush3.msra.mxu1 %v3596_v20 }
  0xf8   :  { %v495_v23 = vadd.f32 %v8395_v19, %v10498_v18  ;;  %v10615_v22 = vadd.f32 %v951_v28, %v465_v14  ;;  %8700 = vmatprep.mubr.f32.mxu0 %v14320_v36  ;;  %v2860_v14 = vld [vmem:[%s13779_s3 + $0x28] sm:$0xff] }
  0xf9   :  { %v484_v47 = vpop.f32.mrf.mxu0  ;;  %v8471_v15 = vpop.f32.mrf.mxu1  ;;  %8774 = vmatmul.mubr.f32.gmra.mxu1 %v14317_v8  ;;  %v10648_v8 = vand.u32 4294901760, %v2860_v14 }
  0xfa   :  { %14319 = vst [vmem:[#allocation42_spill] sm:$0xff] %v10615_v22  ;;  %v485_v33 = vadd.f32 %v10498_v18, %v484_v47  ;;  %v10624_v53 = vadd.f32 %v8471_v15, %v495_v23  ;;  %8776 = vmatprep.mubr.f32.mxu1 %v14320_v36 }
  0xfb   :  { %v8398_v59 = vpop.f32.mrf.mxu0  ;;  %v963_v54 = vpop.f32.mrf.mxu1  ;;  %8701 = vmatmul.mubr.f32.gmra.mxu0 %v14322_v41  ;;  %14328 = vst [vmem:[#allocation52_spill] sm:$0xff] %v10648_v8  ;;  %8822 = vmatprep.subr.mxu0 %v10648_v8 }
  0xfc   :  { %v515_v48 = vadd.f32 %v8398_v59, %v10498_v18  ;;  %v10631_v45 = vadd.f32 %v963_v54, %v485_v33  ;;  %8703 = vmatprep.mubr.f32.mxu0 %v14324_v51  ;;  %v14329_v33 = vld [vmem:[#allocation31_spill] sm:$0xff]  ;;  %v10657_v59 = vsub.f32 %v2860_v14, %v10648_v8  ;;  %8823 = vmatpush3.msra.mxu0 %v10648_v8  ;;  %v14336_v14 = vld [vmem:[#allocation36_spill] sm:$0xff] }
  0xfd   :  { %v504_v63 = vpop.f32.mrf.mxu0  ;;  %v8474_v55 = vpop.f32.mrf.mxu1  ;;  %8777 = vmatmul.mubr.f32.gmra.mxu1 %v14322_v41 }
  0xfe   :  { %14323 = vst [vmem:[#allocation47_spill] sm:$0xff] %v10631_v45  ;;  %v505_v25 = vadd.f32 %v10498_v18, %v504_v63  ;;  %v10636_v26 = vadd.f32 %v8474_v55, %v515_v48  ;;  %8779 = vmatprep.mubr.f32.mxu1 %v14324_v51  ;;  %14330 = vst [vmem:[#allocation53_spill] sm:$0xff] %v10657_v59  ;;  %v10666_v63 = vand.u32 4294901760, %v10657_v59 }
  0xff   :  { %v8401_v27 = vpop.f32.mrf.mxu0  ;;  %v975_v29 = vpop.f32.mrf.mxu1  ;;  %8704 = vmatmul.mubr.f32.gmra.mxu0 %v14325_v32 }
 0x100   :  { %v535_v38 = vadd.f32 %v8401_v27, %v10498_v18  ;;  %v10641_v7 = vadd.f32 %v975_v29, %v505_v25  ;;  %8706 = vmatprep.mubr.f32.mxu0 %v14327_v9  ;;  %14333 = vst [vmem:[#allocation6_spill] sm:$0xff] %v10666_v63  ;;  %v14334_v29 = vld [vmem:[#allocation34_spill] sm:$0xff] }
 0x101   :  { %v524_v19 = vpop.f32.mrf.mxu0  ;;  %v8477_v28 = vpop.f32.mrf.mxu1  ;;  %8780 = vmatmul.mubr.f32.gmra.mxu1 %v14325_v32  ;;  %v3602_v32 = vsub.f32 %v10657_v59, %v10666_v63  ;;  %v14349_v59 = vld [vmem:[#allocation46_spill] sm:$0xff] }
 0x102   :  { %14326 = vst [vmem:[#allocation51_spill] sm:$0xff] %v10641_v7  ;;  %v525_v23 = vadd.f32 %v10498_v18, %v524_v19  ;;  %v10651_v36 = vadd.f32 %v8477_v28, %v535_v38  ;;  %8782 = vmatprep.mubr.f32.mxu1 %v14327_v9 }
 0x103   :  { %v8404_v47 = vpop.f32.mrf.mxu0  ;;  %v987_v15 = vpop.f32.mrf.mxu1  ;;  %8707 = vmatmul.mubr.f32.gmra.mxu0 %v14329_v33 }
 0x104   :  { %v555_v54 = vadd.f32 %v8404_v47, %v10498_v18  ;;  %v10660_v41 = vadd.f32 %v987_v15, %v525_v23  ;;  %8709 = vmatprep.mubr.f32.mxu0 %v14332_v11  ;;  %v3603_v23 = vand.u32 4294901760, %v3602_v32 }
 0x105   :  { %v544_v48 = vpop.f32.mrf.mxu0  ;;  %v8480_v51 = vpop.f32.mrf.mxu1  ;;  %8783 = vmatmul.mubr.f32.gmra.mxu1 %v14329_v33 }
 0x106   :  { %14331 = vst [vmem:[#allocation54_spill] sm:$0xff] %v10660_v41  ;;  %v545_v55 = vadd.f32 %v10498_v18, %v544_v48  ;;  %v10669_v20 = vadd.f32 %v8480_v51, %v555_v54  ;;  %8785 = vmatprep.mubr.f32.mxu1 %v14332_v11  ;;  %v14337_v11 = vld [vmem:[#allocation38_spill] sm:$0xff]  ;;  %8910 = vmatprep.subr.mxu1 %v3603_v23 }
 0x107   :  { %v8407_v25 = vpop.f32.mrf.mxu0  ;;  %v999_v27 = vpop.f32.mrf.mxu1  ;;  %8710 = vmatmul.mubr.f32.gmra.mxu0 %v14334_v29  ;;  %8911 = vmatpush3.msra.mxu1 %v3603_v23 }
 0x108   :  { %v575_v38 = vadd.f32 %v8407_v25, %v10498_v18  ;;  %v10676_v9 = vadd.f32 %v999_v27, %v545_v55  ;;  %8712 = vmatprep.mubr.f32.mxu0 %v14336_v14  ;;  %v14339_v55 = vld [vmem:[#allocation39_spill] sm:$0xff]  ;;  %v2859_v25 = vld [vmem:[%s13779_s3 + $0x20] sm:$0xff] }
 0x109   :  { %v564_v19 = vpop.f32.mrf.mxu0  ;;  %v8483_v28 = vpop.f32.mrf.mxu1  ;;  %8786 = vmatmul.mubr.f32.gmra.mxu1 %v14334_v29  ;;  %v10693_v32 = vand.u32 4294901760, %v2859_v25 }
 0x10a   :  { %14335 = vst [vmem:[#allocation7_spill] sm:$0xff] %v10676_v9  ;;  %v565_v47 = vadd.f32 %v10498_v18, %v564_v19  ;;  %v10681_v15 = vadd.f32 %v8483_v28, %v575_v38  ;;  %8788 = vmatprep.mubr.f32.mxu1 %v14336_v14  ;;  %v2858_v19 = vld [vmem:[%s13779_s3 + $0x18] sm:$0xff] }
 0x10b   :  { %v8410_v33 = vpop.f32.mrf.mxu0  ;;  %v1011_v54 = vpop.f32.mrf.mxu1  ;;  %8713 = vmatmul.mubr.f32.gmra.mxu0 %v14337_v11  ;;  %14340 = vst [vmem:[#allocation9_spill] sm:$0xff] %v10693_v32  ;;  %8824 = vmatprep.subr.mxu0 %v10693_v32 }
 0x10c   :  { %v595_v48 = vadd.f32 %v8410_v33, %v10498_v18  ;;  %v10686_v51 = vadd.f32 %v1011_v54, %v565_v47  ;;  %8715 = vmatprep.mubr.f32.mxu0 %v14339_v55  ;;  %v14341_v47 = vld [vmem:[#allocation43_spill] sm:$0xff]  ;;  %v10705_v33 = vsub.f32 %v2859_v25, %v10693_v32  ;;  %v10707_v54 = vand.u32 4294901760, %v2858_v19  ;;  %8825 = vmatpush3.msra.mxu0 %v10693_v32 }
 0x10d   :  { %v584_v27 = vpop.f32.mrf.mxu0  ;;  %v8486_v29 = vpop.f32.mrf.mxu1  ;;  %8789 = vmatmul.mubr.f32.gmra.mxu1 %v14337_v11  ;;  %v2857_v25 = vld [vmem:[%s13779_s3 + $0x10] sm:$0xff] }
 0x10e   :  { %14338 = vst [vmem:[#allocation8_spill] sm:$0xff] %v10686_v51  ;;  %v585_v38 = vadd.f32 %v10498_v18, %v584_v27  ;;  %v10696_v14 = vadd.f32 %v8486_v29, %v595_v48  ;;  %8791 = vmatprep.mubr.f32.mxu1 %v14339_v55  ;;  %14342 = vst [vmem:[#allocation10_spill] sm:$0xff] %v10705_v33  ;;  %v14345_v55 = vld [vmem:[#allocation44_spill] sm:$0xff]  ;;  %v10716_v63 = vand.u32 4294901760, %v10705_v33  ;;  %8826 = vmatprep.subr.mxu0 %v10707_v54 }
 0x10f   :  { %v8413_v28 = vpop.f32.mrf.mxu0  ;;  %v1023_v23 = vpop.f32.mrf.mxu1  ;;  %8716 = vmatmul.mubr.f32.gmra.mxu0 %v14341_v47  ;;  %14343 = vst [vmem:[#allocation11_spill] sm:$0xff] %v10707_v54 }
 0x110   :  { %v615_v11 = vadd.f32 %v8413_v28, %v10498_v18  ;;  %v10710_v48 = vadd.f32 %v1023_v23, %v585_v38  ;;  %8718 = vmatprep.mubr.f32.mxu0 %v14345_v55  ;;  %14346 = vst [vmem:[#allocation13_spill] sm:$0xff] %v10716_v63  ;;  %8827 = vmatpush3.msra.mxu0 %v10707_v54 }
 0x111   :  { %v604_v27 = vpop.f32.mrf.mxu0  ;;  %v8489_v29 = vpop.f32.mrf.mxu1  ;;  %8792 = vmatmul.mubr.f32.gmra.mxu1 %v14341_v47  ;;  %v10728_v23 = vsub.f32 %v2858_v19, %v10707_v54  ;;  %v10730_v47 = vand.u32 4294901760, %v2857_v25  ;;  %v3609_v10 = vsub.f32 %v10705_v33, %v10716_v63 }
 0x112   :  { %14344 = vst [vmem:[#allocation12_spill] sm:$0xff] %v10710_v48  ;;  %v605_v38 = vadd.f32 %v10498_v18, %v604_v27  ;;  %v10723_v28 = vadd.f32 %v8489_v29, %v615_v11  ;;  %8794 = vmatprep.mubr.f32.mxu1 %v14345_v55  ;;  %v2856_v11 = vld [vmem:[%s13779_s3 + $0x8] sm:$0xff]  ;;  %v14351_v29 = vld [vmem:[#allocation48_spill] sm:$0xff] }
 0x113   :  { %14347 = vst [vmem:[#allocation14_spill] sm:$0xff] %v10728_v23  ;;  %14348 = vst [vmem:[#allocation15_spill] sm:$0xff] %v10730_v47  ;;  %v8416_v50 = vpop.f32.mrf.mxu0  ;;  %v1035_v1 = vpop.f32.mrf.mxu1  ;;  %8719 = vmatmul.mubr.f32.gmra.mxu0 %v14349_v59  ;;  %v10743_v19 = vand.u32 4294901760, %v10728_v23  ;;  %v10746_v54 = vsub.f32 %v2857_v25, %v10730_v47  ;;  %8828 = vmatprep.subr.mxu0 %v10730_v47  ;;  %v3610_v33 = vand.u32 4294901760, %v3609_v10  ;;  %v10752_v8 = vand.u32 4294901760, %v2856_v11 }
 0x114   :  { %v635_v55 = vadd.f32 %v8416_v50, %v10498_v18  ;;  %v10739_v27 = vadd.f32 %v1035_v1, %v605_v38  ;;  %8721 = vmatprep.mubr.f32.mxu0 %v14351_v29  ;;  %8829 = vmatpush3.msra.mxu0 %v10730_v47  ;;  %v2855_v38 = vld [vmem:[%s13779_s3] sm:$0xff] }
 0x115   :  { %14352 = vst [vmem:[#allocation17_spill] sm:$0xff] %v10743_v19  ;;  %14353 = vst [vmem:[#allocation18_spill] sm:$0xff] %v10746_v54  ;;  %v10749_v32 = vpop.f32.mrf.mxu0  ;;  %v8492_v63 = vpop.f32.mrf.mxu1  ;;  %8795 = vmatmul.mubr.f32.gmra.mxu1 %v14349_v59  ;;  %v3616_v50 = vsub.f32 %v10728_v23, %v10743_v19  ;;  %v10761_v25 = vand.u32 4294901760, %v10746_v54  ;;  %8912 = vmatprep.subr.mxu1 %v3610_v33 }
 0x116   :  { %14350 = vst [vmem:[#allocation16_spill] sm:$0xff] %v10739_v27  ;;  %14354 = vst [vmem:[#allocation19_spill] sm:$0xff] %v10752_v8  ;;  %v10755_v1 = vadd.f32 %v8492_v63, %v635_v55  ;;  %8797 = vmatprep.mubr.f32.mxu1 %v14351_v29  ;;  %v10770_v63 = vsub.f32 %v2856_v11, %v10752_v8  ;;  %v10772_v55 = vand.u32 4294901760, %v2855_v38  ;;  %8913 = vmatpush3.msra.mxu1 %v3610_v33 }
 0x117   :  { %14355 = vst [vmem:[#allocation20_spill] sm:$0xff] %v10761_v25  ;;  %v8419_v59 = vpop.f32.mrf.mxu0  ;;  %v10766_v10 = vpop.f32.mrf.mxu1  ;;  %8722 = vmatmul.mubr.f32.gmra.mxu0 %v14356_v13  ;;  %v3617_v19 = vand.u32 4294901760, %v3616_v50  ;;  %v3623_v23 = vsub.f32 %v10746_v54, %v10761_v25  ;;  %8830 = vmatprep.subr.mxu0 %v10752_v8  ;;  %v14361_v54 = vld [vmem:[#allocation50_spill] sm:$0xff] }
 0x118   :  { %14357 = vst [vmem:[#allocation21_spill] sm:$0xff] %v10770_v63  ;;  %14358 = vst [vmem:[#allocation22_spill] sm:$0xff] %v10772_v55  ;;  %v655_v29 = vadd.f32 %v8419_v59, %v10498_v18  ;;  %8724 = vmatprep.mubr.f32.mxu0 %v10156_v0  ;;  %v10782_v48 = vand.u32 4294901760, %v10770_v63  ;;  %v10785_v11 = vsub.f32 %v2855_v38, %v10772_v55  ;;  %8831 = vmatpush3.msra.mxu0 %v10752_v8 }
 0x119   :  { %v10778_v47 = vpop.f32.mrf.mxu0  ;;  %v8495_v27 = vpop.f32.mrf.mxu1  ;;  %8798 = vmatmul.mubr.f32.gmra.mxu1 %v14356_v13  ;;  %8914 = vmatprep.subr.mxu1 %v3617_v19  ;;  %v3624_v33 = vand.u32 4294901760, %v3623_v23 }
 0x11a   :  { %14359 = vst [vmem:[#allocation23_spill] sm:$0xff] %v10782_v48  ;;  %14360 = vst [vmem:[#allocation24_spill] sm:$0xff] %v10785_v11  ;;  %v10788_v59 = vadd.f32 %v8495_v27, %v655_v29  ;;  %8800 = vmatprep.mubr.f32.mxu1 %v10156_v0  ;;  %8915 = vmatpush3.msra.mxu1 %v3617_v19  ;;  %v3630_v13 = vsub.f32 %v10770_v63, %v10782_v48  ;;  %v10797_v38 = vand.u32 4294901760, %v10785_v11 }
 0x11b   :  { %v8422_v50 = vpop.f32.mrf.mxu0  ;;  %v10791_v25 = vpop.f32.mrf.mxu1  ;;  %8725 = vmatmul.mubr.f32.gmra.mxu0 %v14361_v54  ;;  %8916 = vmatprep.subr.mxu1 %v3624_v33 }
 0x11c   :  { %14362 = vst [vmem:[#allocation25_spill] sm:$0xff] %v10797_v38  ;;  %v675_v51 = vadd.f32 %v8422_v50, %v10498_v18  ;;  %8727 = vmatprep.mubr.f32.mxu0 %v10171_v57  ;;  %v3631_v27 = vand.u32 4294901760, %v3630_v13  ;;  %v3637_v19 = vsub.f32 %v10785_v11, %v10797_v38  ;;  %8917 = vmatpush3.msra.mxu1 %v3624_v33 }
 0x11d   :  { %v10801_v0 = vpop.f32.mrf.mxu0  ;;  %v8498_v23 = vpop.f32.mrf.mxu1  ;;  %8801 = vmatmul.mubr.f32.gmra.mxu1 %v14361_v54  ;;  %8832 = vmatprep.subr.mxu0 %v10772_v55 }
 0x11e   :  { %v10807_v29 = vadd.f32 %v8498_v23, %v675_v51  ;;  %8803 = vmatprep.mubr.f32.mxu1 %v10171_v57  ;;  %8918 = vmatprep.subr.mxu1 %v3631_v27  ;;  %v3638_v63 = vand.u32 4294901760, %v3637_v19 }
 0x11f   :  { %v8425_v50 = vpop.f32.mrf.mxu0  ;;  %v10810_v48 = vpop.f32.mrf.mxu1  ;;  %8728 = vmatmul.mubr.f32.gmra.mxu0 %v10197_v17  ;;  %8919 = vmatpush3.msra.mxu1 %v3631_v27 }
 0x120   :  { %v695_v54 = vadd.f32 %v8425_v50, %v10498_v18  ;;  %8730 = vmatprep.mubr.f32.mxu0 %v10206_v30  ;;  %8920 = vmatprep.subr.mxu1 %v3638_v63 }
 0x121   :  { %v10815_v13 = vpop.f32.mrf.mxu0  ;;  %v8501_v38 = vpop.f32.mrf.mxu1  ;;  %8804 = vmatmul.mubr.f32.gmra.mxu1 %v10197_v17  ;;  %8833 = vmatpush3.msra.mxu0 %v10772_v55 }
 0x122   :  { %v10818_v57 = vadd.f32 %v8501_v38, %v695_v54  ;;  %8806 = vmatprep.mubr.f32.mxu1 %v10206_v30  ;;  %8921 = vmatpush3.msra.mxu1 %v3638_v63 }
 0x123   :  { %v8428_v51 = vpop.f32.mrf.mxu0  ;;  %v10821_v33 = vpop.f32.mrf.mxu1  ;;  %8731 = vmatmul.mubr.f32.gmra.mxu0 %v10233_v58  ;;  %8994 = vmatprep.subr.mxu0 %v10567_v43 }
 0x124   :  { %v715_v23 = vadd.f32 %v8428_v51, %v10498_v18  ;;  %8733 = vmatprep.mubr.f32.mxu0 %v10238_v56  ;;  %9082 = vmatprep.subr.mxu1 %v10558_v2 }
 0x125   :  { %v10828_v17 = vpop.f32.mrf.mxu0  ;;  %v8504_v38 = vpop.f32.mrf.mxu1  ;;  %8807 = vmatmul.mubr.f32.gmra.mxu1 %v10233_v58 }
 0x126   :  { %v10832_v30 = vadd.f32 %v8504_v38, %v715_v23  ;;  %8809 = vmatprep.mubr.f32.mxu1 %v10238_v56 }
 0x127   :  { %v8431_v63 = vpop.f32.mrf.mxu0  ;;  %v10836_v27 = vpop.f32.mrf.mxu1  ;;  %8734 = vmatmul.mubr.f32.gmra.mxu0 %v10261_v34 }
 0x128   :  { %v735_v19 = vadd.f32 %v8431_v63, %v10498_v18  ;;  %8736 = vmatprep.mubr.f32.mxu0 %v10266_v42 }
 0x129   :  { %v10841_v50 = vpop.f32.mrf.mxu0  ;;  %v8507_v58 = vpop.f32.mrf.mxu1  ;;  %8810 = vmatmul.mubr.f32.gmra.mxu1 %v10261_v34 }
 0x12a   :  { %v10844_v54 = vadd.f32 %v8507_v58, %v735_v19  ;;  %8812 = vmatprep.mubr.f32.mxu1 %v10266_v42 }
 0x12b   :  { %v8434_v56 = vpop.f32.mrf.mxu0  ;;  %v10847_v51 = vpop.f32.mrf.mxu1  ;;  %8737 = vmatmul.mubr.f32.gmra.mxu0 %v10285_v6 }
 0x12c   :  { %v755_v23 = vadd.f32 %v8434_v56, %v10498_v18  ;;  %8739 = vmatprep.mubr.f32.mxu0 %v10291_v40 }
 0x12d   :  { %v10852_v38 = vpop.f32.mrf.mxu0  ;;  %v8510_v63 = vpop.f32.mrf.mxu1  ;;  %8813 = vmatmul.mubr.f32.gmra.mxu1 %v10285_v6 }
 0x12e   :  { %v10855_v11 = vadd.f32 %v8510_v63, %v755_v23  ;;  %8815 = vmatprep.mubr.f32.mxu1 %v10291_v40 }
 0x12f   :  { %v8437_v34 = vpop.f32.mrf.mxu0  ;;  %v10858_v42 = vpop.f32.mrf.mxu1  ;;  %8740 = vmatmul.mubr.f32.gmra.mxu0 %v10303_v52 }
 0x130   :  { %v775_v19 = vadd.f32 %v8437_v34, %v10498_v18 }
 0x131   :  { %v10862_v58 = vpop.f32.mrf.mxu0  ;;  %v8513_v56 = vpop.f32.mrf.mxu1  ;;  %8816 = vmatmul.mubr.f32.gmra.mxu1 %v10303_v52 }
 0x132   :  { %v10865_v55 = vadd.f32 %v8513_v56, %v775_v19 }
 0x133   :  { %v10867_v43 = vpop.f32.mrf.mxu1  ;;  %v8520_v6 = vpop.f32.mrf.mxu0 }
 0x134   :  { %14363 = vst [vmem:[#allocation26_spill] sm:$0xff] %v10865_v55  ;;  %v1221_v23 = vadd.f32 %v8520_v6, %v10506_v3 }
 0x135   :  { %v10870_v40 = vpop.f32.mrf.mxu0  ;;  %v8596_v63 = vpop.f32.mrf.mxu1 }
 0x136   :  { %v10872_v8 = vadd.f32 %v8596_v63, %v1221_v23 }
 0x137   :  { %v8523_v2 = vpop.f32.mrf.mxu0  ;;  %v10874_v9 = vpop.f32.mrf.mxu1 }
 0x138   :  { %14364 = vst [vmem:[#allocation27_spill] sm:$0xff] %v10872_v8  ;;  %v1235_v34 = vadd.f32 %v8523_v2, %v10516_v49 }
 0x139   :  { %v10877_v41 = vpop.f32.mrf.mxu0  ;;  %v8599_v52 = vpop.f32.mrf.mxu1 }
 0x13a   :  { %v10879_v19 = vadd.f32 %v8599_v52, %v1235_v34 }
 0x13b   :  { %v8526_v56 = vpop.f32.mrf.mxu0  ;;  %v10881_v55 = vpop.f32.mrf.mxu1 }
 0x13c   :  { %14365 = vst [vmem:[#allocation28_spill] sm:$0xff] %v10879_v19  ;;  %v1249_v3 = vadd.f32 %v8526_v56, %v10526_v60 }
 0x13d   :  { %v10884_v6 = vpop.f32.mrf.mxu0  ;;  %v8602_v7 = vpop.f32.mrf.mxu1 }
 0x13e   :  { %v10886_v23 = vadd.f32 %v8602_v7, %v1249_v3 }
 0x13f   :  { %v8529_v63 = vpop.f32.mrf.mxu0  ;;  %v10888_v8 = vpop.f32.mrf.mxu1 }
 0x140   :  { %14366 = vst [vmem:[#allocation29_spill] sm:$0xff] %v10886_v23  ;;  %14367 = vst [vmem:[#allocation30_spill] sm:$0xff] %v10888_v8  ;;  %v1263_v49 = vadd.f32 %v8529_v63, %v10536_v24 }
 0x141   :  { %v10891_v2 = vpop.f32.mrf.mxu0  ;;  %v8605_v45 = vpop.f32.mrf.mxu1 }
 0x142   :  { %v10893_v34 = vadd.f32 %v8605_v45, %v1263_v49 }
 0x143   :  { %v8532_v52 = vpop.f32.mrf.mxu0  ;;  %v10895_v19 = vpop.f32.mrf.mxu1 }
 0x144   :  { %14368 = vst [vmem:[#allocation31_spill] sm:$0xff] %v10893_v34  ;;  %14369 = vst [vmem:[#allocation32_spill] sm:$0xff] %v10895_v19  ;;  %v1277_v60 = vadd.f32 %v8532_v52, %v10546_v39 }
 0x145   :  { %v10898_v56 = vpop.f32.mrf.mxu0  ;;  %v8608_v22 = vpop.f32.mrf.mxu1 }
 0x146   :  { %v10900_v7 = vadd.f32 %v8608_v22, %v1277_v60 }
 0x147   :  { %v8535_v3 = vpop.f32.mrf.mxu0  ;;  %v10902_v23 = vpop.f32.mrf.mxu1 }
 0x148   :  { %14370 = vst [vmem:[#allocation34_spill] sm:$0xff] %v10900_v7  ;;  %14371 = vst [vmem:[#allocation36_spill] sm:$0xff] %v10902_v23  ;;  %v1291_v24 = vadd.f32 %v8535_v3, %v10561_v12 }
 0x149   :  { %v10905_v63 = vpop.f32.mrf.mxu0  ;;  %v8611_v8 = vpop.f32.mrf.mxu1 }
 0x14a   :  { %v10907_v45 = vadd.f32 %v8611_v8, %v1291_v24 }
 0x14b   :  { %v8538_v49 = vpop.f32.mrf.mxu0  ;;  %v10909_v34 = vpop.f32.mrf.mxu1 }
 0x14c   :  { %14372 = vst [vmem:[#allocation38_spill] sm:$0xff] %v10907_v45  ;;  %14373 = vst [vmem:[#allocation39_spill] sm:$0xff] %v10909_v34  ;;  %v1305_v39 = vadd.f32 %v8538_v49, %v10579_v61 }
 0x14d   :  { %v10912_v52 = vpop.f32.mrf.mxu0  ;;  %v8614_v19 = vpop.f32.mrf.mxu1 }
 0x14e   :  { %v10914_v22 = vadd.f32 %v8614_v19, %v1305_v39 }
 0x14f   :  { %v8541_v60 = vpop.f32.mrf.mxu0  ;;  %v10916_v7 = vpop.f32.mrf.mxu1 }
 0x150   :  { %14374 = vst [vmem:[#allocation43_spill] sm:$0xff] %v10914_v22  ;;  %14375 = vst [vmem:[#allocation44_spill] sm:$0xff] %v10916_v7  ;;  %v1319_v12 = vadd.f32 %v8541_v60, %v10591_v4 }
 0x151   :  { %v10919_v3 = vpop.f32.mrf.mxu0  ;;  %v8617_v23 = vpop.f32.mrf.mxu1 }
 0x152   :  { %v10921_v8 = vadd.f32 %v8617_v23, %v1319_v12 }
 0x153   :  { %v8544_v24 = vpop.f32.mrf.mxu0  ;;  %v10923_v45 = vpop.f32.mrf.mxu1 }
 0x154   :  { %14376 = vst [vmem:[#allocation46_spill] sm:$0xff] %v10921_v8  ;;  %14377 = vst [vmem:[#allocation48_spill] sm:$0xff] %v10923_v45  ;;  %v1333_v61 = vadd.f32 %v8544_v24, %v10606_v62 }
 0x155   :  { %v10926_v49 = vpop.f32.mrf.mxu0  ;;  %v8620_v34 = vpop.f32.mrf.mxu1 }
 0x156   :  { %v10928_v19 = vadd.f32 %v8620_v34, %v1333_v61 }
 0x157   :  { %v8547_v39 = vpop.f32.mrf.mxu0  ;;  %v10930_v22 = vpop.f32.mrf.mxu1 }
 0x158   :  { %14378 = vst [vmem:[#allocation49_spill] sm:$0xff] %v10928_v19  ;;  %14379 = vst [vmem:[#allocation50_spill] sm:$0xff] %v10930_v22  ;;  %v1347_v4 = vadd.f32 %v8547_v39, %v10624_v53 }
 0x159   :  { %v10933_v60 = vpop.f32.mrf.mxu0  ;;  %v8623_v7 = vpop.f32.mrf.mxu1 }
 0x15a   :  { %v10935_v23 = vadd.f32 %v8623_v7, %v1347_v4 }
 0x15b   :  { %v8550_v12 = vpop.f32.mrf.mxu0  ;;  %v10937_v8 = vpop.f32.mrf.mxu1 }
 0x15c   :  { %14380 = vst [vmem:[#allocation55_spill] sm:$0xff] %v10935_v23  ;;  %14381 = vst [vmem:[#allocation56_spill] sm:$0xff] %v10937_v8  ;;  %v1361_v62 = vadd.f32 %v8550_v12, %v10636_v26 }
 0x15d   :  { %v10940_v24 = vpop.f32.mrf.mxu0  ;;  %v8626_v45 = vpop.f32.mrf.mxu1 }
 0x15e   :  { %v10942_v34 = vadd.f32 %v8626_v45, %v1361_v62 }
 0x15f   :  { %v8553_v61 = vpop.f32.mrf.mxu0  ;;  %v10944_v19 = vpop.f32.mrf.mxu1 }
 0x160   :  { %14382 = vst [vmem:[#allocation57_spill] sm:$0xff] %v10942_v34  ;;  %14383 = vst [vmem:[#allocation58_spill] sm:$0xff] %v10944_v19  ;;  %v1375_v53 = vadd.f32 %v8553_v61, %v10651_v36 }
 0x161   :  { %v10947_v39 = vpop.f32.mrf.mxu0  ;;  %v8629_v22 = vpop.f32.mrf.mxu1 }
 0x162   :  { %v10949_v7 = vadd.f32 %v8629_v22, %v1375_v53 }
 0x163   :  { %v8556_v4 = vpop.f32.mrf.mxu0  ;;  %v10951_v23 = vpop.f32.mrf.mxu1 }
 0x164   :  { %14384 = vst [vmem:[#allocation59_spill] sm:$0xff] %v10949_v7  ;;  %14385 = vst [vmem:[#allocation60_spill] sm:$0xff] %v10951_v23  ;;  %v1389_v26 = vadd.f32 %v8556_v4, %v10669_v20 }
 0x165   :  { %v10954_v12 = vpop.f32.mrf.mxu0  ;;  %v8632_v8 = vpop.f32.mrf.mxu1 }
 0x166   :  { %v10956_v45 = vadd.f32 %v8632_v8, %v1389_v26 }
 0x167   :  { %v8559_v62 = vpop.f32.mrf.mxu0  ;;  %v10958_v34 = vpop.f32.mrf.mxu1 }
 0x168   :  { %14386 = vst [vmem:[#allocation61_spill] sm:$0xff] %v10956_v45  ;;  %14387 = vst [vmem:[#allocation62_spill] sm:$0xff] %v10958_v34  ;;  %v1403_v36 = vadd.f32 %v8559_v62, %v10681_v15 }
 0x169   :  { %v10961_v61 = vpop.f32.mrf.mxu0  ;;  %v8635_v19 = vpop.f32.mrf.mxu1 }
 0x16a   :  { %v10963_v22 = vadd.f32 %v8635_v19, %v1403_v36 }
 0x16b   :  { %v8562_v53 = vpop.f32.mrf.mxu0  ;;  %v10965_v7 = vpop.f32.mrf.mxu1 }
 0x16c   :  { %14388 = vst [vmem:[#allocation63_spill] sm:$0xff] %v10963_v22  ;;  %14389 = vst [vmem:[#allocation64_spill] sm:$0xff] %v10965_v7  ;;  %v1417_v20 = vadd.f32 %v8562_v53, %v10696_v14 }
 0x16d   :  { %v10968_v4 = vpop.f32.mrf.mxu0  ;;  %v8638_v23 = vpop.f32.mrf.mxu1 }
 0x16e   :  { %v10970_v8 = vadd.f32 %v8638_v23, %v1417_v20 }
 0x16f   :  { %v8565_v26 = vpop.f32.mrf.mxu0  ;;  %v10972_v45 = vpop.f32.mrf.mxu1 }
 0x170   :  { %14390 = vst [vmem:[#allocation65_spill] sm:$0xff] %v10970_v8  ;;  %14391 = vst [vmem:[#allocation66_spill] sm:$0xff] %v10972_v45  ;;  %v1431_v15 = vadd.f32 %v8565_v26, %v10723_v28 }
 0x171   :  { %v10975_v62 = vpop.f32.mrf.mxu0  ;;  %v8641_v34 = vpop.f32.mrf.mxu1 }
 0x172   :  { %v10977_v19 = vadd.f32 %v8641_v34, %v1431_v15 }
 0x173   :  { %v8568_v36 = vpop.f32.mrf.mxu0  ;;  %v10979_v22 = vpop.f32.mrf.mxu1 }
 0x174   :  { %14392 = vst [vmem:[#allocation67_spill] sm:$0xff] %v10977_v19  ;;  %14393 = vst [vmem:[#allocation68_spill] sm:$0xff] %v10979_v22  ;;  %v1445_v14 = vadd.f32 %v8568_v36, %v10755_v1 }
 0x175   :  { %v10982_v53 = vpop.f32.mrf.mxu0  ;;  %v8644_v7 = vpop.f32.mrf.mxu1 }
 0x176   :  { %v10984_v23 = vadd.f32 %v8644_v7, %v1445_v14 }
 0x177   :  { %v8571_v20 = vpop.f32.mrf.mxu0  ;;  %v10986_v8 = vpop.f32.mrf.mxu1 }
 0x178   :  { %14394 = vst [vmem:[#allocation69_spill] sm:$0xff] %v10984_v23  ;;  %14395 = vst [vmem:[#allocation70_spill] sm:$0xff] %v10986_v8  ;;  %v1459_v28 = vadd.f32 %v8571_v20, %v10788_v59 }
 0x179   :  { %v10989_v26 = vpop.f32.mrf.mxu0  ;;  %v8647_v45 = vpop.f32.mrf.mxu1 }
 0x17a   :  { %v10991_v34 = vadd.f32 %v8647_v45, %v1459_v28 }
 0x17b   :  { %v8574_v15 = vpop.f32.mrf.mxu0  ;;  %v10993_v19 = vpop.f32.mrf.mxu1 }
 0x17c   :  { %14396 = vst [vmem:[#allocation71_spill] sm:$0xff] %v10991_v34  ;;  %v1473_v1 = vadd.f32 %v8574_v15, %v10807_v29  ;;  %v625_v15 = vadd.f32 %v10498_v18, %v10749_v32  ;;  %v705_v32 = vadd.f32 %v10498_v18, %v10828_v17 }
 0x17d   :  { %v10996_v36 = vpop.f32.mrf.mxu0  ;;  %v8650_v22 = vpop.f32.mrf.mxu1 }
 0x17e   :  { %v10998_v7 = vadd.f32 %v8650_v22, %v1473_v1 }
 0x17f   :  { %v8577_v14 = vpop.f32.mrf.mxu0  ;;  %v11000_v23 = vpop.f32.mrf.mxu1 }
 0x180   :  { %14397 = vst [vmem:[#allocation72_spill] sm:$0xff] %v10998_v7  ;;  %v1487_v59 = vadd.f32 %v8577_v14, %v10818_v57  ;;  %v645_v7 = vadd.f32 %v10498_v18, %v10778_v47  ;;  %v1048_v47 = vadd.f32 %v10766_v10, %v625_v15  ;;  %v1228_v10 = vadd.f32 %v10877_v41, %v10521_v35  ;;  %v14406_v15 = vld [vmem:[#allocation26_spill] sm:$0xff] }
 0x181   :  { %v11003_v20 = vpop.f32.mrf.mxu0  ;;  %v8653_v8 = vpop.f32.mrf.mxu1  ;;  %v1270_v35 = vadd.f32 %v10898_v56, %v10551_v21  ;;  %v1298_v41 = vadd.f32 %v10912_v52, %v10586_v37 }
 0x182   :  { %v11005_v45 = vadd.f32 %v8653_v8, %v1487_v59  ;;  %v665_v8 = vadd.f32 %v10498_v18, %v10801_v0  ;;  %v1060_v0 = vadd.f32 %v10791_v25, %v645_v7 }
 0x183   :  { %v8580_v28 = vpop.f32.mrf.mxu0  ;;  %v11007_v34 = vpop.f32.mrf.mxu1 }
 0x184   :  { %14398 = vst [vmem:[#allocation73_spill] sm:$0xff] %v11005_v45  ;;  %v1501_v29 = vadd.f32 %v8580_v28, %v10832_v30  ;;  %v685_v30 = vadd.f32 %v10498_v18, %v10815_v13  ;;  %v725_v28 = vadd.f32 %v10498_v18, %v10841_v50  ;;  %v765_v13 = vadd.f32 %v10498_v18, %v10862_v58 }
 0x185   :  { %v11012_v22 = vpop.f32.mrf.mxu0  ;;  %v8656_v1 = vpop.f32.mrf.mxu1  ;;  %v1072_v17 = vadd.f32 %v10810_v48, %v665_v8  ;;  %v1214_v50 = vadd.f32 %v10870_v40, %v10511_v16  ;;  %v1256_v16 = vadd.f32 %v10891_v2, %v10541_v5  ;;  %v1312_v5 = vadd.f32 %v10919_v3, %v10596_v31  ;;  %v14402_v2 = vld [vmem:[#allocation42_spill] sm:$0xff] }
 0x186   :  { %v11016_v57 = vadd.f32 %v8656_v1, %v1501_v29  ;;  %v1108_v58 = vadd.f32 %v10847_v51, %v725_v28  ;;  %v1326_v56 = vadd.f32 %v10926_v49, %v14402_v2  ;;  %v14405_v3 = vld [vmem:[#allocation54_spill] sm:$0xff]  ;;  %v14410_v28 = vld [vmem:[#allocation44_spill] sm:$0xff] }
 0x187   :  { %v8583_v14 = vpop.f32.mrf.mxu0  ;;  %v11020_v59 = vpop.f32.mrf.mxu1  ;;  %v1618_v21 = vadd.f32 %v10874_v9, %v1214_v50  ;;  %v1368_v9 = vadd.f32 %v10947_v39, %v14405_v3  ;;  %v14412_v39 = vld [vmem:[#allocation7_spill] sm:$0xff]  ;;  %v14419_v3 = vld [vmem:[#allocation60_spill] sm:$0xff] }
 0x188   :  { %14399 = vst [vmem:[#allocation74_spill] sm:$0xff] %v11016_v57  ;;  %14400 = vst [vmem:[#allocation75_spill] sm:$0xff] %v11020_v59  ;;  %v1515_v45 = vadd.f32 %v8583_v14, %v10844_v54  ;;  %v745_v57 = vadd.f32 %v10498_v18, %v10852_v38  ;;  %v1242_v54 = vadd.f32 %v10884_v6, %v10531_v44  ;;  %v14401_v6 = vld [vmem:[#allocation30_spill] sm:$0xff]  ;;  %v14408_v14 = vld [vmem:[#allocation36_spill] sm:$0xff] }
 0x189   :  { %v11030_v29 = vpop.f32.mrf.mxu0  ;;  %v8659_v1 = vpop.f32.mrf.mxu1  ;;  %v1084_v38 = vadd.f32 %v10821_v33, %v685_v30  ;;  %v1096_v18 = vadd.f32 %v10836_v27, %v705_v32  ;;  %v1284_v44 = vadd.f32 %v10905_v63, %v10570_v46  ;;  %v1634_v46 = vadd.f32 %v10881_v55, %v1228_v10  ;;  %v14409_v30 = vld [vmem:[#allocation39_spill] sm:$0xff] }
 0x18a   :  { %v11037_v59 = vadd.f32 %v8659_v1, %v1515_v45  ;;  %v11063_v27 = vadd.f32 %v10858_v42, %v745_v57  ;;  %v11075_v37 = vadd.f32 %v14401_v6, %v1242_v54  ;;  %v14404_v45 = vld [vmem:[#allocation51_spill] sm:$0xff]  ;;  %v14407_v57 = vld [vmem:[#allocation32_spill] sm:$0xff]  ;;  %v11092_v49 = vadd.f32 %v14408_v14, %v1270_v35 }
 0x18b   :  { %v8586_v25 = vpop.f32.mrf.mxu0  ;;  %v11046_v7 = vpop.f32.mrf.mxu1  ;;  %v1354_v31 = vadd.f32 %v10940_v24, %v14404_v45  ;;  %v11089_v8 = vadd.f32 %v14407_v57, %v1256_v16  ;;  %v11095_v32 = vadd.f32 %v14409_v30, %v1284_v44  ;;  %v1382_v10 = vadd.f32 %v10954_v12, %v14412_v39  ;;  %v14413_v54 = vld [vmem:[#allocation8_spill] sm:$0xff]  ;;  %v14414_v16 = vld [vmem:[#allocation50_spill] sm:$0xff] }
 0x18c   :  { %v1529_v48 = vadd.f32 %v8586_v25, %v10855_v11  ;;  %v11066_v11 = vadd.f32 %v10867_v43, %v765_v13  ;;  %v14403_v43 = vld [vmem:[#allocation47_spill] sm:$0xff]  ;;  %v14411_v13 = vld [vmem:[#allocation48_spill] sm:$0xff]  ;;  %v1396_v25 = vadd.f32 %v10961_v61, %v14413_v54  ;;  %v11110_v35 = vadd.f32 %v14414_v16, %v1326_v56  ;;  %v14418_v61 = vld [vmem:[#allocation58_spill] sm:$0xff] }
 0x18d   :  { %v11060_v40 = vpop.f32.mrf.mxu0  ;;  %v8662_v33 = vpop.f32.mrf.mxu1  ;;  %v1340_v52 = vadd.f32 %v10933_v60, %v14403_v43  ;;  %v11098_v60 = vadd.f32 %v14410_v28, %v1298_v41  ;;  %v11101_v50 = vadd.f32 %v14411_v13, %v1312_v5  ;;  %v14415_v44 = vld [vmem:[#allocation12_spill] sm:$0xff]  ;;  %v1438_v5 = vadd.f32 %v10982_v53, %v1048_v47  ;;  %v14423_v13 = vld [vmem:[#allocation66_spill] sm:$0xff] }
 0x18e   :  { %v11070_v51 = vadd.f32 %v8662_v33, %v1529_v48  ;;  %v1410_v41 = vadd.f32 %v10968_v4, %v14415_v44  ;;  %v14416_v33 = vld [vmem:[#allocation16_spill] sm:$0xff]  ;;  %v11123_v45 = vadd.f32 %v14418_v61, %v1354_v31  ;;  %v11126_v56 = vadd.f32 %v14419_v3, %v1368_v9 }
 0x18f   :  { %v8589_v42 = vpop.f32.mrf.mxu0  ;;  %v11079_v63 = vpop.f32.mrf.mxu1  ;;  %v1424_v6 = vadd.f32 %v10975_v62, %v14416_v33  ;;  %v14417_v12 = vld [vmem:[#allocation56_spill] sm:$0xff]  ;;  %v1452_v4 = vadd.f32 %v10989_v26, %v1060_v0  ;;  %v1466_v62 = vadd.f32 %v10996_v36, %v1072_v17  ;;  %v1480_v53 = vadd.f32 %v11003_v20, %v1084_v38  ;;  %v14425_v36 = vld [vmem:[#allocation70_spill] sm:$0xff] }
 0x190   :  { %v1543_v55 = vadd.f32 %v8589_v42, %v14406_v15  ;;  %v11120_v43 = vadd.f32 %v14417_v12, %v1340_v52  ;;  %v14420_v15 = vld [vmem:[#allocation27_spill] sm:$0xff]  ;;  %v1494_v47 = vadd.f32 %v11012_v22, %v1096_v18  ;;  %v14421_v52 = vld [vmem:[#allocation62_spill] sm:$0xff]  ;;  %v14422_v31 = vld [vmem:[#allocation64_spill] sm:$0xff]  ;;  %v11140_v39 = vadd.f32 %v14423_v13, %v1410_v41 }
 0x191   :  { %v1535_v1 = vpop.f32.mrf.mxu0  ;;  %v8665_v24 = vpop.f32.mrf.mxu1  ;;  %v11134_v30 = vadd.f32 %v14421_v52, %v1382_v10  ;;  %v11137_v28 = vadd.f32 %v14422_v31, %v1396_v25  ;;  %v14424_v26 = vld [vmem:[#allocation68_spill] sm:$0xff]  ;;  %v11146_v20 = vadd.f32 %v14425_v36, %v1438_v5  ;;  %v1508_v22 = vadd.f32 %v11030_v29, %v1108_v58  ;;  %v14427_v41 = vld [vmem:[#allocation75_spill] sm:$0xff] }
 0x192   :  { %v11107_v48 = vadd.f32 %v8665_v24, %v1543_v55  ;;  %v11143_v0 = vadd.f32 %v14424_v26, %v1424_v6  ;;  %v14426_v10 = vld [vmem:[#allocation28_spill] sm:$0xff]  ;;  %v11154_v16 = vadd.f32 %v11000_v23, %v1466_v62  ;;  %v11157_v44 = vadd.f32 %v11007_v34, %v1480_v53 }
 0x193   :  { %v11117_v2 = vpop.f32.mrf.mxu1  ;;  %v8672_v42 = vpop.f32.mrf.mxu0  ;;  %v11160_v33 = vadd.f32 %v14427_v41, %v1494_v47  ;;  %v11163_v12 = vadd.f32 %v11046_v7, %v1508_v22  ;;  %v1536_v47 = vadd.f32 %v1535_v1, %v11066_v11 }
 0x194   :  { %v2077_v55 = vadd.f32 %v8672_v42, %v14420_v15 }
 0x195   :  { %v2070_v57 = vpop.f32.mrf.mxu0  ;;  %v8748_v14 = vpop.f32.mrf.mxu1 }
 0x196   :  { %v2071_v9 = vadd.f32 %v2070_v57, %v1618_v21  ;;  %v2432_v24 = vadd.f32 %v8748_v14, %v2077_v55  ;;  %v11151_v21 = vadd.f32 %v10993_v19, %v1452_v4  ;;  %v1522_v19 = vadd.f32 %v11060_v40, %v11063_v27  ;;  %v14429_v4 = vld [vmem:[#allocation29_spill] sm:$0xff] }
 0x197   :  { %v8675_v17 = vpop.f32.mrf.mxu0  ;;  %v2425_v38 = vpop.f32.mrf.mxu1 }
 0x198   :  { %vm2712_vm2 = vcmp.gt.f32.partialorder %v2432_v24, 0.0  ;;  %v2760_v18 = vmul.f32 0.01, %v2432_v24  ;;  %v2089_v54 = vadd.f32 %v8675_v17, %v14426_v10  ;;  %v2426_v25 = vadd.f32 %v2425_v38, %v2071_v9  ;;  %v14431_v17 = vld [vmem:[#allocation31_spill] sm:$0xff] }
 0x199   :  { %v2082_v29 = vpop.f32.mrf.mxu0  ;;  %v8751_v58 = vpop.f32.mrf.mxu1  ;;  %v11178_v31 = vadd.f32 %v11079_v63, %v1522_v19 }
 0x19a   :  { %v2808_v6 = vsel %vm2712_vm2, %v2432_v24, %v2760_v18  ;;  %vm2711_vm3 = vcmp.gt.f32.partialorder %v2426_v25, 0.0  ;;  %v2759_v5 = vmul.f32 0.01, %v2426_v25  ;;  %v2083_v42 = vadd.f32 %v2082_v29, %v1634_v46 }
 0x19b   :  { %v2875_v23 = vsel %vm2870_vm1, %v2808_v6, 0  ;;  %v2444_v61 = vadd.f32 %v8751_v58, %v2089_v54  ;;  %v8678_v34 = vpop.f32.mrf.mxu0  ;;  %v2437_v3 = vpop.f32.mrf.mxu1 }
 0x19c   :  { %v11168_v15 = vand.u32 4294901760, %v2875_v23  ;;  %v2807_v55 = vsel %vm2711_vm3, %v2426_v25, %v2759_v5  ;;  %v2101_v62 = vadd.f32 %v8678_v34, %v14429_v4  ;;  %v2438_v53 = vadd.f32 %v2437_v3, %v2083_v42 }
 0x19d   :  { %v2872_v46 = vsel %vm2870_vm1, %v2807_v55, 0  ;;  %vm2714_vm4 = vcmp.gt.f32.partialorder %v2444_v61, 0.0  ;;  %v2762_v7 = vmul.f32 0.01, %v2444_v61  ;;  %v2094_v57 = vpop.f32.mrf.mxu0  ;;  %v8754_v14 = vpop.f32.mrf.mxu1  ;;  %v11192_v25 = vadd.f32 %v11117_v2, %v1536_v47  ;;  %v14435_v55 = vld [vmem:[#allocation40_spill] sm:$0xff] }
 0x19e   :  { %14428 = vst [vmem:[#allocation30_spill] sm:$0xff] %v11168_v15  ;;  %v11174_v40 = vsub.f32 %v2875_v23, %v11168_v15  ;;  %vm2713_vm5 = vcmp.gt.f32.partialorder %v2438_v53, 0.0  ;;  %v2761_v27 = vmul.f32 0.01, %v2438_v53  ;;  %v2095_v52 = vadd.f32 %v2094_v57, %v11075_v37 }
 0x19f   :  { %v2810_v9 = vsel %vm2714_vm4, %v2444_v61, %v2762_v7  ;;  %v2456_v24 = vadd.f32 %v8754_v14, %v2101_v62  ;;  %v8681_v13 = vpop.f32.mrf.mxu0  ;;  %v2449_v11 = vpop.f32.mrf.mxu1  ;;  %v11180_v1 = vand.u32 4294901760, %v2872_v46  ;;  %v14434_v61 = vld [vmem:[#allocation33_spill] sm:$0xff] }
 0x1a0   :  { %v13956_v26 = vand.u32 4294901760, %v11174_v40  ;;  %v2881_v36 = vsel %vm2870_vm1, %v2810_v9, 0  ;;  %v2809_v22 = vsel %vm2713_vm5, %v2438_v53, %v2761_v27  ;;  %v2113_v38 = vadd.f32 %v8681_v13, %v14431_v17  ;;  %v14437_v53 = vld [vmem:[#allocation34_spill] sm:$0xff]  ;;  %v14438_v9 = vld [vmem:[#allocation52_spill] sm:$0xff] }
 0x1a1   :  { %14430 = vst [vmem:[#allocation42_spill] sm:$0xff] %v11180_v1  ;;  %v11185_v18 = vand.u32 4294901760, %v2881_v36  ;;  %v11188_v37 = vsel %vm2870_vm1, %v2809_v22, 0  ;;  %vm2716_vm6 = vcmp.gt.f32.partialorder %v2456_v24, 0.0  ;;  %v2764_v63 = vmul.f32 0.01, %v2456_v24  ;;  %8922 = vmatprep.mubr.f32.mxu1 %v11180_v1  ;;  %v2106_v10 = vpop.f32.mrf.mxu0  ;;  %v8757_v54 = vpop.f32.mrf.mxu1 }
 0x1a2   :  { %v2450_v41 = vadd.f32 %v2449_v11, %v2095_v52  ;;  %v2107_v29 = vadd.f32 %v2106_v10, %v11089_v8  ;;  %v2468_v58 = vadd.f32 %v8757_v54, %v2113_v38  ;;  %8923 = vmatmul.mubr.f32.vlgmr.msra.gmra.mxu1 %v11168_v15  ;;  %v11199_v6 = vsub.f32 %v11174_v40, %v13956_v26  ;;  %v14440_v54 = vld [vmem:[#allocation9_spill] sm:$0xff] }
 0x1a3   :  { %14432 = vst [vmem:[#allocation47_spill] sm:$0xff] %v11185_v18  ;;  %v2812_v5 = vsel %vm2716_vm6, %v2456_v24, %v2764_v63  ;;  %v8684_v42 = vpop.f32.mrf.mxu0  ;;  %v2461_v19 = vpop.f32.mrf.mxu1  ;;  %v11202_v23 = vand.u32 4294901760, %v11188_v37  ;;  %v11205_v2 = vsub.f32 %v2872_v46, %v11180_v1  ;;  %9083 = vmatpush3.msra.mxu1 %v14434_v61  ;;  %v11209_v8 = vsub.f32 %v2881_v36, %v11185_v18  ;;  %v14439_v63 = vld [vmem:[#allocation38_spill] sm:$0xff] }
 0x1a4   :  { %v2887_v34 = vsel %vm2870_vm1, %v2812_v5, 0  ;;  %vm2715_vm7 = vcmp.gt.f32.partialorder %v2450_v41, 0.0  ;;  %v2763_v3 = vmul.f32 0.01, %v2450_v41  ;;  %9084 = vmatprep.subr.mxu1 %v14435_v55  ;;  %vm2718_vm8 = vcmp.gt.f32.partialorder %v2468_v58, 0.0  ;;  %v14460_v1 = vld [vmem:[#allocation10_spill] sm:$0xff] }
 0x1a5   :  { %14433 = vst [vmem:[#allocation51_spill] sm:$0xff] %v11202_v23  ;;  %v11213_v4 = vand.u32 4294901760, %v2887_v34  ;;  %v2766_v62 = vmul.f32 0.01, %v2468_v58  ;;  %v2125_v47 = vadd.f32 %v8684_v42, %v14437_v53  ;;  %8925 = vmatprep.mubr.f32.mxu1 %v11202_v23  ;;  %v2118_v46 = vpop.f32.mrf.mxu0  ;;  %v8760_v7 = vpop.f32.mrf.mxu1  ;;  %9085 = vmatpush3.msra.mxu1 %v14435_v55  ;;  %v2462_v14 = vadd.f32 %v2461_v19, %v2107_v29  ;;  %v14443_v53 = vld [vmem:[#allocation11_spill] sm:$0xff] }
 0x1a6   :  { %v2811_v57 = vsel %vm2715_vm7, %v2450_v41, %v2763_v3  ;;  %v2119_v27 = vadd.f32 %v2118_v46, %v11092_v49  ;;  %8926 = vmatmul.mubr.f32.gmra.mxu1 %v11185_v18  ;;  %v13957_v52 = vand.u32 4294901760, %v11205_v2  ;;  %9086 = vmatprep.subr.mxu1 %v14438_v9  ;;  %v3102_v24 = vand.u32 4294901760, %v11199_v6 }
 0x1a7   :  { %14436 = vst [vmem:[#allocation54_spill] sm:$0xff] %v11213_v4  ;;  %v11224_v13 = vsel %vm2870_vm1, %v2811_v57, 0  ;;  %v2814_v11 = vsel %vm2718_vm8, %v2468_v58, %v2766_v62  ;;  %v2480_v36 = vadd.f32 %v8760_v7, %v2125_v47  ;;  %v8687_v22 = vpop.f32.mrf.mxu0  ;;  %v2473_v17 = vpop.f32.mrf.mxu1  ;;  %9087 = vmatpush3.msra.mxu1 %v14438_v9  ;;  %vm2717_vm9 = vcmp.gt.f32.partialorder %v2462_v14, 0.0 }
 0x1a8   :  { %v2893_v38 = vsel %vm2870_vm1, %v2814_v11, 0  ;;  %v2765_v49 = vmul.f32 0.01, %v2462_v14  ;;  %v2137_v10 = vadd.f32 %v8687_v22, %v14439_v63  ;;  %9088 = vmatprep.subr.mxu1 %v14440_v54  ;;  %v11231_v41 = vsub.f32 %v2887_v34, %v11213_v4  ;;  %v14445_v22 = vld [vmem:[#allocation15_spill] sm:$0xff] }
 0x1a9   :  { %vm2720_vm10 = vcmp.gt.f32.partialorder %v2480_v36, 0.0  ;;  %v2768_v29 = vmul.f32 0.01, %v2480_v36  ;;  %v2474_v6 = vadd.f32 %v2473_v17, %v2119_v27  ;;  %v2130_v58 = vpop.f32.mrf.mxu0  ;;  %v8763_v5 = vpop.f32.mrf.mxu1  ;;  %9089 = vmatpush3.msra.mxu1 %v14440_v54  ;;  %v3091_v19 = vsub.f32 %v11205_v2, %v13957_v52 }
 0x1aa   :  { %14441 = vst [vmem:[#allocation26_spill] sm:$0xff] %v11231_v41  ;;  %v2813_v42 = vsel %vm2717_vm9, %v2462_v14, %v2765_v49  ;;  %v11238_v3 = vand.u32 4294901760, %v11224_v13  ;;  %v2131_v62 = vadd.f32 %v2130_v58, %v11095_v32  ;;  %9090 = vmatprep.subr.mxu1 %v14443_v53  ;;  %v11242_v34 = vand.u32 4294901760, %v2893_v38  ;;  %v14447_v49 = vld [vmem:[#allocation43_spill] sm:$0xff] }
 0x1ab   :  { %v11245_v47 = vsel %vm2870_vm1, %v2813_v42, 0  ;;  %v2816_v46 = vsel %vm2720_vm10, %v2480_v36, %v2768_v29  ;;  %vm2719_vm11 = vcmp.gt.f32.partialorder %v2474_v6, 0.0  ;;  %v8690_v7 = vpop.f32.mrf.mxu0  ;;  %v2485_v57 = vpop.f32.mrf.mxu1  ;;  %9091 = vmatpush3.msra.mxu1 %v14443_v53  ;;  %v2767_v27 = vmul.f32 0.01, %v2474_v6 }
 0x1ac   :  { %14442 = vst [vmem:[#allocation32_spill] sm:$0xff] %v11238_v3  ;;  %14444 = vst [vmem:[#allocation36_spill] sm:$0xff] %v11242_v34  ;;  %v2899_v14 = vsel %vm2870_vm1, %v2816_v46, 0  ;;  %v3092_v11 = vand.u32 4294901760, %v3091_v19  ;;  %8928 = vmatprep.mubr.f32.mxu1 %v11238_v3  ;;  %v2492_v32 = vadd.f32 %v8763_v5, %v2137_v10  ;;  %9092 = vmatprep.subr.mxu1 %v14445_v22  ;;  %v11261_v5 = vand.u32 4294901760, %v11245_v47 }
 0x1ad   :  { %v11251_v17 = vand.u32 4294901760, %v2899_v14  ;;  %8929 = vmatmul.mubr.f32.gmra.mxu1 %v11213_v4  ;;  %v2149_v36 = vadd.f32 %v8690_v7, %v14447_v49  ;;  %v2486_v63 = vadd.f32 %v2485_v57, %v2131_v62  ;;  %v11257_v29 = vsub.f32 %v11188_v37, %v11202_v23  ;;  %v2142_v58 = vpop.f32.mrf.mxu0  ;;  %v8766_v42 = vpop.f32.mrf.mxu1  ;;  %v14458_v23 = vld [vmem:[#allocation22_spill] sm:$0xff] }
 0x1ae   :  { %v2815_v19 = vsel %vm2719_vm11, %v2474_v6, %v2767_v27  ;;  %8834 = vmatprep.mubr.f32.mxu0 %v3092_v11  ;;  %vm2722_vm12 = vcmp.gt.f32.partialorder %v2492_v32, 0.0  ;;  %v2770_v10 = vmul.f32 0.01, %v2492_v32  ;;  %14448 = vst [vmem:[#allocation44_spill] sm:$0xff] %v11261_v5  ;;  %9093 = vmatpush3.msra.mxu1 %v14445_v22  ;;  %v11265_v46 = vsub.f32 %v2893_v38, %v11242_v34  ;;  %v14451_v6 = vld [vmem:[#allocation19_spill] sm:$0xff]  ;;  %v14453_v11 = vld [vmem:[#allocation41_spill] sm:$0xff] }
 0x1af   :  { %14446 = vst [vmem:[#allocation39_spill] sm:$0xff] %v11251_v17  ;;  %v11268_v62 = vsub.f32 %v2899_v14, %v11251_v17  ;;  %8835 = vmatmul.mubr.f32.vlgmr.msra.gmra.mxu0 %v3102_v24  ;;  %vm2721_vm13 = vcmp.gt.f32.partialorder %v2486_v63, 0.0  ;;  %v2769_v37 = vmul.f32 0.01, %v2486_v63  ;;  %v8693_v7 = vpop.f32.mrf.mxu0  ;;  %v2497_v57 = vpop.f32.mrf.mxu1  ;;  %9094 = vmatprep.subr.mxu1 %v14451_v6  ;;  %v2143_v49 = vadd.f32 %v2142_v58, %v11098_v60  ;;  %v14452_v38 = vld [vmem:[#allocation35_spill] sm:$0xff]  ;;  %v14456_v58 = vld [vmem:[#allocation46_spill] sm:$0xff] }
 0x1b0   :  { %14449 = vst [vmem:[#allocation48_spill] sm:$0xff] %v11265_v46  ;;  %v2818_v27 = vsel %vm2722_vm12, %v2492_v32, %v2770_v10  ;;  %8931 = vmatprep.mubr.f32.mxu1 %v11261_v5  ;;  %v2504_v26 = vadd.f32 %v8766_v42, %v2149_v36  ;;  %8995 = vmatpush3.msra.mxu0 %v14452_v38  ;;  %v11276_v14 = vsel %vm2870_vm1, %v2815_v19, 0  ;;  %v13966_v4 = vand.u32 4294901760, %v11209_v8 }
 0x1b1   :  { %14450 = vst [vmem:[#allocation7_spill] sm:$0xff] %v11268_v62  ;;  %v2905_v24 = vsel %vm2870_vm1, %v2818_v27, 0  ;;  %v2817_v52 = vsel %vm2721_vm13, %v2486_v63, %v2769_v37  ;;  %8932 = vmatmul.mubr.f32.gmra.mxu1 %v11242_v34  ;;  %v2154_v32 = vpop.f32.mrf.mxu0  ;;  %v8769_v10 = vpop.f32.mrf.mxu1  ;;  %8996 = vmatprep.subr.mxu0 %v14453_v11  ;;  %v14455_v60 = vand.u32 4294901760, %v11257_v29  ;;  %v2161_v42 = vadd.f32 %v8693_v7, %v14456_v58 }
 0x1b2   :  { %v11282_v18 = vand.u32 4294901760, %v2905_v24  ;;  %vm2724_vm14 = vcmp.gt.f32.partialorder %v2504_v26, 0.0  ;;  %8997 = vmatpush3.msra.mxu0 %v14453_v11  ;;  %9095 = vmatpush3.msra.mxu1 %v14451_v6  ;;  %v2772_v63 = vmul.f32 0.01, %v2504_v26  ;;  %v3121_v19 = vsub.f32 %v11209_v8, %v13966_v4 }
 0x1b3   :  { %v3111_v36 = vsub.f32 %v11257_v29, %v14455_v60  ;;  %v2498_v37 = vadd.f32 %v2497_v57, %v2143_v49  ;;  %v11295_v27 = vsub.f32 %v11224_v13, %v11238_v3  ;;  %v8696_v38 = vpop.f32.mrf.mxu0  ;;  %v2509_v34 = vpop.f32.mrf.mxu1  ;;  %v14457_v60 = vld [vmem:[#allocation53_spill] sm:$0xff]  ;;  %9096 = vmatprep.subr.mxu1 %v14458_v23  ;;  %v11300_v7 = vsel %vm2870_vm1, %v2817_v52, 0 }
 0x1b4   :  { %14454 = vst [vmem:[#allocation8_spill] sm:$0xff] %v11282_v18  ;;  %8998 = vmatprep.subr.mxu0 %v14457_v60  ;;  %v11303_v58 = vand.u32 4294901760, %v11276_v14  ;;  %v2155_v4 = vadd.f32 %v2154_v32, %v11101_v50  ;;  %9097 = vmatpush3.msra.mxu1 %v14458_v23  ;;  %v2820_v13 = vsel %vm2724_vm14, %v2504_v26, %v2772_v63  ;;  %v3122_v57 = vand.u32 4294901760, %v3121_v19 }
 0x1b5   :  { %v3112_v11 = vand.u32 4294901760, %v3111_v36  ;;  %8999 = vmatpush3.msra.mxu0 %v14457_v60  ;;  %vm2723_vm15 = vcmp.gt.f32.partialorder %v2498_v37, 0.0  ;;  %v2771_v49 = vmul.f32 0.01, %v2498_v37  ;;  %v2166_v3 = vpop.f32.mrf.mxu0  ;;  %v8772_v15 = vpop.f32.mrf.mxu1  ;;  %9258 = vmatprep.subr.mxu1 %v14434_v61  ;;  %v2911_v52 = vsel %vm2870_vm1, %v2820_v13, 0 }
 0x1b6   :  { %14459 = vst [vmem:[#allocation50_spill] sm:$0xff] %v11303_v58  ;;  %9000 = vmatprep.subr.mxu0 %v14460_v1  ;;  %v13976_v50 = vand.u32 4294901760, %v11295_v27  ;;  %8934 = vmatprep.mubr.f32.mxu1 %v11303_v58  ;;  %v2516_v32 = vadd.f32 %v8769_v10, %v2161_v42  ;;  %v11316_v26 = vsub.f32 %v2905_v24, %v11282_v18  ;;  %v11318_v63 = vand.u32 4294901760, %v2911_v52  ;;  %v14463_v42 = vld [vmem:[#allocation49_spill] sm:$0xff] }
 0x1b7   :  { %8837 = vmatprep.mubr.f32.mxu0 %v3112_v11  ;;  %v2819_v19 = vsel %vm2723_vm15, %v2498_v37, %v2771_v49  ;;  %8935 = vmatmul.mubr.f32.gmra.mxu1 %v11251_v17  ;;  %v2510_v60 = vadd.f32 %v2509_v34, %v2155_v4  ;;  %v8699_v11 = vpop.f32.mrf.mxu0  ;;  %v2521_v23 = vpop.f32.mrf.mxu1  ;;  %v2173_v36 = vadd.f32 %v8696_v38, %v14463_v42  ;;  %v14464_v37 = vand.u32 4294901760, %v11231_v41  ;;  %v14465_v17 = vld [vmem:[#allocation14_spill] sm:$0xff] }
 0x1b8   :  { %14461 = vst [vmem:[#allocation12_spill] sm:$0xff] %v11316_v26  ;;  %14462 = vst [vmem:[#allocation16_spill] sm:$0xff] %v11318_v63  ;;  %8838 = vmatmul.mubr.f32.gmra.mxu0 %v3122_v57  ;;  %v3131_v13 = vsub.f32 %v11295_v27, %v13976_v50  ;;  %vm2726_vm0 = vcmp.gt.f32.partialorder %v2516_v32, 0.0  ;;  %v2774_v10 = vmul.f32 0.01, %v2516_v32  ;;  %v11327_v24 = vsel %vm2870_vm1, %v2819_v19, 0 }
 0x1b9   :  { %9001 = vmatpush3.msra.mxu0 %v14460_v1  ;;  %v3141_v57 = vsub.f32 %v11231_v41, %v14464_v37  ;;  %vm2725_vm2 = vcmp.gt.f32.partialorder %v2510_v60, 0.0  ;;  %v2773_v4 = vmul.f32 0.01, %v2510_v60  ;;  %v2178_v34 = vpop.f32.mrf.mxu0  ;;  %v8775_v49 = vpop.f32.mrf.mxu1  ;;  %v11335_v38 = vsub.f32 %v11245_v47, %v11261_v5  ;;  %v14468_v41 = vld [vmem:[#allocation18_spill] sm:$0xff] }
 0x1ba   :  { %9002 = vmatprep.subr.mxu0 %v14465_v17  ;;  %v3132_v50 = vand.u32 4294901760, %v3131_v13  ;;  %v2822_v6 = vsel %vm2726_vm0, %v2516_v32, %v2774_v10  ;;  %v11338_v1 = vand.u32 4294901760, %v11300_v7  ;;  %v2167_v22 = vadd.f32 %v2166_v3, %v11110_v35 }
 0x1bb   :  { %14466 = vst [vmem:[#allocation56_spill] sm:$0xff] %v11335_v38  ;;  %9003 = vmatpush3.msra.mxu0 %v14465_v17  ;;  %v2917_v19 = vsel %vm2870_vm1, %v2822_v6, 0  ;;  %v3142_v42 = vand.u32 4294901760, %v3141_v57  ;;  %v2821_v37 = vsel %vm2725_vm2, %v2510_v60, %v2773_v4  ;;  %v8702_v53 = vpop.f32.mrf.mxu0  ;;  %v2533_v54 = vpop.f32.mrf.mxu1  ;;  %v11345_v32 = vsub.f32 %v2911_v52, %v11318_v63 }
 0x1bc   :  { %14467 = vst [vmem:[#allocation58_spill] sm:$0xff] %v11338_v1  ;;  %9004 = vmatprep.subr.mxu0 %v14468_v41  ;;  %8840 = vmatprep.mubr.f32.mxu0 %v3132_v50  ;;  %v11347_v47 = vand.u32 4294901760, %v2917_v19  ;;  %v13985_v13 = vand.u32 4294901760, %v11335_v38  ;;  %v2528_v17 = vadd.f32 %v8772_v15, %v2173_v36  ;;  %v11352_v6 = vsel %vm2870_vm1, %v2821_v37, 0  ;;  %v14472_v36 = vld [vmem:[#allocation55_spill] sm:$0xff]  ;;  %v14473_v37 = vld [vmem:[#allocation21_spill] sm:$0xff] }
 0x1bd   :  { %14469 = vst [vmem:[#allocation60_spill] sm:$0xff] %v11345_v32  ;;  %8937 = vmatprep.mubr.f32.mxu1 %v11338_v1  ;;  %8841 = vmatmul.mubr.f32.gmra.mxu0 %v3142_v42  ;;  %v13988_v35 = vand.u32 4294901760, %v11265_v46  ;;  %v2522_v3 = vadd.f32 %v2521_v23, %v2167_v22  ;;  %v11358_v52 = vsub.f32 %v11276_v14, %v11303_v58  ;;  %v2190_v50 = vpop.f32.mrf.mxu0  ;;  %v8778_v60 = vpop.f32.mrf.mxu1  ;;  %v11371_v58 = vand.u32 4294901760, %v11327_v24 }
 0x1be   :  { %14470 = vst [vmem:[#allocation27_spill] sm:$0xff] %v11347_v47  ;;  %8938 = vmatmul.mubr.f32.gmra.mxu1 %v11282_v18  ;;  %v3151_v10 = vsub.f32 %v11335_v38, %v13985_v13  ;;  %vm2728_vm3 = vcmp.gt.f32.partialorder %v2528_v17, 0.0  ;;  %v2776_v15 = vmul.f32 0.01, %v2528_v17  ;;  %v2185_v57 = vadd.f32 %v8699_v11, %v14472_v36  ;;  %9005 = vmatpush3.msra.mxu0 %v14468_v41 }
 0x1bf   :  { %14471 = vst [vmem:[#allocation62_spill] sm:$0xff] %v11358_v52  ;;  %v3161_v23 = vsub.f32 %v11265_v46, %v13988_v35  ;;  %vm2727_vm4 = vcmp.gt.f32.partialorder %v2522_v3, 0.0  ;;  %v2775_v22 = vmul.f32 0.01, %v2522_v3  ;;  %v13995_v14 = vand.u32 4294901760, %v11358_v52  ;;  %v8705_v4 = vpop.f32.mrf.mxu0  ;;  %v2545_v42 = vpop.f32.mrf.mxu1  ;;  %9006 = vmatprep.subr.mxu0 %v14473_v37  ;;  %14474 = vst [vmem:[#allocation64_spill] sm:$0xff] %v11371_v58  ;;  %8940 = vmatprep.mubr.f32.mxu1 %v11371_v58 }
 0x1c0   :  { %v3152_v18 = vand.u32 4294901760, %v3151_v10  ;;  %v2824_v13 = vsel %vm2728_vm3, %v2528_v17, %v2776_v15  ;;  %v2179_v11 = vadd.f32 %v2178_v34, %v11120_v43  ;;  %9007 = vmatpush3.msra.mxu0 %v14473_v37  ;;  %v14475_v17 = vld [vmem:[#allocation24_spill] sm:$0xff]  ;;  %v11385_v10 = vsub.f32 %v2917_v19, %v11347_v47  ;;  %v14478_v15 = vld [vmem:[#allocation57_spill] sm:$0xff] }
 0x1c1   :  { %v2923_v41 = vsel %vm2870_vm1, %v2824_v13, 0  ;;  %v3162_v36 = vand.u32 4294901760, %v3161_v23  ;;  %v2823_v35 = vsel %vm2727_vm4, %v2522_v3, %v2775_v22  ;;  %v3171_v5 = vsub.f32 %v11358_v52, %v13995_v14  ;;  %v11379_v46 = vpop.f32.mrf.mxu0  ;;  %v11381_v38 = vpop.f32.mrf.mxu1  ;;  %9008 = vmatprep.subr.mxu0 %v14475_v17 }
 0x1c2   :  { %14476 = vst [vmem:[#allocation66_spill] sm:$0xff] %v11385_v10  ;;  %8843 = vmatprep.mubr.f32.mxu0 %v3152_v18  ;;  %v11387_v43 = vand.u32 4294901760, %v2923_v41  ;;  %v2540_v34 = vadd.f32 %v8775_v49, %v2185_v57  ;;  %v14000_v13 = vand.u32 4294901760, %v11268_v62  ;;  %8941 = vmatmul.mubr.f32.gmra.mxu1 %v11318_v63  ;;  %v2197_v23 = vadd.f32 %v8702_v53, %v14478_v15 }
 0x1c3   :  { %8844 = vmatmul.mubr.f32.gmra.mxu0 %v3162_v36  ;;  %v3172_v3 = vand.u32 4294901760, %v3171_v5  ;;  %v2534_v22 = vadd.f32 %v2533_v54, %v2179_v11  ;;  %v11395_v37 = vsub.f32 %v11300_v7, %v11338_v1  ;;  %v8708_v19 = vpop.f32.mrf.mxu0  ;;  %v11397_v18 = vpop.f32.mrf.mxu1  ;;  %v11400_v14 = vsel %vm2870_vm1, %v2823_v35, 0  ;;  %v14481_v35 = vld [vmem:[#allocation37_spill] sm:$0xff] }
 0x1c4   :  { %14477 = vst [vmem:[#allocation68_spill] sm:$0xff] %v11387_v43  ;;  %vm2730_vm5 = vcmp.gt.f32.partialorder %v2540_v34, 0.0  ;;  %v2778_v49 = vmul.f32 0.01, %v2540_v34  ;;  %v3181_v5 = vsub.f32 %v11268_v62, %v14000_v13  ;;  %9009 = vmatpush3.msra.mxu0 %v14475_v17  ;;  %v11408_v7 = vand.u32 4294901760, %v11352_v6 }
 0x1c5   :  { %14479 = vst [vmem:[#allocation70_spill] sm:$0xff] %v11395_v37  ;;  %8846 = vmatprep.mubr.f32.mxu0 %v3172_v3  ;;  %vm2729_vm6 = vcmp.gt.f32.partialorder %v2534_v22, 0.0  ;;  %v2777_v54 = vmul.f32 0.01, %v2534_v22  ;;  %v14006_v53 = vand.u32 4294901760, %v11395_v37  ;;  %v2214_v57 = vpop.f32.mrf.mxu0  ;;  %v8784_v11 = vpop.f32.mrf.mxu1  ;;  %9170 = vmatprep.subr.mxu0 %v14481_v35  ;;  %v2191_v63 = vadd.f32 %v2190_v50, %v11123_v45 }
 0x1c6   :  { %14480 = vst [vmem:[#allocation28_spill] sm:$0xff] %v11408_v7  ;;  %v2826_v36 = vsel %vm2730_vm5, %v2540_v34, %v2778_v49  ;;  %v3182_v15 = vand.u32 4294901760, %v3181_v5  ;;  %v2552_v1 = vadd.f32 %v8778_v60, %v2197_v23  ;;  %8943 = vmatprep.mubr.f32.mxu1 %v11408_v7  ;;  %v14007_v62 = vand.u32 4294901760, %v11316_v26 }
 0x1c7   :  { %v2929_v13 = vsel %vm2870_vm1, %v2826_v36, 0  ;;  %v2825_v17 = vsel %vm2729_vm6, %v2534_v22, %v2777_v54  ;;  %v3191_v3 = vsub.f32 %v11395_v37, %v14006_v53  ;;  %v11418_v52 = vpop.f32.mrf.mxu0  ;;  %v11420_v9 = vpop.f32.mrf.mxu1  ;;  %v11423_v34 = vsub.f32 %v2923_v41, %v11387_v43  ;;  %8944 = vmatmul.mubr.f32.gmra.mxu1 %v11347_v47  ;;  %v14484_v22 = vld [vmem:[#allocation59_spill] sm:$0xff] }
 0x1c8   :  { %v11425_v45 = vand.u32 4294901760, %v2929_v13  ;;  %8847 = vmatmul.mubr.f32.gmra.mxu0 %v3182_v15  ;;  %vm2732_vm7 = vcmp.gt.f32.partialorder %v2552_v1, 0.0  ;;  %v2780_v50 = vmul.f32 0.01, %v2552_v1  ;;  %v3201_v23 = vsub.f32 %v11316_v26, %v14007_v62 }
 0x1c9   :  { %14482 = vst [vmem:[#allocation75_spill] sm:$0xff] %v11423_v34  ;;  %v3192_v60 = vand.u32 4294901760, %v3191_v3  ;;  %v2209_v49 = vadd.f32 %v8705_v4, %v14484_v22  ;;  %v2546_v5 = vadd.f32 %v2545_v42, %v2191_v63  ;;  %v11432_v54 = vpop.f32.mrf.mxu0  ;;  %v11434_v36 = vpop.f32.mrf.mxu1  ;;  %v11437_v41 = vsel %vm2870_vm1, %v2825_v17, 0 }
 0x1ca   :  { %14483 = vst [vmem:[#allocation29_spill] sm:$0xff] %v11425_v45  ;;  %v2828_v15 = vsel %vm2732_vm7, %v2552_v1, %v2780_v50  ;;  %v11441_v53 = vsub.f32 %v11327_v24, %v11371_v58  ;;  %v11444_v3 = vand.u32 4294901760, %v11400_v14  ;;  %v3202_v4 = vand.u32 4294901760, %v3201_v23 }
 0x1cb   :  { %8849 = vmatprep.mubr.f32.mxu0 %v3192_v60  ;;  %v2935_v62 = vsel %vm2870_vm1, %v2828_v15, 0  ;;  %vm2731_vm8 = vcmp.gt.f32.partialorder %v2546_v5, 0.0  ;;  %v2779_v63 = vmul.f32 0.01, %v2546_v5  ;;  %v11447_v42 = vpop.f32.mrf.mxu0  ;;  %v11449_v22 = vpop.f32.mrf.mxu1  ;;  %v2203_v24 = vadd.f32 %v11379_v46, %v11126_v56  ;;  %v14488_v15 = vld [vmem:[#allocation61_spill] sm:$0xff] }
 0x1cc   :  { %14485 = vst [vmem:[#allocation31_spill] sm:$0xff] %v11441_v53  ;;  %14486 = vst [vmem:[#allocation33_spill] sm:$0xff] %v11444_v3  ;;  %v11451_v17 = vand.u32 4294901760, %v2935_v62  ;;  %8946 = vmatprep.mubr.f32.mxu1 %v11444_v3  ;;  %v2564_v50 = vadd.f32 %v11381_v38, %v2209_v49  ;;  %v11459_v60 = vsub.f32 %v2929_v13, %v11425_v45  ;;  %8850 = vmatmul.mubr.f32.gmra.mxu0 %v3202_v4 }
 0x1cd   :  { %v14022_v23 = vand.u32 4294901760, %v11345_v32  ;;  %8947 = vmatmul.mubr.f32.gmra.mxu1 %v11387_v43  ;;  %v2221_v47 = vadd.f32 %v8708_v19, %v14488_v15  ;;  %v11466_v1 = vsub.f32 %v11352_v6, %v11408_v7  ;;  %v11468_v58 = vpop.f32.mrf.mxu0  ;;  %v11470_v26 = vpop.f32.mrf.mxu1  ;;  %v2827_v46 = vsel %vm2731_vm8, %v2546_v5, %v2779_v63 }
 0x1ce   :  { %14487 = vst [vmem:[#allocation40_spill] sm:$0xff] %v11451_v17  ;;  %v11473_v56 = vsub.f32 %v2935_v62, %v11451_v17  ;;  %v14490_v38 = vand.u32 4294901760, %v11441_v53  ;;  %vm2734_vm9 = vcmp.gt.f32.partialorder %v2564_v50, 0.0  ;;  %v2782_v49 = vmul.f32 0.01, %v2564_v50 }
 0x1cf   :  { %14489 = vst [vmem:[#allocation34_spill] sm:$0xff] %v11466_v1  ;;  %v3221_v6 = vsub.f32 %v11345_v32, %v14022_v23  ;;  %v2558_v19 = vadd.f32 %v11397_v18, %v2203_v24  ;;  %v14023_v4 = vand.u32 4294901760, %v11466_v1  ;;  %v11484_v15 = vpop.f32.mrf.mxu0  ;;  %v11486_v62 = vpop.f32.mrf.mxu1  ;;  %v11489_v5 = vand.u32 4294901760, %v11437_v41 }
 0x1d0   :  { %v3211_v13 = vsub.f32 %v11441_v53, %v14490_v38  ;;  %v2215_v63 = vadd.f32 %v2214_v57, %v11134_v30  ;;  %v2576_v38 = vadd.f32 %v8784_v11, %v2221_v47  ;;  %v2830_v7 = vsel %vm2734_vm9, %v2564_v50, %v2782_v49 }
 0x1d1   :  { %14491 = vst [vmem:[#allocation38_spill] sm:$0xff] %v11489_v5  ;;  %v3222_v53 = vand.u32 4294901760, %v3221_v6  ;;  %vm2733_vm10 = vcmp.gt.f32.partialorder %v2558_v19, 0.0  ;;  %v2781_v37 = vmul.f32 0.01, %v2558_v19  ;;  %v11492_v23 = vpop.f32.mrf.mxu0  ;;  %v11494_v18 = vpop.f32.mrf.mxu1  ;;  %v2941_v24 = vsel %vm2870_vm1, %v2830_v7, 0  ;;  %8949 = vmatprep.mubr.f32.mxu1 %v11489_v5 }
 0x1d2   :  { %v3212_v43 = vand.u32 4294901760, %v3211_v13  ;;  %v3231_v13 = vsub.f32 %v11466_v1, %v14023_v4  ;;  %vm2736_vm11 = vcmp.gt.f32.partialorder %v2576_v38, 0.0  ;;  %v2784_v30 = vmul.f32 0.01, %v2576_v38  ;;  %8950 = vmatmul.mubr.f32.gmra.mxu1 %v11425_v45 }
 0x1d3   :  { %v11502_v47 = vsel %vm2870_vm1, %v2827_v46, 0  ;;  %v2829_v57 = vsel %vm2733_vm10, %v2558_v19, %v2781_v37  ;;  %v14028_v11 = vand.u32 4294901760, %v11385_v10  ;;  %v11508_v50 = vpop.f32.mrf.mxu0  ;;  %v11510_v49 = vpop.f32.mrf.mxu1  ;;  %v11512_v6 = vand.u32 4294901760, %v2941_v24 }
 0x1d4   :  { %8852 = vmatprep.mubr.f32.mxu0 %v3212_v43  ;;  %v14492_v43 = vld [vmem:[#allocation63_spill] sm:$0xff]  ;;  %v3232_v4 = vand.u32 4294901760, %v3231_v13  ;;  %v2832_v1 = vsel %vm2736_vm11, %v2576_v38, %v2784_v30  ;;  %v2570_v46 = vadd.f32 %v11420_v9, %v2215_v63  ;;  %v11533_v63 = vand.u32 4294901760, %v11502_v47  ;;  %v14496_v13 = vld [vmem:[#allocation65_spill] sm:$0xff] }
 0x1d5   :  { %8853 = vmatmul.mubr.f32.gmra.mxu0 %v3222_v53  ;;  %v2233_v7 = vadd.f32 %v11418_v52, %v14492_v43  ;;  %14493 = vst [vmem:[#allocation43_spill] sm:$0xff] %v11512_v6  ;;  %v11516_v53 = vsel %vm2870_vm1, %v2829_v57, 0  ;;  %v2947_v37 = vsel %vm2870_vm1, %v2832_v1, 0  ;;  %v3241_v19 = vsub.f32 %v11385_v10, %v14028_v11  ;;  %v11526_v43 = vpop.f32.mrf.mxu0  ;;  %v11528_v45 = vpop.f32.mrf.mxu1 }
 0x1d6   :  { %v11524_v52 = vsub.f32 %v11400_v14, %v11444_v3  ;;  %8855 = vmatprep.mubr.f32.mxu0 %v3232_v4  ;;  %v11530_v38 = vand.u32 4294901760, %v2947_v37  ;;  %vm2735_vm12 = vcmp.gt.f32.partialorder %v2570_v46, 0.0  ;;  %v2783_v9 = vmul.f32 0.01, %v2570_v46  ;;  %14495 = vst [vmem:[#allocation41_spill] sm:$0xff] %v11533_v63  ;;  %8952 = vmatprep.mubr.f32.mxu1 %v11533_v63 }
 0x1d7   :  { %v3242_v1 = vand.u32 4294901760, %v3241_v19  ;;  %v2227_v30 = vadd.f32 %v11432_v54, %v11137_v28  ;;  %v2588_v14 = vadd.f32 %v11434_v36, %v2233_v7  ;;  %v11539_v57 = vpop.f32.mrf.mxu0  ;;  %v11541_v11 = vpop.f32.mrf.mxu1  ;;  %v11544_v4 = vsub.f32 %v2941_v24, %v11512_v6  ;;  %8953 = vmatmul.mubr.f32.gmra.mxu1 %v11451_v17 }
 0x1d8   :  { %14494 = vst [vmem:[#allocation35_spill] sm:$0xff] %v11530_v38  ;;  %v11547_v3 = vsub.f32 %v2947_v37, %v11530_v38  ;;  %v14037_v19 = vand.u32 4294901760, %v11423_v34  ;;  %v2245_v10 = vadd.f32 %v11447_v42, %v14496_v13  ;;  %v2831_v28 = vsel %vm2735_vm12, %v2570_v46, %v2783_v9 }
 0x1d9   :  { %8856 = vmatmul.mubr.f32.gmra.mxu0 %v3242_v1  ;;  %v14497_v54 = vand.u32 4294901760, %v11524_v52  ;;  %vm2738_vm13 = vcmp.gt.f32.partialorder %v2588_v14, 0.0  ;;  %v2786_v7 = vmul.f32 0.01, %v2588_v14  ;;  %v11557_v24 = vpop.f32.mrf.mxu1  ;;  %v2582_v32 = vadd.f32 %v11449_v22, %v2227_v30  ;;  %v11570_v9 = vpop.f32.mrf.mxu0 }
 0x1da   :  { %v3261_v37 = vsub.f32 %v11423_v34, %v14037_v19  ;;  %v11565_v42 = vsub.f32 %v11437_v41, %v11489_v5  ;;  %v11568_v46 = vand.u32 4294901760, %v11516_v53  ;;  %v2600_v17 = vadd.f32 %v11470_v26, %v2245_v10  ;;  %v14500_v26 = vld [vmem:[#allocation67_spill] sm:$0xff] }
 0x1db   :  { %v3251_v36 = vsub.f32 %v11524_v52, %v14497_v54  ;;  %v2834_v13 = vsel %vm2738_vm13, %v2588_v14, %v2786_v7  ;;  %v2239_v54 = vadd.f32 %v11468_v58, %v11140_v39  ;;  %vm2737_vm14 = vcmp.gt.f32.partialorder %v2582_v32, 0.0  ;;  %v11577_v41 = vpop.f32.mrf.mxu1 }
 0x1dc   :  { %14498 = vst [vmem:[#allocation46_spill] sm:$0xff] %v11568_v46  ;;  %v2953_v19 = vsel %vm2870_vm1, %v2834_v13, 0  ;;  %v3262_v34 = vand.u32 4294901760, %v3261_v37  ;;  %v2785_v22 = vmul.f32 0.01, %v2582_v32  ;;  %8955 = vmatprep.mubr.f32.mxu1 %v11568_v46  ;;  %vm2740_vm15 = vcmp.gt.f32.partialorder %v2600_v17, 0.0  ;;  %v11590_v37 = vpop.f32.mrf.mxu0 }
 0x1dd   :  { %v3252_v1 = vand.u32 4294901760, %v3251_v36  ;;  %v11579_v30 = vand.u32 4294901760, %v2953_v19  ;;  %v14043_v36 = vand.u32 4294901760, %v11565_v42  ;;  %v2788_v14 = vmul.f32 0.01, %v2600_v17  ;;  %8956 = vmatmul.mubr.f32.gmra.mxu1 %v11512_v6 }
 0x1de   :  { %v11584_v39 = vsel %vm2870_vm1, %v2831_v28, 0  ;;  %v14042_v58 = vand.u32 4294901760, %v11459_v60  ;;  %v2257_v10 = vadd.f32 %v11484_v15, %v14500_v26  ;;  %v2594_v7 = vadd.f32 %v11486_v62, %v2239_v54  ;;  %v11603_v54 = vpop.f32.mrf.mxu1 }
 0x1df   :  { %8858 = vmatprep.mubr.f32.mxu0 %v3252_v1  ;;  %14499 = vst [vmem:[#allocation53_spill] sm:$0xff] %v11579_v30  ;;  %v11593_v1 = vsub.f32 %v2953_v19, %v11579_v30  ;;  %v2833_v13 = vsel %vm2737_vm14, %v2582_v32, %v2785_v22  ;;  %v3271_v28 = vsub.f32 %v11565_v42, %v14043_v36  ;;  %v11612_v22 = vand.u32 4294901760, %v11584_v39  ;;  %v11620_v36 = vpop.f32.mrf.mxu0 }
 0x1e0   :  { %8859 = vmatmul.mubr.f32.gmra.mxu0 %v3262_v34  ;;  %v2836_v6 = vsel %vm2740_vm15, %v2600_v17, %v2788_v14  ;;  %v3281_v15 = vsub.f32 %v11459_v60, %v14042_v58  ;;  %vm2739_vm0 = vcmp.gt.f32.partialorder %v2594_v7, 0.0  ;;  %v2787_v62 = vmul.f32 0.01, %v2594_v7 }
 0x1e1   :  { %v2959_v34 = vsel %vm2870_vm1, %v2836_v6, 0  ;;  %v3272_v26 = vand.u32 4294901760, %v3271_v28  ;;  %v11609_v32 = vsub.f32 %v11502_v47, %v11533_v63  ;;  %14502 = vst [vmem:[#allocation49_spill] sm:$0xff] %v11612_v22  ;;  %v11615_v17 = vsel %vm2870_vm1, %v2833_v13, 0  ;;  %8958 = vmatprep.mubr.f32.mxu1 %v11612_v22 }
 0x1e2   :  { %v11605_v19 = vand.u32 4294901760, %v2959_v34  ;;  %v3282_v6 = vand.u32 4294901760, %v3281_v15  ;;  %v2251_v14 = vadd.f32 %v11492_v23, %v11143_v0  ;;  %v2612_v58 = vadd.f32 %v11494_v18, %v2257_v10  ;;  %8959 = vmatmul.mubr.f32.gmra.mxu1 %v11530_v38  ;;  %v14503_v0 = vld [vmem:[#allocation69_spill] sm:$0xff]  ;;  %v11632_v10 = vpop.f32.mrf.mxu1 }
 0x1e3   :  { %8861 = vmatprep.mubr.f32.mxu0 %v3272_v26  ;;  %v2835_v47 = vsel %vm2739_vm0, %v2594_v7, %v2787_v62  ;;  %v14046_v63 = vand.u32 4294901760, %v11609_v32  ;;  %v14047_v13 = vand.u32 4294901760, %v11473_v56  ;;  %v2269_v23 = vadd.f32 %v11508_v50, %v14503_v0 }
 0x1e4   :  { %14501 = vst [vmem:[#allocation10_spill] sm:$0xff] %v11605_v19  ;;  %v11623_v28 = vsub.f32 %v2959_v34, %v11605_v19  ;;  %8862 = vmatmul.mubr.f32.gmra.mxu0 %v3282_v6  ;;  %vm2742_vm2 = vcmp.gt.f32.partialorder %v2612_v58, 0.0  ;;  %v2790_v15 = vmul.f32 0.01, %v2612_v58  ;;  %v2606_v18 = vadd.f32 %v11510_v49, %v2251_v14  ;;  %v11649_v14 = vpop.f32.mrf.mxu0 }
 0x1e5   :  { %v3291_v7 = vsub.f32 %v11609_v32, %v14046_v63  ;;  %v3301_v34 = vsub.f32 %v11473_v56, %v14047_v13  ;;  %v11642_v62 = vsub.f32 %v11516_v53, %v11568_v46  ;;  %v11645_v26 = vand.u32 4294901760, %v11615_v17 }
 0x1e6   :  { %v2838_v50 = vsel %vm2742_vm2, %v2612_v58, %v2790_v15  ;;  %vm2741_vm3 = vcmp.gt.f32.partialorder %v2606_v18, 0.0  ;;  %v2789_v49 = vmul.f32 0.01, %v2606_v18  ;;  %v2263_v6 = vadd.f32 %v11526_v43, %v11146_v20  ;;  %v11660_v20 = vpop.f32.mrf.mxu1 }
 0x1e7   :  { %14504 = vst [vmem:[#allocation14_spill] sm:$0xff] %v11645_v26  ;;  %v11652_v0 = vsel %vm2870_vm1, %v2835_v47, 0  ;;  %v3292_v63 = vand.u32 4294901760, %v3291_v7  ;;  %v2965_v13 = vsel %vm2870_vm1, %v2838_v50, 0  ;;  %v14052_v53 = vand.u32 4294901760, %v11642_v62  ;;  %8961 = vmatprep.mubr.f32.mxu1 %v11645_v26  ;;  %v14506_v7 = vld [vmem:[#allocation71_spill] sm:$0xff] }
 0x1e8   :  { %v3302_v38 = vand.u32 4294901760, %v3301_v34  ;;  %v2837_v46 = vsel %vm2741_vm3, %v2606_v18, %v2789_v49  ;;  %v2624_v58 = vadd.f32 %v11528_v45, %v2269_v23  ;;  %v14053_v15 = vand.u32 4294901760, %v11544_v4  ;;  %8962 = vmatmul.mubr.f32.gmra.mxu1 %v11579_v30  ;;  %v11676_v34 = vpop.f32.mrf.mxu0 }
 0x1e9   :  { %8864 = vmatprep.mubr.f32.mxu0 %v3292_v63  ;;  %v11662_v43 = vand.u32 4294901760, %v2965_v13  ;;  %v3311_v47 = vsub.f32 %v11642_v62, %v14052_v53  ;;  %v2281_v50 = vadd.f32 %v11539_v57, %v14506_v7  ;;  %v2618_v18 = vadd.f32 %v11541_v11, %v2263_v6  ;;  %v11687_v7 = vpop.f32.mrf.mxu1 }
 0x1ea   :  { %8865 = vmatmul.mubr.f32.gmra.mxu0 %v3302_v38  ;;  %v11671_v45 = vsel %vm2870_vm1, %v2837_v46, 0  ;;  %vm2744_vm4 = vcmp.gt.f32.partialorder %v2624_v58, 0.0  ;;  %v2792_v23 = vmul.f32 0.01, %v2624_v58  ;;  %v3321_v63 = vsub.f32 %v11544_v4, %v14053_v15 }
 0x1eb   :  { %14505 = vst [vmem:[#allocation18_spill] sm:$0xff] %v11662_v43  ;;  %v3312_v49 = vand.u32 4294901760, %v3311_v47  ;;  %vm2743_vm5 = vcmp.gt.f32.partialorder %v2618_v18, 0.0  ;;  %v2791_v53 = vmul.f32 0.01, %v2618_v18  ;;  %v11680_v57 = vsub.f32 %v11584_v39, %v11612_v22 }
 0x1ec   :  { %v2840_v11 = vsel %vm2744_vm4, %v2624_v58, %v2792_v23  ;;  %v3322_v38 = vand.u32 4294901760, %v3321_v63  ;;  %v11683_v46 = vand.u32 4294901760, %v11652_v0  ;;  %v2275_v6 = vadd.f32 %v11570_v9, %v11151_v21  ;;  %v14508_v9 = vld [vmem:[#allocation72_spill] sm:$0xff]  ;;  %v8732_v63 = vpop.f32.mrf.mxu0 }
 0x1ed   :  { %8867 = vmatprep.mubr.f32.mxu0 %v3312_v49  ;;  %v2971_v15 = vsel %vm2870_vm1, %v2840_v11, 0  ;;  %v2839_v47 = vsel %vm2743_vm5, %v2618_v18, %v2791_v53  ;;  %v14058_v30 = vand.u32 4294901760, %v11680_v57  ;;  %v2636_v5 = vadd.f32 %v11557_v24, %v2281_v50  ;;  %v11719_v11 = vpop.f32.mrf.mxu1 }
 0x1ee   :  { %v11693_v39 = vsub.f32 %v2965_v13, %v11662_v43  ;;  %v11695_v58 = vand.u32 4294901760, %v2971_v15  ;;  %8868 = vmatmul.mubr.f32.gmra.mxu0 %v3322_v38  ;;  %8964 = vmatprep.mubr.f32.mxu1 %v11683_v46  ;;  %v14059_v21 = vand.u32 4294901760, %v11547_v3  ;;  %v2293_v23 = vadd.f32 %v11590_v37, %v14508_v9 }
 0x1ef   :  { %v3331_v53 = vsub.f32 %v11680_v57, %v14058_v30  ;;  %vm2746_vm6 = vcmp.gt.f32.partialorder %v2636_v5, 0.0  ;;  %v2794_v24 = vmul.f32 0.01, %v2636_v5  ;;  %8965 = vmatmul.mubr.f32.gmra.mxu1 %v11605_v19  ;;  %v2630_v13 = vadd.f32 %v11577_v41, %v2275_v6 }
 0x1f0   :  { %14507 = vst [vmem:[#allocation55_spill] sm:$0xff] %v11695_v58  ;;  %v11707_v50 = vsel %vm2870_vm1, %v2839_v47, 0  ;;  %v3341_v18 = vsub.f32 %v11547_v3, %v14059_v21  ;;  %v11714_v37 = vsub.f32 %v11615_v17, %v11645_v26  ;;  %v11717_v49 = vand.u32 4294901760, %v11671_v45  ;;  %v2310_v21 = vpop.f32.mrf.mxu0 }
 0x1f1   :  { %v3332_v38 = vand.u32 4294901760, %v3331_v53  ;;  %v2842_v9 = vsel %vm2746_vm6, %v2636_v5, %v2794_v24  ;;  %vm2745_vm7 = vcmp.gt.f32.partialorder %v2630_v13, 0.0  ;;  %v2793_v41 = vmul.f32 0.01, %v2630_v13 }
 0x1f2   :  { %14509 = vst [vmem:[#allocation21_spill] sm:$0xff] %v11717_v49  ;;  %v2977_v6 = vsel %vm2870_vm1, %v2842_v9, 0  ;;  %v3342_v47 = vand.u32 4294901760, %v3341_v18  ;;  %v14064_v30 = vand.u32 4294901760, %v11714_v37  ;;  %8967 = vmatprep.mubr.f32.mxu1 %v11717_v49  ;;  %v2287_v17 = vadd.f32 %v11620_v36, %v11154_v16  ;;  %v14511_v16 = vld [vmem:[#allocation73_spill] sm:$0xff] }
 0x1f3   :  { %v11727_v19 = vsub.f32 %v2971_v15, %v11695_v58  ;;  %8870 = vmatprep.mubr.f32.mxu0 %v3332_v38  ;;  %v2841_v26 = vsel %vm2745_vm7, %v2630_v13, %v2793_v41  ;;  %v2648_v5 = vadd.f32 %v11603_v54, %v2293_v23  ;;  %v14065_v53 = vand.u32 4294901760, %v11593_v1  ;;  %8968 = vmatmul.mubr.f32.gmra.mxu1 %v11662_v43  ;;  %v2665_v38 = vpop.f32.mrf.mxu1 }
 0x1f4   :  { %v11732_v24 = vand.u32 4294901760, %v2977_v6  ;;  %8871 = vmatmul.mubr.f32.gmra.mxu0 %v3342_v47  ;;  %v3351_v18 = vsub.f32 %v11714_v37, %v14064_v30  ;;  %v2305_v36 = vadd.f32 %v11649_v14, %v14511_v16  ;;  %v2642_v15 = vadd.f32 %v11632_v10, %v2287_v17  ;;  %v8735_v14 = vpop.f32.mrf.mxu0 }
 0x1f5   :  { %v11741_v13 = vsel %vm2870_vm1, %v2841_v26, 0  ;;  %vm2748_vm8 = vcmp.gt.f32.partialorder %v2648_v5, 0.0  ;;  %v2796_v54 = vmul.f32 0.01, %v2648_v5  ;;  %v3361_v23 = vsub.f32 %v11593_v1, %v14065_v53  ;;  %v8811_v22 = vpop.f32.mrf.mxu1 }
 0x1f6   :  { %14510 = vst [vmem:[#allocation24_spill] sm:$0xff] %v11732_v24  ;;  %v3352_v9 = vand.u32 4294901760, %v3351_v18  ;;  %vm2747_vm9 = vcmp.gt.f32.partialorder %v2642_v15, 0.0  ;;  %v2795_v41 = vmul.f32 0.01, %v2642_v15  ;;  %v11748_v47 = vsub.f32 %v11652_v0, %v11683_v46 }
 0x1f7   :  { %v2844_v16 = vsel %vm2748_vm8, %v2648_v5, %v2796_v54  ;;  %v3362_v10 = vand.u32 4294901760, %v3361_v23  ;;  %v11751_v17 = vand.u32 4294901760, %v11707_v50  ;;  %v2299_v26 = vadd.f32 %v11676_v34, %v11157_v44  ;;  %v14513_v44 = vld [vmem:[#allocation74_spill] sm:$0xff] }
 0x1f8   :  { %8873 = vmatprep.mubr.f32.mxu0 %v3352_v9  ;;  %v2983_v30 = vsel %vm2870_vm1, %v2844_v16, 0  ;;  %v2843_v53 = vsel %vm2747_vm9, %v2642_v15, %v2795_v41  ;;  %v14070_v18 = vand.u32 4294901760, %v11748_v47  ;;  %v2660_v43 = vadd.f32 %v11660_v20, %v2305_v36 }
 0x1f9   :  { %v11759_v0 = vsub.f32 %v2977_v6, %v11732_v24  ;;  %v11761_v5 = vand.u32 4294901760, %v2983_v30  ;;  %8874 = vmatmul.mubr.f32.gmra.mxu0 %v3362_v10  ;;  %8970 = vmatprep.mubr.f32.mxu1 %v11751_v17  ;;  %v14071_v54 = vand.u32 4294901760, %v11623_v28  ;;  %v2317_v34 = vadd.f32 %v8732_v63, %v14513_v44  ;;  %v2322_v6 = vpop.f32.mrf.mxu0 }
 0x1fa   :  { %v3371_v15 = vsub.f32 %v11748_v47, %v14070_v18  ;;  %vm2750_vm10 = vcmp.gt.f32.partialorder %v2660_v43, 0.0  ;;  %v2798_v23 = vmul.f32 0.01, %v2660_v43  ;;  %8971 = vmatmul.mubr.f32.gmra.mxu1 %v11695_v58  ;;  %v2654_v20 = vadd.f32 %v11687_v7, %v2299_v26  ;;  %v2677_v7 = vpop.f32.mrf.mxu1 }
 0x1fb   :  { %14512 = vst [vmem:[#allocation57_spill] sm:$0xff] %v11761_v5  ;;  %v11772_v36 = vsel %vm2870_vm1, %v2843_v53, 0  ;;  %v3381_v9 = vsub.f32 %v11623_v28, %v14071_v54  ;;  %v11779_v63 = vsub.f32 %v11671_v45, %v11717_v49  ;;  %v11782_v41 = vand.u32 4294901760, %v11741_v13 }
 0x1fc   :  { %v3372_v16 = vand.u32 4294901760, %v3371_v15  ;;  %v2846_v10 = vsel %vm2750_vm10, %v2660_v43, %v2798_v23  ;;  %vm2749_vm11 = vcmp.gt.f32.partialorder %v2654_v20, 0.0  ;;  %v2797_v44 = vmul.f32 0.01, %v2654_v20  ;;  %v8738_v23 = vpop.f32.mrf.mxu0 }
 0x1fd   :  { %v2989_v26 = vsel %vm2870_vm1, %v2846_v10, 0  ;;  %v3382_v53 = vand.u32 4294901760, %v3381_v9  ;;  %v14074_v18 = vand.u32 4294901760, %v11779_v63  ;;  %8973 = vmatprep.mubr.f32.mxu1 %v11782_v41  ;;  %v2311_v54 = vadd.f32 %v2310_v21, %v11160_v33 }
 0x1fe   :  { %v11789_v45 = vsub.f32 %v2983_v30, %v11761_v5  ;;  %8876 = vmatprep.mubr.f32.mxu0 %v3372_v16  ;;  %v2845_v58 = vsel %vm2749_vm11, %v2654_v20, %v2797_v44  ;;  %v2672_v15 = vadd.f32 %v11719_v11, %v2317_v34  ;;  %v14075_v43 = vand.u32 4294901760, %v11693_v39  ;;  %8974 = vmatmul.mubr.f32.gmra.mxu1 %v11732_v24  ;;  %v8814_v20 = vpop.f32.mrf.mxu1 }
 0x1ff   :  { %v11794_v10 = vand.u32 4294901760, %v2989_v26  ;;  %8877 = vmatmul.mubr.f32.gmra.mxu0 %v3382_v53  ;;  %v3391_v9 = vsub.f32 %v11779_v63, %v14074_v18  ;;  %v2329_v33 = vadd.f32 %v8735_v14, %v11037_v59  ;;  %v2666_v30 = vadd.f32 %v2665_v38, %v2311_v54  ;;  %v2334_v14 = vpop.f32.mrf.mxu0 }
 0x200   :  { %v11801_v21 = vsel %vm2870_vm1, %v2845_v58, 0  ;;  %vm2752_vm12 = vcmp.gt.f32.partialorder %v2672_v15, 0.0  ;;  %v2800_v11 = vmul.f32 0.01, %v2672_v15  ;;  %v3401_v34 = vsub.f32 %v11693_v39, %v14075_v43 }
 0x201   :  { %v3392_v16 = vand.u32 4294901760, %v3391_v9  ;;  %vm2751_vm13 = vcmp.gt.f32.partialorder %v2666_v30, 0.0  ;;  %v2799_v44 = vmul.f32 0.01, %v2666_v30  ;;  %v11808_v53 = vsub.f32 %v11707_v50, %v11751_v17 }
 0x202   :  { %v2848_v18 = vsel %vm2752_vm12, %v2672_v15, %v2800_v11  ;;  %v3402_v59 = vand.u32 4294901760, %v3401_v34  ;;  %v11811_v38 = vand.u32 4294901760, %v11772_v36  ;;  %v2323_v58 = vadd.f32 %v2322_v6, %v11163_v12  ;;  %v2689_v6 = vpop.f32.mrf.mxu1  ;;  %v8741_v11 = vpop.f32.mrf.mxu0 }
 0x203   :  { %8879 = vmatprep.mubr.f32.mxu0 %v3392_v16  ;;  %v2995_v54 = vsel %vm2870_vm1, %v2848_v18, 0  ;;  %v2847_v43 = vsel %vm2751_vm13, %v2666_v30, %v2799_v44  ;;  %v14081_v9 = vand.u32 4294901760, %v11808_v53  ;;  %v2684_v24 = vadd.f32 %v8811_v22, %v2329_v33 }
 0x204   :  { %v11817_v49 = vsub.f32 %v2989_v26, %v11794_v10  ;;  %v11819_v50 = vand.u32 4294901760, %v2995_v54  ;;  %8880 = vmatmul.mubr.f32.gmra.mxu0 %v3402_v59  ;;  %8976 = vmatprep.mubr.f32.mxu1 %v11811_v38  ;;  %v14080_v15 = vand.u32 4294901760, %v11727_v19  ;;  %v2341_v12 = vadd.f32 %v8738_v23, %v11070_v51 }
 0x205   :  { %v3411_v18 = vsub.f32 %v11808_v53, %v14081_v9  ;;  %vm2754_vm14 = vcmp.gt.f32.partialorder %v2684_v24, 0.0  ;;  %v2802_v30 = vmul.f32 0.01, %v2684_v24  ;;  %8977 = vmatmul.mubr.f32.gmra.mxu1 %v11761_v5  ;;  %v2678_v22 = vadd.f32 %v2677_v7, %v2323_v58 }
 0x206   :  { %v11829_v26 = vsel %vm2870_vm1, %v2847_v43, 0  ;;  %v3421_v33 = vsub.f32 %v11727_v19, %v14080_v15  ;;  %v11836_v51 = vsub.f32 %v11741_v13, %v11782_v41  ;;  %v11839_v23 = vand.u32 4294901760, %v11801_v21  ;;  %v8817_v15 = vpop.f32.mrf.mxu1 }
 0x207   :  { %v3412_v34 = vand.u32 4294901760, %v3411_v18  ;;  %v2850_v16 = vsel %vm2754_vm14, %v2684_v24, %v2802_v30  ;;  %vm2753_vm15 = vcmp.gt.f32.partialorder %v2678_v22, 0.0  ;;  %v2801_v44 = vmul.f32 0.01, %v2678_v22 }
 0x208   :  { %v3001_v7 = vsel %vm2870_vm1, %v2850_v16, 0  ;;  %v3422_v43 = vand.u32 4294901760, %v3421_v33  ;;  %v14085_v59 = vand.u32 4294901760, %v11836_v51  ;;  %8979 = vmatprep.mubr.f32.mxu1 %v11839_v23  ;;  %v2335_v58 = vadd.f32 %v2334_v14, %v11178_v31  ;;  %v2346_v33 = vpop.f32.mrf.mxu0 }
 0x209   :  { %v11846_v13 = vsub.f32 %v2995_v54, %v11819_v50  ;;  %8882 = vmatprep.mubr.f32.mxu0 %v3412_v34  ;;  %v2849_v9 = vsel %vm2753_vm15, %v2678_v22, %v2801_v44  ;;  %v2696_v5 = vadd.f32 %v8814_v20, %v2341_v12  ;;  %v14084_v24 = vand.u32 4294901760, %v11759_v0  ;;  %8980 = vmatmul.mubr.f32.gmra.mxu1 %v11794_v10  ;;  %v2701_v44 = vpop.f32.mrf.mxu1 }
 0x20a   :  { %v11850_v18 = vand.u32 4294901760, %v3001_v7  ;;  %8883 = vmatmul.mubr.f32.gmra.mxu0 %v3422_v43  ;;  %v3431_v30 = vsub.f32 %v11836_v51, %v14085_v59  ;;  %v2353_v31 = vadd.f32 %v8741_v11, %v11107_v48  ;;  %v2690_v14 = vadd.f32 %v2689_v6, %v2335_v58 }
 0x20b   :  { %v2998_v54 = vsel %vm2870_vm1, %v2849_v9, 0  ;;  %vm2756_vm0 = vcmp.gt.f32.partialorder %v2696_v5, 0.0  ;;  %v2804_v22 = vmul.f32 0.01, %v2696_v5  ;;  %v3441_v20 = vsub.f32 %v11759_v0, %v14084_v24 }
 0x20c   :  { %v3432_v12 = vand.u32 4294901760, %v3431_v30  ;;  %vm2755_vm2 = vcmp.gt.f32.partialorder %v2690_v14, 0.0  ;;  %v2803_v34 = vmul.f32 0.01, %v2690_v14  ;;  %v11862_v16 = vsub.f32 %v11772_v36, %v11811_v38 }
 0x20d   :  { %v2852_v43 = vsel %vm2756_vm0, %v2696_v5, %v2804_v22  ;;  %v3442_v48 = vand.u32 4294901760, %v3441_v20  ;;  %v11865_v6 = vand.u32 4294901760, %v11829_v26  ;;  %v2347_v9 = vadd.f32 %v2346_v33, %v11192_v25 }
 0x20e   :  { %8885 = vmatprep.mubr.f32.mxu0 %v3432_v12  ;;  %v3007_v11 = vsel %vm2870_vm1, %v2852_v43, 0  ;;  %v2851_v58 = vsel %vm2755_vm2, %v2690_v14, %v2803_v34  ;;  %v14090_v30 = vand.u32 4294901760, %v11862_v16  ;;  %v2708_v24 = vadd.f32 %v8817_v15, %v2353_v31 }
 0x20f   :  { %v11871_v59 = vsub.f32 %v3001_v7, %v11850_v18  ;;  %v11873_v36 = vand.u32 4294901760, %v3007_v11  ;;  %8886 = vmatmul.mubr.f32.gmra.mxu0 %v3442_v48  ;;  %8982 = vmatprep.mubr.f32.mxu1 %v11865_v6  ;;  %v14086_v5 = vand.u32 4294901760, %v11789_v45  ;;  %v2702_v22 = vadd.f32 %v2701_v44, %v2347_v9 }
 0x210   :  { %v3451_v25 = vsub.f32 %v11862_v16, %v14090_v30  ;;  %vm2758_vm3 = vcmp.gt.f32.partialorder %v2708_v24, 0.0  ;;  %v2806_v14 = vmul.f32 0.01, %v2708_v24  ;;  %8983 = vmatmul.mubr.f32.gmra.mxu1 %v11819_v50  ;;  %v11883_v15 = vsub.f32 %v11801_v21, %v11839_v23 }
 0x211   :  { %14514 = vst [vmem:[#allocation37_spill] sm:$0xff] %v11873_v36  ;;  %v3004_v7 = vsel %vm2870_vm1, %v2851_v58, 0  ;;  %v3461_v31 = vsub.f32 %v11789_v45, %v14086_v5  ;;  %vm2757_vm4 = vcmp.gt.f32.partialorder %v2702_v22, 0.0  ;;  %v2805_v33 = vmul.f32 0.01, %v2702_v22 }
 0x212   :  { %v3452_v20 = vand.u32 4294901760, %v3451_v25  ;;  %v2854_v12 = vsel %vm2758_vm3, %v2708_v24, %v2806_v14  ;;  %v14088_v34 = vand.u32 4294901760, %v11883_v15  ;;  %v11890_v44 = vand.u32 4294901760, %v2998_v54 }
 0x213   :  { %v3013_v43 = vsel %vm2870_vm1, %v2854_v12, 0  ;;  %v3462_v48 = vand.u32 4294901760, %v3461_v31  ;;  %v2853_v9 = vsel %vm2757_vm4, %v2702_v22, %v2805_v33  ;;  %v14087_v21 = vand.u32 4294901760, %v11817_v49 }
 0x214   :  { %v11895_v58 = vsub.f32 %v3007_v11, %v11873_v36  ;;  %8888 = vmatprep.mubr.f32.mxu0 %v3452_v20  ;;  %v3010_v5 = vsel %vm2870_vm1, %v2853_v9, 0  ;;  %v3471_v24 = vsub.f32 %v11883_v15, %v14088_v34  ;;  %8985 = vmatprep.mubr.f32.mxu1 %v11890_v44  ;;  %v11904_v25 = vsub.f32 %v11829_v26, %v11865_v6 }
 0x215   :  { %8889 = vmatmul.mubr.f32.gmra.mxu0 %v3462_v48  ;;  %v3481_v22 = vsub.f32 %v11817_v49, %v14087_v21  ;;  %8986 = vmatmul.mubr.f32.gmra.mxu1 %v11850_v18  ;;  %v11910_v11 = vand.u32 4294901760, %v3004_v7  ;;  %v14089_v14 = vand.u32 4294901760, %v11846_v13  ;;  %v11914_v31 = vsub.f32 %v2998_v54, %v11890_v44 }
 0x216   :  { %v11916_v33 = vand.u32 4294901760, %v3013_v43  ;;  %v3472_v20 = vand.u32 4294901760, %v3471_v24  ;;  %v14091_v26 = vand.u32 4294901760, %v11904_v25  ;;  %v11919_v12 = vand.u32 4294901760, %v3010_v5 }
 0x217   :  { %14515 = vst [vmem:[#allocation59_spill] sm:$0xff] %v11910_v11  ;;  %v3482_v48 = vand.u32 4294901760, %v3481_v22  ;;  %8988 = vmatprep.mubr.f32.mxu1 %v11910_v11  ;;  %v3501_v9 = vsub.f32 %v11846_v13, %v14089_v14  ;;  %v14096_v21 = vand.u32 4294901760, %v11914_v31  ;;  %v11931_v24 = vsub.f32 %v3004_v7, %v11910_v11 }
 0x218   :  { %8891 = vmatprep.mubr.f32.mxu0 %v3472_v20  ;;  %v3491_v54 = vsub.f32 %v11904_v25, %v14091_v26  ;;  %v11934_v22 = vsub.f32 %v3010_v5, %v11919_v12  ;;  %v11941_v30 = vsub.f32 %v3013_v43, %v11916_v33  ;;  %v3540_v11 = vand.u32 4294901760, %v11895_v58 }
 0x219   :  { %8892 = vmatmul.mubr.f32.gmra.mxu0 %v3482_v48  ;;  %8989 = vmatmul.mubr.f32.gmra.mxu1 %v11873_v36  ;;  %v3511_v14 = vsub.f32 %v11914_v31, %v14096_v21  ;;  %v3530_v26 = vand.u32 4294901760, %v11931_v24  ;;  %v3502_v34 = vand.u32 4294901760, %v3501_v9  ;;  %v14516_v48 = vand.u32 4294901760, %v11871_v59 }
 0x21a   :  { %v3492_v20 = vand.u32 4294901760, %v3491_v54  ;;  %8991 = vmatprep.mubr.f32.mxu1 %v11919_v12  ;;  %v3550_v7 = vand.u32 4294901760, %v11934_v22  ;;  %v14517_v54 = vand.u32 4294901760, %v11205_v2  ;;  %v3560_v21 = vand.u32 4294901760, %v11941_v30 }
 0x21b   :  { %v3512_v5 = vand.u32 4294901760, %v3511_v14  ;;  %v3521_v36 = vsub.f32 %v11871_v59, %v14516_v48  ;;  %v3531_v43 = vsub.f32 %v11931_v24, %v3530_v26  ;;  %vm5728_vm1 = vcmask 261120  }
 0x21c   :  { %8894 = vmatprep.mubr.f32.mxu0 %v3492_v20  ;;  %v3551_v14 = vsub.f32 %v11934_v22, %v3550_v7  ;;  %v3541_v20 = vsub.f32 %v11895_v58, %v3540_v11 }
 0x21d   :  { %8895 = vmatmul.mubr.f32.gmra.mxu0 %v3502_v34  ;;  %8992 = vmatmul.mubr.f32.gmra.mxu1 %v11916_v33  ;;  %v3532_v9 = vand.u32 4294901760, %v3531_v43  ;;  %v3522_v48 = vand.u32 4294901760, %v3521_v36  ;;  %v14518_v34 = vand.u32 4294901760, %v11174_v40  ;;  %v3561_v36 = vsub.f32 %v11941_v30, %v3560_v21 }
 0x21e   :  { %8897 = vmatprep.mubr.f32.mxu0 %v3512_v5  ;;  %9098 = vmatprep.mubr.f32.mxu1 %v14517_v54  ;;  %v14519_v5 = vand.u32 4294901760, %v11257_v29  ;;  %v3552_v43 = vand.u32 4294901760, %v3551_v14  ;;  %v3542_v54 = vand.u32 4294901760, %v3541_v20  ;;  %v14522_v14 = vld [vmem:[#allocation52_spill] sm:$0xff]  ;;  %v14523_v20 = vld [vmem:[#allocation26_spill] sm:$0xff] }
 0x221   :  { %8898 = vmatmul.mubr.f32.gmra.mxu0 %v3522_v48  ;;  %9099 = vmatmul.mubr.f32.vlgmr.msra.gmra.mxu1 %v14518_v34  ;;  %v14520_v48 = vand.u32 4294901760, %v11209_v8  ;;  %v3562_v34 = vand.u32 4294901760, %v3561_v36  ;;  %v14528_v36 = vld [vmem:[#allocation48_spill] sm:$0xff] }
 0x222   :  { %8900 = vmatprep.mubr.f32.mxu0 %v3532_v9  ;;  %9101 = vmatprep.mubr.f32.mxu1 %v14519_v5  ;;  %v14521_v9 = vand.u32 4294901760, %v11295_v27  ;;  %v14524_v5 = vand.u32 4294901760, %v14523_v20 }
 0x223   :  { %9259 = vmatpush3.msra.mxu1 %v14434_v61  ;;  %v14525_v61 = vld [vmem:[#allocation56_spill] sm:$0xff] }
 0x224   :  { %9260 = vmatprep.subr.mxu1 %v14435_v55 }
 0x225   :  { %8901 = vmatmul.mubr.f32.gmra.mxu0 %v3542_v54  ;;  %9102 = vmatmul.mubr.f32.gmra.mxu1 %v14520_v48  ;;  %v14526_v54 = vand.u32 4294901760, %v14525_v61  ;;  %v14529_v48 = vand.u32 4294901760, %v14528_v36 }
 0x226   :  { %8903 = vmatprep.mubr.f32.mxu0 %v3552_v43  ;;  %9104 = vmatprep.mubr.f32.mxu1 %v14521_v9  ;;  %v14527_v43 = vld [vmem:[#allocation9_spill] sm:$0xff] }
 0x227   :  { %9261 = vmatpush3.msra.mxu1 %v14435_v55  ;;  %v14530_v55 = vld [vmem:[#allocation62_spill] sm:$0xff] }
 0x228   :  { %9262 = vmatprep.subr.mxu1 %v14522_v14  ;;  %v14531_v9 = vand.u32 4294901760, %v14530_v55 }
 0x229   :  { %8904 = vmatmul.mubr.f32.gmra.mxu0 %v3562_v34  ;;  %9105 = vmatmul.mubr.f32.gmra.mxu1 %v14524_v5  ;;  %v14533_v34 = vld [vmem:[#allocation11_spill] sm:$0xff]  ;;  %v14536_v5 = vld [vmem:[#allocation70_spill] sm:$0xff] }
 0x22a   :  { %9010 = vmatprep.mubr.f32.mxu0 %v11205_v2  ;;  %9107 = vmatprep.mubr.f32.mxu1 %v14526_v54  ;;  %v14532_v2 = vld [vmem:[#allocation45_spill] sm:$0xff]  ;;  %v14539_v54 = vld [vmem:[#allocation15_spill] sm:$0xff] }
 0x22b   :  { %9263 = vmatpush3.msra.mxu1 %v14522_v14  ;;  %v14534_v14 = vld [vmem:[#allocation7_spill] sm:$0xff] }
 0x22c   :  { %9264 = vmatprep.subr.mxu1 %v14527_v43 }
 0x22d   :  { %9011 = vmatmul.mubr.f32.vlgmr.msra.gmra.mxu0 %v11174_v40  ;;  %9108 = vmatmul.mubr.f32.gmra.mxu1 %v14529_v48  ;;  %v14535_v40 = vand.u32 4294901760, %v14534_v14  ;;  %v14542_v48 = vld [vmem:[#allocation31_spill] sm:$0xff] }
 0x22e   :  { %9013 = vmatprep.mubr.f32.mxu0 %v11257_v29  ;;  %9110 = vmatprep.mubr.f32.mxu1 %v14531_v9  ;;  %v14537_v29 = vand.u32 4294901760, %v14536_v5  ;;  %v14544_v9 = vld [vmem:[#allocation13_spill] sm:$0xff] }
 0x22f   :  { %9171 = vmatpush3.msra.mxu0 %v14481_v35  ;;  %9265 = vmatpush3.msra.mxu1 %v14527_v43  ;;  %v14538_v35 = vld [vmem:[#allocation6_spill] sm:$0xff]  ;;  %v14540_v43 = vld [vmem:[#allocation12_spill] sm:$0xff] }
 0x230   :  { %9172 = vmatprep.subr.mxu0 %v14532_v2  ;;  %9266 = vmatprep.subr.mxu1 %v14533_v34 }
 0x231   :  { %9014 = vmatmul.mubr.f32.gmra.mxu0 %v11209_v8  ;;  %9111 = vmatmul.mubr.f32.gmra.mxu1 %v14535_v40  ;;  %v14541_v8 = vand.u32 4294901760, %v14540_v43  ;;  %v14548_v40 = vld [vmem:[#allocation34_spill] sm:$0xff] }
 0x232   :  { %9016 = vmatprep.mubr.f32.mxu0 %v11295_v27  ;;  %9113 = vmatprep.mubr.f32.mxu1 %v14537_v29  ;;  %v14543_v27 = vand.u32 4294901760, %v14542_v48  ;;  %v14550_v29 = vld [vmem:[#allocation17_spill] sm:$0xff] }
 0x233   :  { %9173 = vmatpush3.msra.mxu0 %v14532_v2  ;;  %9267 = vmatpush3.msra.mxu1 %v14533_v34  ;;  %v14545_v2 = vld [vmem:[#allocation19_spill] sm:$0xff]  ;;  %v14546_v34 = vld [vmem:[#allocation60_spill] sm:$0xff] }
 0x234   :  { %9174 = vmatprep.subr.mxu0 %v14538_v35  ;;  %9268 = vmatprep.subr.mxu1 %v14539_v54 }
 0x235   :  { %9017 = vmatmul.mubr.f32.gmra.mxu0 %v14523_v20  ;;  %9114 = vmatmul.mubr.f32.gmra.mxu1 %v14541_v8  ;;  %v14547_v20 = vand.u32 4294901760, %v14546_v34  ;;  %v14555_v8 = vld [vmem:[#allocation20_spill] sm:$0xff] }
 0x236   :  { %9019 = vmatprep.mubr.f32.mxu0 %v14525_v61  ;;  %9116 = vmatprep.mubr.f32.mxu1 %v14543_v27  ;;  %v14549_v61 = vand.u32 4294901760, %v14548_v40  ;;  %v14556_v27 = vld [vmem:[#allocation75_spill] sm:$0xff] }
 0x237   :  { %9175 = vmatpush3.msra.mxu0 %v14538_v35  ;;  %9269 = vmatpush3.msra.mxu1 %v14539_v54  ;;  %v14551_v35 = vld [vmem:[#allocation22_spill] sm:$0xff] }
 0x238   :  { %9176 = vmatprep.subr.mxu0 %v14544_v9  ;;  %9270 = vmatprep.subr.mxu1 %v14545_v2  ;;  %v14552_v54 = vld [vmem:[#allocation66_spill] sm:$0xff] }
 0x239   :  { %9020 = vmatmul.mubr.f32.gmra.mxu0 %v14528_v36  ;;  %9117 = vmatmul.mubr.f32.gmra.mxu1 %v14547_v20  ;;  %v14553_v36 = vand.u32 4294901760, %v14552_v54  ;;  %v14563_v20 = vand.u32 4294901760, %v11473_v56 }
 0x23a   :  { %9022 = vmatprep.mubr.f32.mxu0 %v14530_v55  ;;  %9119 = vmatprep.mubr.f32.mxu1 %v14549_v61  ;;  %v14554_v55 = vand.u32 4294901760, %v11524_v52  ;;  %v14566_v61 = vand.u32 4294901760, %v11680_v57 }
 0x23b   :  { %9177 = vmatpush3.msra.mxu0 %v14544_v9  ;;  %9271 = vmatpush3.msra.mxu1 %v14545_v2  ;;  %v14557_v9 = vand.u32 4294901760, %v14556_v27  ;;  %v14560_v2 = vand.u32 4294901760, %v11459_v60 }
 0x23c   :  { %9178 = vmatprep.subr.mxu0 %v14550_v29  ;;  %9272 = vmatprep.subr.mxu1 %v14551_v35 }
 0x23d   :  { %9023 = vmatmul.mubr.f32.gmra.mxu0 %v14534_v14  ;;  %9120 = vmatmul.mubr.f32.gmra.mxu1 %v14553_v36  ;;  %v14558_v14 = vand.u32 4294901760, %v11565_v42  ;;  %v14577_v36 = vand.u32 4294901760, %v11759_v0 }
 0x23e   :  { %9025 = vmatprep.mubr.f32.mxu0 %v14536_v5  ;;  %9122 = vmatprep.mubr.f32.mxu1 %v14554_v55  ;;  %v14559_v5 = vld [vmem:[#allocation23_spill] sm:$0xff] }
 0x23f   :  { %9179 = vmatpush3.msra.mxu0 %v14550_v29  ;;  %9273 = vmatpush3.msra.mxu1 %v14551_v35  ;;  %v14567_v29 = vand.u32 4294901760, %v11547_v3  ;;  %v14569_v35 = vand.u32 4294901760, %v11593_v1 }
 0x240   :  { %9180 = vmatprep.subr.mxu0 %v14555_v8 }
 0x241   :  { %9026 = vmatmul.mubr.f32.gmra.mxu0 %v14540_v43  ;;  %9123 = vmatmul.mubr.f32.gmra.mxu1 %v14557_v9  ;;  %v14561_v43 = vand.u32 4294901760, %v11609_v32 }
 0x242   :  { %9028 = vmatprep.mubr.f32.mxu0 %v14542_v48  ;;  %9125 = vmatprep.mubr.f32.mxu1 %v14558_v14  ;;  %v14562_v48 = vld [vmem:[#allocation25_spill] sm:$0xff] }
 0x243   :  { %9181 = vmatpush3.msra.mxu0 %v14555_v8  ;;  %v14580_v8 = vand.u32 4294901760, %v11883_v15 }
 0x244   :  { %9182 = vmatprep.subr.mxu0 %v14559_v5 }
 0x245   :  { %9029 = vmatmul.mubr.f32.gmra.mxu0 %v14546_v34  ;;  %9126 = vmatmul.mubr.f32.gmra.mxu1 %v14560_v2  ;;  %v14564_v34 = vand.u32 4294901760, %v11642_v62 }
 0x246   :  { %9031 = vmatprep.mubr.f32.mxu0 %v14548_v40  ;;  %9128 = vmatprep.mubr.f32.mxu1 %v14561_v43  ;;  %v14565_v40 = vand.u32 4294901760, %v11544_v4  ;;  %v14584_v43 = vand.u32 4294901760, %v11914_v31 }
 0x247   :  { %9183 = vmatpush3.msra.mxu0 %v14559_v5 }
 0x248   :  { %9184 = vmatprep.subr.mxu0 %v14562_v48 }
 0x249   :  { %9032 = vmatmul.mubr.f32.gmra.mxu0 %v14552_v54  ;;  %9129 = vmatmul.mubr.f32.gmra.mxu1 %v14563_v20 }
 0x24a   :  { %9034 = vmatprep.mubr.f32.mxu0 %v11524_v52  ;;  %9131 = vmatprep.mubr.f32.mxu1 %v14564_v34  ;;  %v14568_v52 = vand.u32 4294901760, %v11714_v37 }
 0x24b   :  { %9185 = vmatpush3.msra.mxu0 %v14562_v48 }
 0x24d   :  { %9035 = vmatmul.mubr.f32.gmra.mxu0 %v14556_v27  ;;  %9132 = vmatmul.mubr.f32.gmra.mxu1 %v14565_v40  ;;  %v14582_v27 = vand.u32 4294901760, %v11904_v25 }
 0x24e   :  { %9037 = vmatprep.mubr.f32.mxu0 %v11565_v42  ;;  %9134 = vmatprep.mubr.f32.mxu1 %v14566_v61  ;;  %v14570_v42 = vand.u32 4294901760, %v11748_v47 }
 0x251   :  { %9038 = vmatmul.mubr.f32.gmra.mxu0 %v11459_v60  ;;  %9135 = vmatmul.mubr.f32.gmra.mxu1 %v14567_v29  ;;  %v14571_v60 = vand.u32 4294901760, %v11623_v28 }
 0x252   :  { %9040 = vmatprep.mubr.f32.mxu0 %v11609_v32  ;;  %9137 = vmatprep.mubr.f32.mxu1 %v14568_v52  ;;  %v14572_v32 = vand.u32 4294901760, %v11779_v63 }
 0x255   :  { %9041 = vmatmul.mubr.f32.gmra.mxu0 %v11473_v56  ;;  %9138 = vmatmul.mubr.f32.gmra.mxu1 %v14569_v35  ;;  %v14573_v56 = vand.u32 4294901760, %v11693_v39  ;;  %v14586_v35 = vld [vmem:[#allocation42_spill] sm:$0xff] }
 0x256   :  { %9043 = vmatprep.mubr.f32.mxu0 %v11642_v62  ;;  %9140 = vmatprep.mubr.f32.mxu1 %v14570_v42  ;;  %v14574_v62 = vand.u32 4294901760, %v11808_v53 }
 0x259   :  { %9044 = vmatmul.mubr.f32.gmra.mxu0 %v11544_v4  ;;  %9141 = vmatmul.mubr.f32.gmra.mxu1 %v14571_v60  ;;  %v14575_v4 = vand.u32 4294901760, %v11727_v19 }
 0x25a   :  { %9046 = vmatprep.mubr.f32.mxu0 %v11680_v57  ;;  %9143 = vmatprep.mubr.f32.mxu1 %v14572_v32  ;;  %v14576_v57 = vand.u32 4294901760, %v11836_v51 }
 0x25d   :  { %9047 = vmatmul.mubr.f32.gmra.mxu0 %v11547_v3  ;;  %9144 = vmatmul.mubr.f32.gmra.mxu1 %v14573_v56 }
 0x25e   :  { %9049 = vmatprep.mubr.f32.mxu0 %v11714_v37  ;;  %9146 = vmatprep.mubr.f32.mxu1 %v14574_v62  ;;  %v14578_v37 = vand.u32 4294901760, %v11862_v16 }
 0x261   :  { %9050 = vmatmul.mubr.f32.gmra.mxu0 %v11593_v1  ;;  %9147 = vmatmul.mubr.f32.gmra.mxu1 %v14575_v4 }
 0x262   :  { %9052 = vmatprep.mubr.f32.mxu0 %v11748_v47  ;;  %9149 = vmatprep.mubr.f32.mxu1 %v14576_v57  ;;  %v8924_v54 = vpop.f32.mrf.mxu1  ;;  %v14579_v47 = vand.u32 4294901760, %v11789_v45  ;;  %v14589_v57 = vld [vmem:[#allocation47_spill] sm:$0xff] }
 0x264   :  { %v3675_v3 = vpop.f32.mrf.mxu1 }
 0x265   :  { %9053 = vmatmul.mubr.f32.gmra.mxu0 %v11623_v28  ;;  %9150 = vmatmul.mubr.f32.gmra.mxu1 %v14577_v36  ;;  %v14581_v28 = vand.u32 4294901760, %v11817_v49 }
 0x266   :  { %9055 = vmatprep.mubr.f32.mxu0 %v11779_v63  ;;  %9152 = vmatprep.mubr.f32.mxu1 %v14578_v37  ;;  %v8927_v1 = vpop.f32.mrf.mxu1  ;;  %v12111_v63 = vld [vmem:[%s13780_s4] ss:$0 sm:$0xff] }
 0x268   :  { %v3687_v55 = vpop.f32.mrf.mxu1 }
 0x269   :  { %9056 = vmatmul.mubr.f32.gmra.mxu0 %v11693_v39  ;;  %9153 = vmatmul.mubr.f32.gmra.mxu1 %v14579_v47 }
 0x26a   :  { %9058 = vmatprep.mubr.f32.mxu0 %v11808_v53  ;;  %9155 = vmatprep.mubr.f32.mxu1 %v14580_v8  ;;  %v14592_v8 = vld [vmem:[#allocation44_spill] sm:$0xff] }
 0x26d   :  { %9059 = vmatmul.mubr.f32.gmra.mxu0 %v11727_v19  ;;  %9156 = vmatmul.mubr.f32.gmra.mxu1 %v14581_v28  ;;  %v8930_v39 = vpop.f32.mrf.mxu1  ;;  %v14583_v19 = vand.u32 4294901760, %v11846_v13 }
 0x26e   :  { %9061 = vmatprep.mubr.f32.mxu0 %v11836_v51  ;;  %9158 = vmatprep.mubr.f32.mxu1 %v14582_v27 }
 0x26f   :  { %v8836_v53 = vpop.f32.mrf.mxu0  ;;  %v3699_v9 = vpop.f32.mrf.mxu1 }
 0x270   :  { %v3105_v14 = vadd.f32 %v8836_v53, %v12111_v63  ;;  %v14593_v53 = vld [vmem:[#allocation36_spill] sm:$0xff] }
 0x271   :  { %9062 = vmatmul.mubr.f32.gmra.mxu0 %v11759_v0  ;;  %9159 = vmatmul.mubr.f32.gmra.mxu1 %v14583_v19  ;;  %v3094_v5 = vpop.f32.mrf.mxu0  ;;  %v8933_v2 = vpop.f32.mrf.mxu1  ;;  %v14585_v0 = vand.u32 4294901760, %v11871_v59  ;;  %v14594_v19 = vld [vmem:[#allocation50_spill] sm:$0xff] }
 0x272   :  { %9064 = vmatprep.mubr.f32.mxu0 %v11862_v16  ;;  %9161 = vmatprep.mubr.f32.mxu1 %v14584_v43  ;;  %v3095_v51 = vadd.f32 %v12111_v63, %v3094_v5  ;;  %v12124_v48 = vadd.f32 %v8924_v54, %v3105_v14 }
 0x273   :  { %v3711_v20 = vpop.f32.mrf.mxu1 }
 0x274   :  { %v12126_v34 = vadd.f32 %v3675_v3, %v3095_v51 }
 0x275   :  { %9065 = vmatmul.mubr.f32.gmra.mxu0 %v11789_v45  ;;  %9162 = vmatmul.mubr.f32.gmra.mxu1 %v14585_v0  ;;  %v14595_v0 = vld [vmem:[#allocation39_spill] sm:$0xff] }
 0x276   :  { %9067 = vmatprep.mubr.f32.mxu0 %v11883_v15  ;;  %9164 = vmatprep.mubr.f32.mxu1 %v3530_v26 }
 0x277   :  { %v8936_v40 = vpop.f32.mrf.mxu1 }
 0x278   :  { %v8839_v16 = vpop.f32.mrf.mxu0 }
 0x279   :  { %v3125_v61 = vadd.f32 %v8839_v16, %v12111_v63  ;;  %9068 = vmatmul.mubr.f32.gmra.mxu0 %v11817_v49  ;;  %9165 = vmatmul.mubr.f32.gmra.mxu1 %v3540_v11  ;;  %v3723_v52 = vpop.f32.mrf.mxu1  ;;  %v14596_v16 = vld [vmem:[#allocation58_spill] sm:$0xff] }
 0x27a   :  { %v3114_v29 = vpop.f32.mrf.mxu0  ;;  %9070 = vmatprep.mubr.f32.mxu0 %v11904_v25  ;;  %9167 = vmatprep.mubr.f32.mxu1 %v3550_v7 }
 0x27b   :  { %v3115_v45 = vadd.f32 %v12111_v63, %v3114_v29  ;;  %v12142_v15 = vadd.f32 %v8927_v1, %v3125_v61 }
 0x27d   :  { %v12144_v26 = vadd.f32 %v3687_v55, %v3115_v45  ;;  %9071 = vmatmul.mubr.f32.gmra.mxu0 %v11846_v13  ;;  %9168 = vmatmul.mubr.f32.gmra.mxu1 %v3560_v21  ;;  %v8842_v49 = vpop.f32.mrf.mxu0  ;;  %v14587_v13 = vld [vmem:[#allocation30_spill] sm:$0xff]  ;;  %v14588_v21 = vld [vmem:[#allocation51_spill] sm:$0xff]  ;;  %v14597_v45 = vld [vmem:[#allocation8_spill] sm:$0xff] }
 0x27e   :  { %v8939_v11 = vpop.f32.mrf.mxu1  ;;  %9073 = vmatprep.mubr.f32.mxu0 %v11914_v31  ;;  %9274 = vmatprep.mubr.f32.mxu1 %v14586_v35  ;;  %v3145_v25 = vadd.f32 %v8842_v49, %v12111_v63  ;;  %v14591_v55 = vld [vmem:[#allocation54_spill] sm:$0xff] }
 0x27f   :  { %v3134_v7 = vpop.f32.mrf.mxu0 }
 0x280   :  { %v3735_v42 = vpop.f32.mrf.mxu1  ;;  %v3135_v60 = vadd.f32 %v12111_v63, %v3134_v7  ;;  %v12153_v32 = vadd.f32 %v8930_v39, %v3145_v25 }
 0x281   :  { %9074 = vmatmul.mubr.f32.gmra.mxu0 %v11871_v59  ;;  %9275 = vmatmul.mubr.f32.vlgmr.msra.gmra.mxu1 %v14587_v13  ;;  %v14590_v59 = vld [vmem:[#allocation32_spill] sm:$0xff] }
 0x282   :  { %9076 = vmatprep.mubr.f32.mxu0 %v11931_v24  ;;  %9277 = vmatprep.mubr.f32.mxu1 %v14588_v21  ;;  %v12159_v56 = vadd.f32 %v3699_v9, %v3135_v60  ;;  %v8942_v62 = vpop.f32.mrf.mxu1  ;;  %v14599_v60 = vld [vmem:[#allocation16_spill] sm:$0xff] }
 0x283   :  { %v8845_v31 = vpop.f32.mrf.mxu0 }
 0x284   :  { %v3165_v4 = vadd.f32 %v8845_v31, %v12111_v63  ;;  %v3747_v3 = vpop.f32.mrf.mxu1  ;;  %v14600_v31 = vld [vmem:[#allocation28_spill] sm:$0xff] }
 0x285   :  { %9077 = vmatmul.mubr.f32.gmra.mxu0 %v11895_v58  ;;  %9278 = vmatmul.mubr.f32.gmra.mxu1 %v14589_v57  ;;  %v3154_v54 = vpop.f32.mrf.mxu0 }
 0x286   :  { %9079 = vmatprep.mubr.f32.mxu0 %v11934_v22  ;;  %9280 = vmatprep.mubr.f32.mxu1 %v14590_v59  ;;  %v3155_v24 = vadd.f32 %v12111_v63, %v3154_v54  ;;  %v12167_v36 = vadd.f32 %v8933_v2, %v3165_v4 }
 0x287   :  { %v8945_v1 = vpop.f32.mrf.mxu1 }
 0x288   :  { %v8848_v37 = vpop.f32.mrf.mxu0  ;;  %v12169_v47 = vadd.f32 %v3711_v20, %v3155_v24 }
 0x289   :  { %9080 = vmatmul.mubr.f32.gmra.mxu0 %v11941_v30  ;;  %9281 = vmatmul.mubr.f32.gmra.mxu1 %v14591_v55  ;;  %v3185_v58 = vadd.f32 %v8848_v37, %v12111_v63  ;;  %v3759_v28 = vpop.f32.mrf.mxu1  ;;  %v14602_v37 = vld [vmem:[#allocation33_spill] sm:$0xff] }
 0x28a   :  { %9186 = vmatprep.mubr.f32.mxu0 %v14586_v35  ;;  %9283 = vmatprep.mubr.f32.mxu1 %v14592_v8  ;;  %v3174_v22 = vpop.f32.mrf.mxu0  ;;  %v14598_v35 = vld [vmem:[#allocation64_spill] sm:$0xff] }
 0x28b   :  { %v3175_v39 = vadd.f32 %v12111_v63, %v3174_v22  ;;  %v12177_v27 = vadd.f32 %v8936_v40, %v3185_v58 }
 0x28c   :  { %v8851_v9 = vpop.f32.mrf.mxu0 }
 0x28d   :  { %9187 = vmatmul.mubr.f32.vlgmr.msra.gmra.mxu0 %v14587_v13  ;;  %9284 = vmatmul.mubr.f32.gmra.mxu1 %v14593_v53  ;;  %v8948_v30 = vpop.f32.mrf.mxu1  ;;  %v12181_v14 = vadd.f32 %v3723_v52, %v3175_v39  ;;  %v3205_v5 = vadd.f32 %v8851_v9, %v12111_v63 }
 0x28e   :  { %9189 = vmatprep.mubr.f32.mxu0 %v14588_v21  ;;  %9286 = vmatprep.mubr.f32.mxu1 %v14594_v19  ;;  %v3194_v2 = vpop.f32.mrf.mxu0 }
 0x28f   :  { %v3771_v43 = vpop.f32.mrf.mxu1  ;;  %v3195_v51 = vadd.f32 %v12111_v63, %v3194_v2  ;;  %v12187_v20 = vadd.f32 %v8939_v11, %v3205_v5 }
 0x291   :  { %9190 = vmatmul.mubr.f32.gmra.mxu0 %v14589_v57  ;;  %9287 = vmatmul.mubr.f32.gmra.mxu1 %v14595_v0  ;;  %v12193_v40 = vadd.f32 %v3735_v42, %v3195_v51  ;;  %v14605_v51 = vld [vmem:[#allocation29_spill] sm:$0xff] }
 0x292   :  { %9192 = vmatprep.mubr.f32.mxu0 %v14590_v59  ;;  %9289 = vmatprep.mubr.f32.mxu1 %v14596_v16  ;;  %v8951_v29 = vpop.f32.mrf.mxu1 }
 0x294   :  { %v3783_v11 = vpop.f32.mrf.mxu1 }
 0x295   :  { %v8854_v61 = vpop.f32.mrf.mxu0  ;;  %9193 = vmatmul.mubr.f32.gmra.mxu0 %v14591_v55  ;;  %9290 = vmatmul.mubr.f32.gmra.mxu1 %v14597_v45 }
 0x296   :  { %v3225_v52 = vadd.f32 %v8854_v61, %v12111_v63  ;;  %9195 = vmatprep.mubr.f32.mxu0 %v14592_v8  ;;  %9292 = vmatprep.mubr.f32.mxu1 %v14598_v35 }
 0x297   :  { %v3214_v49 = vpop.f32.mrf.mxu0  ;;  %v8954_v21 = vpop.f32.mrf.mxu1 }
 0x298   :  { %v3215_v25 = vadd.f32 %v12111_v63, %v3214_v49  ;;  %v12201_v7 = vadd.f32 %v8942_v62, %v3225_v52  ;;  %v14607_v49 = vld [vmem:[#allocation40_spill] sm:$0xff] }
 0x299   :  { %9196 = vmatmul.mubr.f32.gmra.mxu0 %v14593_v53  ;;  %9293 = vmatmul.mubr.f32.gmra.mxu1 %v14599_v60  ;;  %v8857_v13 = vpop.f32.mrf.mxu0  ;;  %v3795_v54 = vpop.f32.mrf.mxu1 }
 0x29a   :  { %v12203_v42 = vadd.f32 %v3747_v3, %v3215_v25  ;;  %9198 = vmatprep.mubr.f32.mxu0 %v14594_v19  ;;  %9295 = vmatprep.mubr.f32.mxu1 %v14600_v31  ;;  %v3245_v4 = vadd.f32 %v8857_v13, %v12111_v63  ;;  %v14601_v3 = vld [vmem:[#allocation27_spill] sm:$0xff]  ;;  %v14604_v19 = vld [vmem:[#allocation38_spill] sm:$0xff] }
 0x29b   :  { %v3234_v57 = vpop.f32.mrf.mxu0  ;;  %v14608_v25 = vld [vmem:[#allocation46_spill] sm:$0xff] }
 0x29c   :  { %v3235_v59 = vadd.f32 %v12111_v63, %v3234_v57  ;;  %v12211_v62 = vadd.f32 %v8945_v1, %v3245_v4  ;;  %v14603_v1 = vld [vmem:[#allocation68_spill] sm:$0xff] }
 0x29d   :  { %9199 = vmatmul.mubr.f32.gmra.mxu0 %v14595_v0  ;;  %9296 = vmatmul.mubr.f32.gmra.mxu1 %v14601_v3  ;;  %v8957_v24 = vpop.f32.mrf.mxu1 }
 0x29e   :  { %9201 = vmatprep.mubr.f32.mxu0 %v14596_v16  ;;  %9298 = vmatprep.mubr.f32.mxu1 %v14602_v37  ;;  %v12217_v58 = vadd.f32 %v3759_v28, %v3235_v59  ;;  %v14606_v16 = vld [vmem:[#allocation41_spill] sm:$0xff] }
 0x29f   :  { %v3807_v39 = vpop.f32.mrf.mxu1 }
 0x2a0   :  { %v8860_v55 = vpop.f32.mrf.mxu0 }
 0x2a1   :  { %v3265_v8 = vadd.f32 %v8860_v55, %v12111_v63  ;;  %9202 = vmatmul.mubr.f32.gmra.mxu0 %v14597_v45  ;;  %9299 = vmatmul.mubr.f32.gmra.mxu1 %v14603_v1 }
 0x2a2   :  { %v3254_v22 = vpop.f32.mrf.mxu0  ;;  %9204 = vmatprep.mubr.f32.mxu0 %v14598_v35  ;;  %9301 = vmatprep.mubr.f32.mxu1 %v14604_v19  ;;  %v8960_v2 = vpop.f32.mrf.mxu1 }
 0x2a3   :  { %v3255_v53 = vadd.f32 %v12111_v63, %v3254_v22  ;;  %v12223_v9 = vadd.f32 %v8948_v30, %v3265_v8 }
 0x2a4   :  { %v8863_v28 = vpop.f32.mrf.mxu0  ;;  %v3819_v61 = vpop.f32.mrf.mxu1 }
 0x2a5   :  { %v12227_v5 = vadd.f32 %v3771_v43, %v3255_v53  ;;  %9205 = vmatmul.mubr.f32.gmra.mxu0 %v14599_v60  ;;  %9302 = vmatmul.mubr.f32.gmra.mxu1 %v14605_v51  ;;  %v3285_v0 = vadd.f32 %v8863_v28, %v12111_v63 }
 0x2a6   :  { %9207 = vmatprep.mubr.f32.mxu0 %v14600_v31  ;;  %9304 = vmatprep.mubr.f32.mxu1 %v14606_v16  ;;  %v3274_v30 = vpop.f32.mrf.mxu0 }
 0x2a7   :  { %v3275_v52 = vadd.f32 %v12111_v63, %v3274_v30  ;;  %v12235_v45 = vadd.f32 %v8951_v29, %v3285_v0  ;;  %v14609_v29 = vld [vmem:[#allocation43_spill] sm:$0xff] }
 0x2a8   :  { %v8963_v43 = vpop.f32.mrf.mxu1 }
 0x2a9   :  { %9208 = vmatmul.mubr.f32.gmra.mxu0 %v14601_v3  ;;  %9305 = vmatmul.mubr.f32.gmra.mxu1 %v14607_v49  ;;  %v12239_v35 = vadd.f32 %v3783_v11, %v3275_v52  ;;  %v14610_v11 = vld [vmem:[#allocation49_spill] sm:$0xff] }
 0x2aa   :  { %9210 = vmatprep.mubr.f32.mxu0 %v14602_v37  ;;  %9307 = vmatprep.mubr.f32.mxu1 %v14608_v25  ;;  %v8866_v60 = vpop.f32.mrf.mxu0  ;;  %v3831_v31 = vpop.f32.mrf.mxu1 }
 0x2ab   :  { %v3305_v13 = vadd.f32 %v8866_v60, %v12111_v63 }
 0x2ac   :  { %v3294_v4 = vpop.f32.mrf.mxu0 }
 0x2ad   :  { %9211 = vmatmul.mubr.f32.gmra.mxu0 %v14603_v1  ;;  %9308 = vmatmul.mubr.f32.gmra.mxu1 %v14609_v29  ;;  %v3295_v57 = vadd.f32 %v12111_v63, %v3294_v4  ;;  %v12247_v59 = vadd.f32 %v8954_v21, %v3305_v13  ;;  %v14611_v1 = vld [vmem:[#allocation35_spill] sm:$0xff] }
 0x2ae   :  { %9213 = vmatprep.mubr.f32.mxu0 %v14604_v19  ;;  %9310 = vmatprep.mubr.f32.mxu1 %v14610_v11  ;;  %v8869_v3 = vpop.f32.mrf.mxu0  ;;  %v14612_v19 = vld [vmem:[#allocation14_spill] sm:$0xff] }
 0x2af   :  { %v3325_v37 = vadd.f32 %v8869_v3, %v12111_v63  ;;  %v8966_v55 = vpop.f32.mrf.mxu1  ;;  %v12252_v8 = vadd.f32 %v3795_v54, %v3295_v57  ;;  %v14613_v54 = vld [vmem:[#allocation53_spill] sm:$0xff] }
 0x2b0   :  { %v3314_v22 = vpop.f32.mrf.mxu0  ;;  %v14615_v57 = vld [vmem:[#allocation21_spill] sm:$0xff] }
 0x2b1   :  { %9214 = vmatmul.mubr.f32.gmra.mxu0 %v14605_v51  ;;  %9311 = vmatmul.mubr.f32.gmra.mxu1 %v14611_v1  ;;  %v3315_v53 = vadd.f32 %v12111_v63, %v3314_v22  ;;  %v3843_v28 = vpop.f32.mrf.mxu1  ;;  %v12257_v21 = vadd.f32 %v8957_v24, %v3325_v37 }
 0x2b2   :  { %9216 = vmatprep.mubr.f32.mxu0 %v14606_v16  ;;  %9313 = vmatprep.mubr.f32.mxu1 %v14612_v19 }
 0x2b3   :  { %v8969_v0 = vpop.f32.mrf.mxu1  ;;  %v12261_v30 = vadd.f32 %v3807_v39, %v3315_v53  ;;  %v14614_v39 = vld [vmem:[#allocation10_spill] sm:$0xff] }
 0x2b4   :  { %v8872_v52 = vpop.f32.mrf.mxu0 }
 0x2b5   :  { %9217 = vmatmul.mubr.f32.gmra.mxu0 %v14607_v49  ;;  %9314 = vmatmul.mubr.f32.gmra.mxu1 %v14613_v54  ;;  %v3345_v51 = vadd.f32 %v8872_v52, %v12111_v63  ;;  %v3855_v60 = vpop.f32.mrf.mxu1 }
 0x2b6   :  { %9219 = vmatprep.mubr.f32.mxu0 %v14608_v25  ;;  %9316 = vmatprep.mubr.f32.mxu1 %v11683_v46  ;;  %v3334_v24 = vpop.f32.mrf.mxu0 }
 0x2b7   :  { %v3335_v16 = vadd.f32 %v12111_v63, %v3334_v24  ;;  %v12269_v13 = vadd.f32 %v8960_v2, %v3345_v51  ;;  %v14617_v24 = vld [vmem:[#allocation55_spill] sm:$0xff] }
 0x2b9   :  { %9220 = vmatmul.mubr.f32.gmra.mxu0 %v14609_v29  ;;  %9317 = vmatmul.mubr.f32.gmra.mxu1 %v14614_v39  ;;  %v8875_v4 = vpop.f32.mrf.mxu0  ;;  %v12273_v49 = vadd.f32 %v3819_v61, %v3335_v16  ;;  %v14616_v29 = vld [vmem:[#allocation18_spill] sm:$0xff] }
 0x2ba   :  { %9222 = vmatprep.mubr.f32.mxu0 %v14610_v11  ;;  %9319 = vmatprep.mubr.f32.mxu1 %v14615_v57  ;;  %v3365_v25 = vadd.f32 %v8875_v4, %v12111_v63  ;;  %v8972_v3 = vpop.f32.mrf.mxu1 }
 0x2bb   :  { %v3354_v37 = vpop.f32.mrf.mxu0 }
 0x2bc   :  { %v3355_v22 = vadd.f32 %v12111_v63, %v3354_v37  ;;  %v12279_v53 = vpop.f32.mrf.mxu1  ;;  %v12281_v2 = vadd.f32 %v8963_v43, %v3365_v25  ;;  %v14618_v25 = vld [vmem:[#allocation24_spill] sm:$0xff] }
 0x2bd   :  { %9223 = vmatmul.mubr.f32.gmra.mxu0 %v14611_v1  ;;  %9320 = vmatmul.mubr.f32.gmra.mxu1 %v14616_v29 }
 0x2be   :  { %9225 = vmatprep.mubr.f32.mxu0 %v14612_v19  ;;  %9322 = vmatprep.mubr.f32.mxu1 %v11751_v17  ;;  %v8975_v61 = vpop.f32.mrf.mxu1  ;;  %v12287_v11 = vadd.f32 %v3831_v31, %v3355_v22 }
 0x2bf   :  { %v8878_v52 = vpop.f32.mrf.mxu0 }
 0x2c0   :  { %v3385_v51 = vadd.f32 %v8878_v52, %v12111_v63  ;;  %v12292_v16 = vpop.f32.mrf.mxu1 }
 0x2c1   :  { %9226 = vmatmul.mubr.f32.gmra.mxu0 %v14613_v54  ;;  %9323 = vmatmul.mubr.f32.gmra.mxu1 %v14617_v24  ;;  %v3374_v43 = vpop.f32.mrf.mxu0 }
 0x2c2   :  { %9228 = vmatprep.mubr.f32.mxu0 %v11683_v46  ;;  %9325 = vmatprep.mubr.f32.mxu1 %v11782_v41  ;;  %v3375_v1 = vadd.f32 %v12111_v63, %v3374_v43  ;;  %v12297_v19 = vadd.f32 %v8966_v55, %v3385_v51 }
 0x2c4   :  { %v8881_v31 = vpop.f32.mrf.mxu0  ;;  %v12299_v4 = vadd.f32 %v3843_v28, %v3375_v1  ;;  %v14620_v28 = vld [vmem:[#allocation57_spill] sm:$0xff] }
 0x2c5   :  { %9229 = vmatmul.mubr.f32.gmra.mxu0 %v14614_v39  ;;  %v3405_v54 = vadd.f32 %v8881_v31, %v12111_v63  ;;  %9326 = vmatmul.mubr.f32.gmra.mxu1 %v14618_v25  ;;  %v8978_v37 = vpop.f32.mrf.mxu1 }
 0x2c6   :  { %9231 = vmatprep.mubr.f32.mxu0 %v14615_v57  ;;  %9328 = vmatprep.mubr.f32.mxu1 %v11811_v38  ;;  %v3394_v46 = vpop.f32.mrf.mxu0 }
 0x2c7   :  { %v3395_v22 = vadd.f32 %v12111_v63, %v3394_v46  ;;  %v12307_v52 = vpop.f32.mrf.mxu1  ;;  %v12309_v55 = vadd.f32 %v8969_v0, %v3405_v54 }
 0x2c8   :  { %14619 = vst [vmem:[#allocation61_spill] sm:$0xff] %v12307_v52 }
 0x2c9   :  { %9232 = vmatmul.mubr.f32.gmra.mxu0 %v14616_v29  ;;  %9329 = vmatmul.mubr.f32.gmra.mxu1 %v14620_v28  ;;  %v8981_v39 = vpop.f32.mrf.mxu1  ;;  %v12313_v51 = vadd.f32 %v3855_v60, %v3395_v22  ;;  %v14623_v22 = vld [vmem:[#allocation59_spill] sm:$0xff] }
 0x2ca   :  { %9234 = vmatprep.mubr.f32.mxu0 %v11751_v17  ;;  %v8884_v43 = vpop.f32.mrf.mxu0  ;;  %9331 = vmatprep.mubr.f32.mxu1 %v11839_v23 }
 0x2cb   :  { %v3425_v57 = vadd.f32 %v8884_v43, %v12111_v63  ;;  %v12320_v31 = vpop.f32.mrf.mxu1 }
 0x2cc   :  { %v12318_v1 = vpop.f32.mrf.mxu0  ;;  %14621 = vst [vmem:[#allocation63_spill] sm:$0xff] %v12320_v31 }
 0x2cd   :  { %9235 = vmatmul.mubr.f32.gmra.mxu0 %v14617_v24  ;;  %9332 = vmatmul.mubr.f32.gmra.mxu1 %v11794_v10  ;;  %v12324_v0 = vadd.f32 %v8972_v3, %v3425_v57 }
 0x2ce   :  { %9237 = vmatprep.mubr.f32.mxu0 %v11782_v41  ;;  %9334 = vmatprep.mubr.f32.mxu1 %v11865_v6 }
 0x2cf   :  { %v8887_v17 = vpop.f32.mrf.mxu0 }
 0x2d0   :  { %v3445_v60 = vadd.f32 %v8887_v17, %v12111_v63  ;;  %v8984_v29 = vpop.f32.mrf.mxu1 }
 0x2d1   :  { %9238 = vmatmul.mubr.f32.gmra.mxu0 %v14618_v25  ;;  %v12330_v54 = vpop.f32.mrf.mxu0  ;;  %9335 = vmatmul.mubr.f32.gmra.mxu1 %v11819_v50 }
 0x2d2   :  { %9240 = vmatprep.mubr.f32.mxu0 %v11811_v38  ;;  %9337 = vmatprep.mubr.f32.mxu1 %v11890_v44  ;;  %v12335_v3 = vpop.f32.mrf.mxu1  ;;  %v12337_v24 = vadd.f32 %v8975_v61, %v3445_v60 }
 0x2d3   :  { %14622 = vst [vmem:[#allocation65_spill] sm:$0xff] %v12335_v3 }
 0x2d5   :  { %v8890_v41 = vpop.f32.mrf.mxu0  ;;  %9241 = vmatmul.mubr.f32.gmra.mxu0 %v14620_v28  ;;  %v8987_v46 = vpop.f32.mrf.mxu1  ;;  %9338 = vmatmul.mubr.f32.gmra.mxu1 %v11850_v18  ;;  %v14626_v28 = vld [vmem:[#allocation37_spill] sm:$0xff] }
 0x2d6   :  { %v3465_v25 = vadd.f32 %v8890_v41, %v12111_v63  ;;  %9243 = vmatprep.mubr.f32.mxu0 %v11839_v23  ;;  %9340 = vmatprep.mubr.f32.mxu1 %v14623_v22 }
 0x2d7   :  { %v12344_v43 = vpop.f32.mrf.mxu0  ;;  %v12346_v38 = vpop.f32.mrf.mxu1 }
 0x2d8   :  { %14624 = vst [vmem:[#allocation67_spill] sm:$0xff] %v12346_v38  ;;  %v12348_v57 = vadd.f32 %v8978_v37, %v3465_v25 }
 0x2d9   :  { %v8893_v61 = vpop.f32.mrf.mxu0  ;;  %9244 = vmatmul.mubr.f32.gmra.mxu0 %v11794_v10  ;;  %v8990_v17 = vpop.f32.mrf.mxu1  ;;  %9341 = vmatmul.mubr.f32.gmra.mxu1 %v14626_v28 }
 0x2da   :  { %14625 = vst [vmem:[#allocation69_spill] sm:$0xff] %v12348_v57  ;;  %v3485_v60 = vadd.f32 %v8893_v61, %v12111_v63  ;;  %9246 = vmatprep.mubr.f32.mxu0 %v11865_v6  ;;  %9343 = vmatprep.mubr.f32.mxu1 %v11919_v12 }
 0x2db   :  { %v12355_v23 = vpop.f32.mrf.mxu0  ;;  %v3939_v41 = vpop.f32.mrf.mxu1 }
 0x2dc   :  { %14627 = vst [vmem:[#allocation71_spill] sm:$0xff] %v12355_v23  ;;  %v12357_v3 = vadd.f32 %v8981_v39, %v3485_v60 }
 0x2dd   :  { %v8896_v38 = vpop.f32.mrf.mxu0  ;;  %9247 = vmatmul.mubr.f32.gmra.mxu0 %v11819_v50  ;;  %v8993_v37 = vpop.f32.mrf.mxu1  ;;  %9344 = vmatmul.mubr.f32.gmra.mxu1 %v11916_v33 }
 0x2de   :  { %14628 = vst [vmem:[#allocation72_spill] sm:$0xff] %v12357_v3  ;;  %v3505_v10 = vadd.f32 %v8896_v38, %v12111_v63  ;;  %9249 = vmatprep.mubr.f32.mxu0 %v11890_v44 }
 0x2df   :  { %v12363_v25 = vpop.f32.mrf.mxu0  ;;  %v3951_v6 = vpop.f32.mrf.mxu1 }
 0x2e0   :  { %14629 = vst [vmem:[#allocation73_spill] sm:$0xff] %v12363_v25  ;;  %v12365_v61 = vadd.f32 %v8984_v29, %v3505_v10 }
 0x2e1   :  { %v8899_v31 = vpop.f32.mrf.mxu0  ;;  %9250 = vmatmul.mubr.f32.gmra.mxu0 %v11850_v18  ;;  %v9100_v39 = vpop.f32.mrf.mxu1 }
 0x2e2   :  { %14630 = vst [vmem:[#allocation74_spill] sm:$0xff] %v12365_v61  ;;  %v3525_v60 = vadd.f32 %v8899_v31, %v12111_v63  ;;  %9252 = vmatprep.mubr.f32.mxu0 %v14623_v22 }
 0x2e3   :  { %v12370_v50 = vpop.f32.mrf.mxu0  ;;  %v4455_v3 = vpop.f32.mrf.mxu1 }
 0x2e4   :  { %14631 = vst [vmem:[#allocation52_spill] sm:$0xff] %v12370_v50  ;;  %v12372_v52 = vadd.f32 %v8987_v46, %v3525_v60 }
 0x2e5   :  { %v8902_v38 = vpop.f32.mrf.mxu0  ;;  %9253 = vmatmul.mubr.f32.gmra.mxu0 %v14626_v28  ;;  %v9103_v44 = vpop.f32.mrf.mxu1 }
 0x2e6   :  { %14632 = vst [vmem:[#allocation26_spill] sm:$0xff] %v12372_v52  ;;  %v3545_v29 = vadd.f32 %v8902_v38, %v12111_v63  ;;  %9255 = vmatprep.mubr.f32.mxu0 %v11919_v12 }
 0x2e7   :  { %v3534_v10 = vpop.f32.mrf.mxu0  ;;  %v4471_v18 = vpop.f32.mrf.mxu1 }
 0x2e8   :  { %v3535_v61 = vadd.f32 %v12111_v63, %v3534_v10  ;;  %v12378_v31 = vadd.f32 %v8990_v17, %v3545_v29 }
 0x2e9   :  { %v8905_v22 = vpop.f32.mrf.mxu0  ;;  %9256 = vmatmul.mubr.f32.gmra.mxu0 %v11916_v33  ;;  %v9106_v50 = vpop.f32.mrf.mxu1 }
 0x2ea   :  { %14633 = vst [vmem:[#allocation56_spill] sm:$0xff] %v12378_v31  ;;  %v3565_v46 = vadd.f32 %v8905_v22, %v12111_v63  ;;  %v12382_v60 = vadd.f32 %v3939_v41, %v3535_v61 }
 0x2eb   :  { %v3554_v28 = vpop.f32.mrf.mxu0  ;;  %v4487_v52 = vpop.f32.mrf.mxu1 }
 0x2ec   :  { %14634 = vst [vmem:[#allocation9_spill] sm:$0xff] %v12382_v60  ;;  %v3555_v38 = vadd.f32 %v12111_v63, %v3554_v28  ;;  %v12385_v25 = vadd.f32 %v8993_v37, %v3565_v46 }
 0x2ed   :  { %v9012_v12 = vpop.f32.mrf.mxu0  ;;  %v9109_v57 = vpop.f32.mrf.mxu1 }
 0x2ee   :  { %14635 = vst [vmem:[#allocation48_spill] sm:$0xff] %v12385_v25  ;;  %v4053_v10 = vadd.f32 %v9012_v12, %v12124_v48  ;;  %v12388_v17 = vadd.f32 %v3951_v6, %v3555_v38 }
 0x2ef   :  { %v4045_v29 = vpop.f32.mrf.mxu0  ;;  %v4503_v31 = vpop.f32.mrf.mxu1 }
 0x2f0   :  { %v4046_v33 = vadd.f32 %v4045_v29, %v12126_v34  ;;  %v12391_v23 = vadd.f32 %v9100_v39, %v4053_v10 }
 0x2f1   :  { %v9015_v41 = vpop.f32.mrf.mxu0  ;;  %v9112_v61 = vpop.f32.mrf.mxu1 }
 0x2f2   :  { %v4067_v22 = vadd.f32 %v9015_v41, %v12142_v15  ;;  %v12394_v60 = vadd.f32 %v4455_v3, %v4046_v33 }
 0x2f3   :  { %v4059_v37 = vpop.f32.mrf.mxu0  ;;  %v4519_v46 = vpop.f32.mrf.mxu1 }
 0x2f4   :  { %v4060_v28 = vadd.f32 %v4059_v37, %v12144_v26  ;;  %v12397_v25 = vadd.f32 %v9103_v44, %v4067_v22 }
 0x2f5   :  { %v9018_v48 = vpop.f32.mrf.mxu0  ;;  %v9115_v6 = vpop.f32.mrf.mxu1 }
 0x2f6   :  { %v4081_v38 = vadd.f32 %v9018_v48, %v12153_v32  ;;  %v12400_v12 = vadd.f32 %v4471_v18, %v4060_v28 }
 0x2f7   :  { %v4073_v34 = vpop.f32.mrf.mxu0  ;;  %v4535_v39 = vpop.f32.mrf.mxu1 }
 0x2f8   :  { %v4074_v10 = vadd.f32 %v4073_v34, %v12159_v56  ;;  %v12403_v29 = vadd.f32 %v9106_v50, %v4081_v38 }
 0x2f9   :  { %v9021_v15 = vpop.f32.mrf.mxu0  ;;  %v9118_v3 = vpop.f32.mrf.mxu1 }
 0x2fa   :  { %v4095_v33 = vadd.f32 %v9021_v15, %v12167_v36  ;;  %v12406_v41 = vadd.f32 %v4487_v52, %v4074_v10 }
 0x2fb   :  { %v4087_v26 = vpop.f32.mrf.mxu0  ;;  %v4551_v44 = vpop.f32.mrf.mxu1 }
 0x2fc   :  { %v4088_v22 = vadd.f32 %v4087_v26, %v12169_v47  ;;  %v12409_v37 = vadd.f32 %v9109_v57, %v4095_v33 }
 0x2fd   :  { %v9024_v32 = vpop.f32.mrf.mxu0  ;;  %v9121_v18 = vpop.f32.mrf.mxu1 }
 0x2fe   :  { %v4109_v28 = vadd.f32 %v9024_v32, %v12177_v27  ;;  %v12412_v48 = vadd.f32 %v4503_v31, %v4088_v22 }
 0x2ff   :  { %v4101_v56 = vpop.f32.mrf.mxu0  ;;  %v4567_v50 = vpop.f32.mrf.mxu1 }
 0x300   :  { %v4102_v38 = vadd.f32 %v4101_v56, %v12181_v14  ;;  %v12415_v34 = vadd.f32 %v9112_v61, %v4109_v28 }
 0x301   :  { %v9027_v36 = vpop.f32.mrf.mxu0  ;;  %v9124_v52 = vpop.f32.mrf.mxu1 }
 0x302   :  { %v4123_v10 = vadd.f32 %v9027_v36, %v12187_v20  ;;  %v12418_v15 = vadd.f32 %v4519_v46, %v4102_v38 }
 0x303   :  { %v4115_v47 = vpop.f32.mrf.mxu0  ;;  %v4583_v57 = vpop.f32.mrf.mxu1 }
 0x304   :  { %v4116_v33 = vadd.f32 %v4115_v47, %v12193_v40  ;;  %v12421_v26 = vadd.f32 %v9115_v6, %v4123_v10 }
 0x305   :  { %v9030_v27 = vpop.f32.mrf.mxu0  ;;  %v9127_v31 = vpop.f32.mrf.mxu1 }
 0x306   :  { %v4137_v22 = vadd.f32 %v9030_v27, %v12201_v7  ;;  %v12424_v32 = vadd.f32 %v4535_v39, %v4116_v33 }
 0x307   :  { %v4129_v14 = vpop.f32.mrf.mxu0  ;;  %v4599_v61 = vpop.f32.mrf.mxu1 }
 0x308   :  { %v4130_v28 = vadd.f32 %v4129_v14, %v12203_v42  ;;  %v12427_v56 = vadd.f32 %v9118_v3, %v4137_v22 }
 0x309   :  { %v9033_v20 = vpop.f32.mrf.mxu0  ;;  %v9130_v46 = vpop.f32.mrf.mxu1 }
 0x30a   :  { %v4151_v38 = vadd.f32 %v9033_v20, %v12211_v62  ;;  %v12430_v36 = vadd.f32 %v4551_v44, %v4130_v28 }
 0x30b   :  { %v4143_v40 = vpop.f32.mrf.mxu0  ;;  %v4615_v6 = vpop.f32.mrf.mxu1 }
 0x30c   :  { %v4144_v10 = vadd.f32 %v4143_v40, %v12217_v58  ;;  %v12433_v47 = vadd.f32 %v9121_v18, %v4151_v38 }
 0x30d   :  { %v9036_v7 = vpop.f32.mrf.mxu0  ;;  %v9133_v39 = vpop.f32.mrf.mxu1 }
 0x30e   :  { %v4165_v33 = vadd.f32 %v9036_v7, %v12223_v9  ;;  %v12436_v27 = vadd.f32 %v4567_v50, %v4144_v10 }
 0x30f   :  { %v4157_v42 = vpop.f32.mrf.mxu0  ;;  %v4631_v3 = vpop.f32.mrf.mxu1 }
 0x310   :  { %v4158_v22 = vadd.f32 %v4157_v42, %v12227_v5  ;;  %v12439_v14 = vadd.f32 %v9124_v52, %v4165_v33 }
 0x311   :  { %v9039_v62 = vpop.f32.mrf.mxu0  ;;  %v9136_v44 = vpop.f32.mrf.mxu1 }
 0x312   :  { %v4179_v28 = vadd.f32 %v9039_v62, %v12235_v45  ;;  %v12442_v20 = vadd.f32 %v4583_v57, %v4158_v22 }
 0x313   :  { %v4171_v58 = vpop.f32.mrf.mxu0  ;;  %v4647_v18 = vpop.f32.mrf.mxu1 }
 0x314   :  { %v4172_v38 = vadd.f32 %v4171_v58, %v12239_v35  ;;  %v12445_v40 = vadd.f32 %v9127_v31, %v4179_v28 }
 0x315   :  { %v9042_v9 = vpop.f32.mrf.mxu0  ;;  %v9139_v50 = vpop.f32.mrf.mxu1 }
 0x316   :  { %v4193_v10 = vadd.f32 %v9042_v9, %v12247_v59  ;;  %v12448_v7 = vadd.f32 %v4599_v61, %v4172_v38 }
 0x317   :  { %v4185_v5 = vpop.f32.mrf.mxu0  ;;  %v4663_v52 = vpop.f32.mrf.mxu1 }
 0x318   :  { %v4186_v33 = vadd.f32 %v4185_v5, %v12252_v8  ;;  %v12451_v42 = vadd.f32 %v9130_v46, %v4193_v10 }
 0x319   :  { %v9045_v45 = vpop.f32.mrf.mxu0  ;;  %v9142_v57 = vpop.f32.mrf.mxu1 }
 0x31a   :  { %14636 = vst [vmem:[#allocation62_spill] sm:$0xff] %v12451_v42  ;;  %v4207_v22 = vadd.f32 %v9045_v45, %v12257_v21  ;;  %v12454_v62 = vadd.f32 %v4615_v6, %v4186_v33  ;;  %v14646_v42 = vld [vmem:[#allocation63_spill] sm:$0xff] }
 0x31b   :  { %v4199_v35 = vpop.f32.mrf.mxu0  ;;  %v4679_v31 = vpop.f32.mrf.mxu1 }
 0x31c   :  { %14637 = vst [vmem:[#allocation45_spill] sm:$0xff] %v12454_v62  ;;  %v4200_v28 = vadd.f32 %v4199_v35, %v12261_v30  ;;  %v12457_v58 = vadd.f32 %v9133_v39, %v4207_v22 }
 0x31d   :  { %v9048_v59 = vpop.f32.mrf.mxu0  ;;  %v9145_v61 = vpop.f32.mrf.mxu1 }
 0x31e   :  { %v4221_v38 = vadd.f32 %v9048_v59, %v12269_v13  ;;  %v12460_v9 = vadd.f32 %v4631_v3, %v4200_v28 }
 0x31f   :  { %v4213_v8 = vpop.f32.mrf.mxu0  ;;  %v4695_v46 = vpop.f32.mrf.mxu1 }
 0x320   :  { %14638 = vst [vmem:[#allocation11_spill] sm:$0xff] %v12460_v9  ;;  %v4214_v10 = vadd.f32 %v4213_v8, %v12273_v49  ;;  %v12463_v5 = vadd.f32 %v9136_v44, %v4221_v38 }
 0x321   :  { %v9051_v21 = vpop.f32.mrf.mxu0  ;;  %v9148_v6 = vpop.f32.mrf.mxu1 }
 0x322   :  { %v4235_v33 = vadd.f32 %v9051_v21, %v12281_v2  ;;  %v12466_v45 = vadd.f32 %v4647_v18, %v4214_v10  ;;  %v3415_v10 = vadd.f32 %v12111_v63, %v12318_v1 }
 0x323   :  { %v4227_v30 = vpop.f32.mrf.mxu0  ;;  %v4711_v39 = vpop.f32.mrf.mxu1 }
 0x324   :  { %14639 = vst [vmem:[#allocation7_spill] sm:$0xff] %v12466_v45  ;;  %v4228_v22 = vadd.f32 %v4227_v30, %v12287_v11  ;;  %v12469_v35 = vadd.f32 %v9139_v50, %v4235_v33 }
 0x325   :  { %v9054_v13 = vpop.f32.mrf.mxu0  ;;  %v9151_v3 = vpop.f32.mrf.mxu1 }
 0x326   :  { %v4249_v28 = vadd.f32 %v9054_v13, %v12297_v19  ;;  %v12472_v59 = vadd.f32 %v4663_v52, %v4228_v22  ;;  %v3868_v13 = vadd.f32 %v12279_v53, %v3415_v10 }
 0x327   :  { %v4241_v49 = vpop.f32.mrf.mxu0  ;;  %v4727_v44 = vpop.f32.mrf.mxu1 }
 0x328   :  { %v4242_v38 = vadd.f32 %v4241_v49, %v12299_v4  ;;  %v12475_v8 = vadd.f32 %v9142_v57, %v4249_v28  ;;  %v3435_v4 = vadd.f32 %v12111_v63, %v12330_v54 }
 0x329   :  { %v9057_v2 = vpop.f32.mrf.mxu0  ;;  %v9154_v18 = vpop.f32.mrf.mxu1 }
 0x32a   :  { %v4263_v11 = vadd.f32 %v9057_v2, %v12309_v55  ;;  %v12480_v50 = vadd.f32 %v4679_v31, %v4242_v38  ;;  %v3880_v54 = vadd.f32 %v12292_v16, %v3435_v4 }
 0x32b   :  { %v4255_v21 = vpop.f32.mrf.mxu0  ;;  %v4743_v33 = vpop.f32.mrf.mxu1 }
 0x32c   :  { %v4256_v19 = vadd.f32 %v4255_v21, %v12313_v51  ;;  %v12483_v52 = vadd.f32 %v9145_v61, %v4263_v11  ;;  %v3455_v61 = vadd.f32 %v12111_v63, %v12344_v43 }
 0x32d   :  { %v9060_v30 = vpop.f32.mrf.mxu0  ;;  %v9157_v22 = vpop.f32.mrf.mxu1 }
 0x32e   :  { %v4277_v57 = vadd.f32 %v9060_v30, %v12324_v0  ;;  %v12489_v1 = vadd.f32 %v4695_v46, %v4256_v19 }
 0x32f   :  { %v4269_v55 = vpop.f32.mrf.mxu0  ;;  %v4759_v31 = vpop.f32.mrf.mxu1 }
 0x330   :  { %v4270_v28 = vadd.f32 %v4269_v55, %v3868_v13  ;;  %v12491_v49 = vadd.f32 %v9148_v6, %v4277_v57  ;;  %v14640_v6 = vld [vmem:[#allocation71_spill] sm:$0xff]  ;;  %v14641_v57 = vld [vmem:[#allocation69_spill] sm:$0xff] }
 0x331   :  { %v9063_v38 = vpop.f32.mrf.mxu0  ;;  %v9160_v51 = vpop.f32.mrf.mxu1  ;;  %v3475_v30 = vadd.f32 %v12111_v63, %v14640_v6  ;;  %v14642_v55 = vld [vmem:[#allocation61_spill] sm:$0xff] }
 0x332   :  { %v4291_v2 = vadd.f32 %v9063_v38, %v12337_v24  ;;  %v12497_v11 = vadd.f32 %v4711_v39, %v4270_v28  ;;  %v3892_v43 = vadd.f32 %v14642_v55, %v3455_v61 }
 0x333   :  { %v4283_v0 = vpop.f32.mrf.mxu0  ;;  %v4775_v53 = vpop.f32.mrf.mxu1  ;;  %v3904_v6 = vadd.f32 %v14646_v42, %v3475_v30 }
 0x334   :  { %v4284_v46 = vadd.f32 %v4283_v0, %v3880_v54  ;;  %v12499_v10 = vadd.f32 %v9151_v3, %v4291_v2  ;;  %v14644_v3 = vld [vmem:[#allocation73_spill] sm:$0xff]  ;;  %v14645_v54 = vld [vmem:[#allocation72_spill] sm:$0xff] }
 0x335   :  { %v9066_v21 = vpop.f32.mrf.mxu0  ;;  %v9163_v19 = vpop.f32.mrf.mxu1  ;;  %v3495_v2 = vadd.f32 %v12111_v63, %v14644_v3 }
 0x336   :  { %v4305_v13 = vadd.f32 %v9066_v21, %v14641_v57  ;;  %v12505_v62 = vadd.f32 %v4727_v44, %v4284_v46 }
 0x337   :  { %v4297_v24 = vpop.f32.mrf.mxu0  ;;  %v4791_v16 = vpop.f32.mrf.mxu1 }
 0x338   :  { %v4298_v39 = vadd.f32 %v4297_v24, %v3892_v43  ;;  %v12507_v4 = vadd.f32 %v9154_v18, %v4305_v13  ;;  %v14649_v18 = vld [vmem:[#allocation52_spill] sm:$0xff]  ;;  %v14650_v43 = vld [vmem:[#allocation74_spill] sm:$0xff] }
 0x339   :  { %v9069_v28 = vpop.f32.mrf.mxu0  ;;  %v9166_v38 = vpop.f32.mrf.mxu1  ;;  %v3515_v13 = vadd.f32 %v12111_v63, %v14649_v18 }
 0x33a   :  { %14643 = vst [vmem:[#allocation70_spill] sm:$0xff] %v12507_v4  ;;  %v4319_v0 = vadd.f32 %v9069_v28, %v14645_v54  ;;  %v12513_v9 = vadd.f32 %v4743_v33, %v4298_v39  ;;  %v14651_v4 = vld [vmem:[#allocation65_spill] sm:$0xff] }
 0x33b   :  { %v4311_v21 = vpop.f32.mrf.mxu0  ;;  %v4807_v61 = vpop.f32.mrf.mxu1  ;;  %v3916_v3 = vadd.f32 %v14651_v4, %v3495_v2  ;;  %v14658_v2 = vld [vmem:[#allocation56_spill] sm:$0xff] }
 0x33c   :  { %14647 = vst [vmem:[#allocation6_spill] sm:$0xff] %v12513_v9  ;;  %v4312_v44 = vadd.f32 %v4311_v21, %v3904_v6  ;;  %v12515_v46 = vadd.f32 %v9157_v22, %v4319_v0  ;;  %v14654_v22 = vld [vmem:[#allocation26_spill] sm:$0xff]  ;;  %v14655_v6 = vld [vmem:[#allocation67_spill] sm:$0xff] }
 0x33d   :  { %v9072_v57 = vpop.f32.mrf.mxu0  ;;  %v9169_v55 = vpop.f32.mrf.mxu1  ;;  %v3928_v21 = vadd.f32 %v14655_v6, %v3515_v13 }
 0x33e   :  { %14648 = vst [vmem:[#allocation15_spill] sm:$0xff] %v12515_v46  ;;  %v4333_v24 = vadd.f32 %v9072_v57, %v14650_v43  ;;  %v12521_v45 = vadd.f32 %v4759_v31, %v4312_v44 }
 0x33f   :  { %v4325_v28 = vpop.f32.mrf.mxu0  ;;  %v4823_v42 = vpop.f32.mrf.mxu1 }
 0x340   :  { %14652 = vst [vmem:[#allocation12_spill] sm:$0xff] %v12521_v45  ;;  %v4326_v33 = vadd.f32 %v4325_v28, %v3916_v3  ;;  %v12523_v30 = vadd.f32 %v9160_v51, %v4333_v24  ;;  %v14660_v28 = vld [vmem:[#allocation9_spill] sm:$0xff] }
 0x341   :  { %v9075_v39 = vpop.f32.mrf.mxu0  ;;  %v9276_v54 = vpop.f32.mrf.mxu1 }
 0x342   :  { %14653 = vst [vmem:[#allocation31_spill] sm:$0xff] %v12523_v30  ;;  %v4347_v0 = vadd.f32 %v9075_v39, %v14654_v22  ;;  %v12527_v9 = vadd.f32 %v4775_v53, %v4326_v33  ;;  %v14662_v33 = vld [vmem:[#allocation48_spill] sm:$0xff] }
 0x343   :  { %v4339_v63 = vpop.f32.mrf.mxu0  ;;  %v5287_v18 = vpop.f32.mrf.mxu1 }
 0x344   :  { %14656 = vst [vmem:[#allocation13_spill] sm:$0xff] %v12527_v9  ;;  %v4340_v57 = vadd.f32 %v4339_v63, %v3928_v21  ;;  %v12529_v43 = vadd.f32 %v9163_v19, %v4347_v0 }
 0x345   :  { %v9078_v31 = vpop.f32.mrf.mxu0  ;;  %v9279_v4 = vpop.f32.mrf.mxu1 }
 0x346   :  { %14657 = vst [vmem:[#allocation19_spill] sm:$0xff] %v12529_v43  ;;  %v4361_v44 = vadd.f32 %v9078_v31, %v14658_v2  ;;  %v12532_v3 = vadd.f32 %v4791_v16, %v4340_v57 }
 0x347   :  { %v4353_v51 = vpop.f32.mrf.mxu0  ;;  %v5299_v24 = vpop.f32.mrf.mxu1 }
 0x348   :  { %14659 = vst [vmem:[#allocation60_spill] sm:$0xff] %v12532_v3  ;;  %v4354_v45 = vadd.f32 %v4353_v51, %v14660_v28  ;;  %v12535_v39 = vadd.f32 %v9166_v38, %v4361_v44 }
 0x349   :  { %v9081_v13 = vpop.f32.mrf.mxu0  ;;  %v9282_v53 = vpop.f32.mrf.mxu1 }
 0x34a   :  { %14661 = vst [vmem:[#allocation34_spill] sm:$0xff] %v12535_v39  ;;  %v4375_v22 = vadd.f32 %v9081_v13, %v14662_v33  ;;  %v12538_v6 = vadd.f32 %v4807_v61, %v4354_v45 }
 0x34b   :  { %v4367_v19 = vpop.f32.mrf.mxu0  ;;  %v5311_v0 = vpop.f32.mrf.mxu1 }
 0x34c   :  { %14663 = vst [vmem:[#allocation17_spill] sm:$0xff] %v12538_v6  ;;  %v4368_v21 = vadd.f32 %v4367_v19, %v12388_v17  ;;  %v12541_v63 = vadd.f32 %v9169_v55, %v4375_v22 }
 0x34d   :  { %v9188_v16 = vpop.f32.mrf.mxu0  ;;  %v9285_v57 = vpop.f32.mrf.mxu1 }
 0x34e   :  { %14664 = vst [vmem:[#allocation22_spill] sm:$0xff] %v12541_v63  ;;  %v4933_v31 = vadd.f32 %v9188_v16, %v12391_v23  ;;  %v12544_v2 = vadd.f32 %v4823_v42, %v4368_v21 }
 0x34f   :  { %v4926_v38 = vpop.f32.mrf.mxu0  ;;  %v5323_v44 = vpop.f32.mrf.mxu1 }
 0x350   :  { %14665 = vst [vmem:[#allocation66_spill] sm:$0xff] %v12544_v2  ;;  %v12546_v51 = vadd.f32 %v9276_v54, %v4933_v31  ;;  %v4927_v28 = vadd.f32 %v4926_v38, %v12394_v60  ;;  %v5717_v54 = vld [vmem:[%s13781_s5] sm:$0x1]  ;;  %s9588_s5 = smov [#allocation3]  }
 0x351   :  { %v9191_v45 = vpop.f32.mrf.mxu0  ;;  %v9288_v61 = vpop.f32.mrf.mxu1  ;;  %s7410_s19 = sshll.u32 %s9588_s5, 4  ;;  %s7411_s19 = int_to_ptr.vmem [resolvable:$true] %s7410_s19 }
 0x352   :  { %v12549_v13 = vadd.f32 %v5287_v18, %v4927_v28  ;;  %v4945_v17 = vadd.f32 %v9191_v45, %v12397_v25  ;;  %vm5574_vm6 = vcmp.gt.f32.partialorder %v12546_v51, 0.0  ;;  %s9562_s20 = scalar_lea.vmem %s7411_s19, 48  ;;  %s9566_s21 = scalar_lea.vmem %s7411_s19, 64 }
 0x353   :  { %v4938_v55 = vpop.f32.mrf.mxu0  ;;  %v5335_v33 = vpop.f32.mrf.mxu1  ;;  %p9563_p0 = scmp.ne.s32.totalorder %s7411_s19, %s9562_s20  ;;  %p9567_p1 = scmp.lt.s32.totalorder %s7411_s19, %s7411_s19 }
 0x354   :  { %14666 = vst [vmem:[#allocation20_spill] sm:$0xff] %v12549_v13  ;;  %v12552_v22 = vadd.f32 %v9279_v4, %v4945_v17  ;;  %v4939_v23 = vadd.f32 %v4938_v55, %v12400_v12  ;;  %v12566_v4 = vsel %vm5728_vm1, %v5717_v54, 0  ;;  %p9568_p2 = scmp.lt.s32.totalorder %s9566_s21, %s9562_s20 }
 0x355   :  { %v9194_v42 = vpop.f32.mrf.mxu0  ;;  %v12555_v19 = vpop.f32.mrf.mxu1  ;;  %14667 = vst [vmem:[#allocation75_spill] sm:$0xff] %v12566_v4  ;;  %v12574_v28 = vand.u32 4294901760, %v12566_v4 }
 0x356   :  { %v4957_v60 = vadd.f32 %v9194_v42, %v12403_v29  ;;  %v12561_v18 = vadd.f32 %v5299_v24, %v4939_v23  ;;  %vm5576_vm5 = vcmp.gt.f32.partialorder %v12552_v22, 0.0  ;;  %p9569_p3 = por %p9568_p2, %p9567_p1 }
 0x357   :  { %v4950_v21 = vpop.f32.mrf.mxu0  ;;  %v12563_v25 = vpop.f32.mrf.mxu1  ;;  %14668 = vst [vmem:[#allocation23_spill] sm:$0xff] %v12574_v28  ;;  %8122 = vmatprep.mubr.f32.mxu1 %v12574_v28 }
 0x358   :  { %v12568_v16 = vadd.f32 %v9282_v53, %v4957_v60  ;;  %v4951_v12 = vadd.f32 %v4950_v21, %v12406_v41  ;;  %p9570_p4 = pnand %p9569_p3, %p9563_p0 }
 0x359   :  { %v9197_v31 = vpop.f32.mrf.mxu0  ;;  %v12571_v38 = vpop.f32.mrf.mxu1 }
 0x35a   :  { %v12576_v45 = vadd.f32 %v5311_v0, %v4951_v12  ;;  %v4969_v29 = vadd.f32 %v9197_v31, %v12409_v37  ;;  %vm5578_vm7 = vcmp.gt.f32.partialorder %v12568_v16, 0.0 }
 0x35b   :  { %v4962_v24 = vpop.f32.mrf.mxu0  ;;  %v12579_v17 = vpop.f32.mrf.mxu1 }
 0x35c   :  { %v12582_v55 = vadd.f32 %v9285_v57, %v4969_v29  ;;  %v4963_v53 = vadd.f32 %v4962_v24, %v12412_v48  ;;  %vm5577_vm10 = vcmp.gt.f32.partialorder %v12576_v45, 0.0 }
 0x35d   :  { %v9200_v41 = vpop.f32.mrf.mxu0  ;;  %v9297_v23 = vpop.f32.mrf.mxu1 }
 0x35e   :  { %v4981_v42 = vadd.f32 %v9200_v41, %v12415_v34  ;;  %v12586_v54 = vadd.f32 %v5323_v44, %v4963_v53  ;;  %vm5580_vm8 = vcmp.gt.f32.partialorder %v12582_v55, 0.0 }
 0x35f   :  { %v4974_v60 = vpop.f32.mrf.mxu0  ;;  %v12588_v0 = vpop.f32.mrf.mxu1 }
 0x360   :  { %v12590_v21 = vadd.f32 %v9288_v61, %v4981_v42  ;;  %v4975_v37 = vadd.f32 %v4974_v60, %v12418_v15  ;;  %vm5579_vm11 = vcmp.gt.f32.partialorder %v12586_v54, 0.0 }
 0x361   :  { %v9203_v12 = vpop.f32.mrf.mxu0  ;;  %v9300_v31 = vpop.f32.mrf.mxu1 }
 0x362   :  { %v12593_v46 = vadd.f32 %v5335_v33, %v4975_v37  ;;  %vm5582_vm12 = vcmp.gt.f32.partialorder %v12590_v21, 0.0 }
 0x363   :  { %v4986_v57 = vpop.f32.mrf.mxu0  ;;  %v5383_v29 = vpop.f32.mrf.mxu1 }
 0x364   :  { %vm5581_vm0 = vcmp.gt.f32.partialorder %v12593_v46, 0.0 }
 0x365   :  { %v9206_v48 = vpop.f32.mrf.mxu0  ;;  %v9303_v24 = vpop.f32.mrf.mxu1 }
 0x367   :  { %v4998_v9 = vpop.f32.mrf.mxu0  ;;  %v5395_v30 = vpop.f32.mrf.mxu1 }
 0x369   :  { %v9209_v34 = vpop.f32.mrf.mxu0  ;;  %v12595_v44 = vpop.f32.mrf.mxu1 }
 0x36a   :  { %v5017_v4 = vadd.f32 %v9209_v34, %v12433_v47  ;;  %v5626_v47 = vmul.f32 0.01, %v12568_v16 }
 0x36b   :  { %v5010_v53 = vpop.f32.mrf.mxu0  ;;  %v12597_v41 = vpop.f32.mrf.mxu1 }
 0x36d   :  { %v9212_v61 = vpop.f32.mrf.mxu0  ;;  %v12599_v42 = vpop.f32.mrf.mxu1 }
 0x36e   :  { %v5029_v15 = vadd.f32 %v9212_v61, %v12439_v14 }
 0x36f   :  { %v5022_v60 = vpop.f32.mrf.mxu0  ;;  %v12602_v33 = vpop.f32.mrf.mxu1 }
 0x370   :  { %v12604_v37 = vadd.f32 %v9300_v31, %v5029_v15  ;;  %v5023_v3 = vadd.f32 %v5022_v60, %v12442_v20 }
 0x371   :  { %v9215_v43 = vpop.f32.mrf.mxu0  ;;  %v12607_v6 = vpop.f32.mrf.mxu1 }
 0x372   :  { %14669 = vst [vmem:[#allocation25_spill] sm:$0xff] %v12604_v37  ;;  %v12609_v39 = vadd.f32 %v5383_v29, %v5023_v3  ;;  %v5041_v2 = vadd.f32 %v9215_v43, %v12445_v40  ;;  %v5624_v40 = vmul.f32 0.01, %v12552_v22  ;;  %v5378_v43 = vadd.f32 %v9297_v23, %v5017_v4 }
 0x373   :  { %v5034_v63 = vpop.f32.mrf.mxu0  ;;  %v12612_v13 = vpop.f32.mrf.mxu1  ;;  %v5622_v29 = vmul.f32 0.01, %v12546_v51  ;;  %v5628_v4 = vmul.f32 0.01, %v12582_v55  ;;  %v5005_v23 = vadd.f32 %v9206_v48, %v12427_v56  ;;  %v5627_v56 = vmul.f32 0.01, %v12586_v54 }
 0x374   :  { %14670 = vst [vmem:[#allocation42_spill] sm:$0xff] %v12609_v39  ;;  %v12615_v14 = vadd.f32 %v9303_v24, %v5041_v2  ;;  %v5035_v61 = vadd.f32 %v5034_v63, %v12448_v7  ;;  %v4987_v63 = vadd.f32 %v4986_v57, %v12424_v32  ;;  %v5672_v34 = vsel %vm5576_vm5, %v12552_v22, %v5624_v40 }
 0x375   :  { %v12618_v31 = vpop.f32.mrf.mxu0  ;;  %v12620_v15 = vpop.f32.mrf.mxu1  ;;  %v5011_v39 = vadd.f32 %v5010_v53, %v12436_v27  ;;  %v12648_v28 = vsel %vm5574_vm6, %v12546_v51, %v5622_v29  ;;  %v5625_v32 = vmul.f32 0.01, %v12576_v45  ;;  %vm5588_vm9 = vcmp.gt.f32.partialorder %v5378_v43, 0.0 }
 0x376   :  { %v12622_v20 = vadd.f32 %v5395_v30, %v5035_v61  ;;  %v4993_v30 = vadd.f32 %v9203_v12, %v12421_v26  ;;  %v5636_v61 = vmul.f32 0.01, %v5378_v43  ;;  %14671 = vst [vmem:[#allocation30_spill] sm:$0xff] %v12648_v28  ;;  %v5674_v26 = vsel %vm5578_vm7, %v12568_v16, %v5626_v47 }
 0x377   :  { %v12624_v60 = vpop.f32.mrf.mxu0  ;;  %v12626_v3 = vpop.f32.mrf.mxu1  ;;  %v5348_v57 = vadd.f32 %v12563_v25, %v4987_v63  ;;  %v12661_v27 = vsel %vm5728_vm1, %v5672_v34, 0  ;;  %v5676_v51 = vsel %vm5580_vm8, %v12582_v55, %v5628_v4  ;;  %v5366_v16 = vadd.f32 %v12571_v38, %v5005_v23 }
 0x378   :  { %v5354_v22 = vadd.f32 %v12555_v19, %v4993_v30  ;;  %14672 = vst [vmem:[#allocation51_spill] sm:$0xff] %v12661_v27  ;;  %v5630_v40 = vmul.f32 0.01, %v12590_v21  ;;  %v4999_v29 = vadd.f32 %v4998_v9, %v12430_v36  ;;  %v5684_v19 = vsel %vm5588_vm9, %v5378_v43, %v5636_v61 }
 0x379   :  { %v12632_v7 = vpop.f32.mrf.mxu0  ;;  %v12638_v2 = vpop.f32.mrf.mxu1  ;;  %v5372_v25 = vadd.f32 %v12588_v0, %v5011_v39  ;;  %v12672_v47 = vmul.f32 0.01, %v12561_v18  ;;  %v12675_v30 = vsel %vm5728_vm1, %v5674_v26, 0  ;;  %v12680_v55 = vsel %vm5577_vm10, %v12576_v45, %v5625_v32 }
 0x37a   :  { %14674 = vst [vmem:[#allocation32_spill] sm:$0xff] %v12675_v30  ;;  %v12684_v63 = vsel %vm5728_vm1, %v5676_v51, 0  ;;  %v5675_v36 = vsel %vm5579_vm11, %v12586_v54, %v5627_v56  ;;  %v5632_v9 = vmul.f32 0.01, %v5354_v22  ;;  %v5631_v39 = vmul.f32 0.01, %v5348_v57 }
 0x37b   :  { %v12642_v24 = vpop.f32.mrf.mxu0  ;;  %v12658_v48 = vpop.f32.mrf.mxu1  ;;  %14673 = vst [vmem:[#allocation47_spill] sm:$0xff] %v12672_v47  ;;  %vm5584_vm13 = vcmp.gt.f32.partialorder %v5354_v22, 0.0  ;;  %vm5583_vm14 = vcmp.gt.f32.partialorder %v5348_v57, 0.0  ;;  %v5634_v43 = vmul.f32 0.01, %v5366_v16  ;;  %v5778_v4 = vsel %vm5728_vm1, %v5684_v19, 0 }
 0x37c   :  { %v5678_v45 = vsel %vm5582_vm12, %v12590_v21, %v5630_v40  ;;  %vm5586_vm15 = vcmp.gt.f32.partialorder %v5366_v16, 0.0  ;;  %v5360_v34 = vadd.f32 %v12579_v17, %v4999_v29  ;;  %v5635_v61 = vmul.f32 0.01, %v5372_v25 }
 0x37d   :  { %v12652_v12 = vpop.f32.mrf.mxu0  ;;  %v9321_v0 = vpop.f32.mrf.mxu1  ;;  %v5629_v26 = vmul.f32 0.01, %v12593_v46  ;;  %vm5587_vm2 = vcmp.gt.f32.partialorder %v5372_v25, 0.0  ;;  %v12693_v32 = vand.u32 4294901760, %v12684_v63  ;;  %v5680_v56 = vsel %vm5584_vm13, %v5354_v22, %v5632_v9 }
 0x37e   :  { %v5679_v51 = vsel %vm5583_vm14, %v5348_v57, %v5631_v39  ;;  %v12696_v27 = vand.u32 4294901760, %v5778_v4  ;;  %v12699_v21 = vsel %vm5728_vm1, %v5675_v36, 0  ;;  %v12702_v17 = vsel %vm5728_vm1, %v5678_v45, 0 }
 0x37f   :  { %v12666_v53 = vpop.f32.mrf.mxu0  ;;  %14675 = vst [vmem:[#allocation54_spill] sm:$0xff] %v12693_v32  ;;  %v5467_v28 = vpop.f32.mrf.mxu1  ;;  %v5682_v40 = vsel %vm5586_vm15, %v5366_v16, %v5634_v43  ;;  %v5633_v37 = vmul.f32 0.01, %v5360_v34  ;;  %v5683_v30 = vsel %vm5587_vm2, %v5372_v25, %v5635_v61  ;;  %v12713_v36 = vsel %vm5728_vm1, %v5680_v56, 0 }
 0x380   :  { %v12716_v9 = vsel %vm5728_vm1, %v5679_v51, 0  ;;  %vm5585_vm3 = vcmp.gt.f32.partialorder %v5360_v34, 0.0  ;;  %v5772_v16 = vsel %vm5728_vm1, %v5682_v40, 0  ;;  %v12726_v43 = vand.u32 4294901760, %v12702_v17 }
 0x381   :  { %v9227_v38 = vpop.f32.mrf.mxu0  ;;  %v5681_v45 = vsel %vm5585_vm3, %v5360_v34, %v5633_v37  ;;  %v12736_v51 = vand.u32 4294901760, %v5772_v16  ;;  %vm5592_vm2 = vcmp.gt.f32.partialorder %v12615_v14, 0.0  ;;  %vm5591_vm3 = vcmp.gt.f32.partialorder %v12622_v20, 0.0 }
 0x382   :  { %v5089_v29 = vadd.f32 %v9227_v38, %v12469_v35  ;;  %14676 = vst [vmem:[#allocation44_spill] sm:$0xff] %v12726_v43 }
 0x383   :  { %v5082_v23 = vpop.f32.mrf.mxu0 }
 0x385   :  { %v9230_v54 = vpop.f32.mrf.mxu0 }
 0x386   :  { %v5101_v19 = vadd.f32 %v9230_v54, %v12475_v8  ;;  %v12710_v8 = vsel %vm5581_vm0, %v12593_v46, %v5629_v26  ;;  %v5450_v46 = vadd.f32 %v12620_v15, %v5089_v29  ;;  %v12730_v26 = vand.u32 4294901760, %v12713_v36 }
 0x387   :  { %v5094_v47 = vpop.f32.mrf.mxu0  ;;  %v12733_v54 = vand.u32 4294901760, %v12716_v9  ;;  %vm5575_vm0 = vcmp.gt.f32.partialorder %v12561_v18, 0.0 }
 0x388   :  { %v5462_v22 = vadd.f32 %v12638_v2, %v5101_v19  ;;  %v5095_v57 = vadd.f32 %v5094_v47, %v12480_v50  ;;  %v9324_v2 = vpop.f32.mrf.mxu1  ;;  %v12720_v50 = vsub.f32 %v5778_v4, %v12696_v27  ;;  %v5775_v47 = vsel %vm5728_vm1, %v5683_v30, 0 }
 0x389   :  { %v9233_v35 = vpop.f32.mrf.mxu0  ;;  %v12740_v34 = vand.u32 4294901760, %v5775_v47  ;;  %v5648_v40 = vmul.f32 0.01, %v5450_v46  ;;  %vm5600_vm8 = vcmp.gt.f32.partialorder %v5450_v46, 0.0 }
 0x38a   :  { %vm5602_vm4 = vcmp.gt.f32.partialorder %v5462_v22, 0.0  ;;  %v5650_v25 = vmul.f32 0.01, %v5462_v22  ;;  %v5113_v38 = vadd.f32 %v9233_v35, %v12483_v52  ;;  %v5456_v61 = vadd.f32 %v12658_v48, %v5095_v57  ;;  %v5479_v19 = vpop.f32.mrf.mxu1 }
 0x38b   :  { %v5106_v39 = vpop.f32.mrf.mxu0  ;;  %v5083_v52 = vadd.f32 %v5082_v23, %v12472_v59  ;;  %v14105_v48 = vand.u32 4294901760, %v12720_v50 }
 0x38c   :  { %v5698_v4 = vsel %vm5602_vm4, %v5462_v22, %v5650_v25  ;;  %v5474_v56 = vadd.f32 %v9321_v0, %v5113_v38  ;;  %v5107_v30 = vadd.f32 %v5106_v39, %v12489_v1  ;;  %v5649_v1 = vmul.f32 0.01, %v5456_v61 }
 0x38d   :  { %v9236_v15 = vpop.f32.mrf.mxu0  ;;  %v5820_v0 = vsel %vm5728_vm1, %v5698_v4, 0  ;;  %vm5601_vm6 = vcmp.gt.f32.partialorder %v5456_v61, 0.0  ;;  %v5077_v38 = vadd.f32 %v12652_v12, %v12463_v5  ;;  %v12761_v12 = vsub.f32 %v5775_v47, %v12740_v34 }
 0x38e   :  { %v5125_v37 = vadd.f32 %v9236_v15, %v12491_v49  ;;  %vm5604_vm5 = vcmp.gt.f32.partialorder %v5474_v56, 0.0  ;;  %v5652_v29 = vmul.f32 0.01, %v5474_v56  ;;  %v5468_v57 = vadd.f32 %v5467_v28, %v5107_v30  ;;  %v9327_v28 = vpop.f32.mrf.mxu1 }
 0x38f   :  { %v5118_v22 = vpop.f32.mrf.mxu0  ;;  %v12776_v47 = vsub.f32 %v5772_v16, %v12736_v51 }
 0x390   :  { %v12744_v35 = vadd.f32 %v9324_v2, %v5125_v37  ;;  %v5119_v25 = vadd.f32 %v5118_v22, %v12497_v11  ;;  %v5700_v59 = vsel %vm5604_vm5, %v5474_v56, %v5652_v29  ;;  %vm5603_vm7 = vcmp.gt.f32.partialorder %v5468_v57, 0.0 }
 0x391   :  { %v5651_v49 = vmul.f32 0.01, %v5468_v57  ;;  %v9239_v23 = vpop.f32.mrf.mxu0  ;;  %v5826_v39 = vsel %vm5728_vm1, %v5700_v59, 0  ;;  %v12755_v11 = vand.u32 4294901760, %v5820_v0  ;;  %v5444_v56 = vadd.f32 %v12626_v3, %v5083_v52  ;;  %v5491_v52 = vpop.f32.mrf.mxu1 }
 0x392   :  { %14677 = vst [vmem:[#allocation36_spill] sm:$0xff] %v12744_v35  ;;  %v12750_v30 = vadd.f32 %v5479_v19, %v5119_v25  ;;  %v5137_v2 = vadd.f32 %v9239_v23, %v12499_v10  ;;  %v12753_v37 = vand.u32 4294901760, %v5826_v39  ;;  %v5697_v29 = vsel %vm5601_vm6, %v5456_v61, %v5649_v1  ;;  %v14681_v23 = vld [vmem:[#allocation7_spill] sm:$0xff] }
 0x393   :  { %v5699_v4 = vsel %vm5603_vm7, %v5468_v57, %v5651_v49  ;;  %v5130_v15 = vpop.f32.mrf.mxu0  ;;  %v5696_v22 = vsel %vm5600_vm8, %v5450_v46, %v5648_v40  ;;  %v5769_v25 = vsel %vm5728_vm1, %v5681_v45, 0  ;;  %v5438_v3 = vadd.f32 %v12607_v6, %v5077_v38 }
 0x394   :  { %14678 = vst [vmem:[#allocation50_spill] sm:$0xff] %v12750_v30  ;;  %v5823_v5 = vsel %vm5728_vm1, %v5699_v4, 0  ;;  %v12763_v19 = vadd.f32 %v9327_v28, %v5137_v2  ;;  %v5131_v57 = vadd.f32 %v5130_v15, %v12505_v62  ;;  %8056 = vmatprep.subr.mxu0 %v12753_v37  ;;  %v12773_v61 = vsub.f32 %v5826_v39, %v12753_v37 }
 0x395   :  { %v12767_v10 = vand.u32 4294901760, %v5823_v5  ;;  %8057 = vmatpush3.xpose.msra.mxu0 %v12696_v27  ;;  %v5065_v62 = vadd.f32 %v12632_v7, %v12457_v58  ;;  %v5817_v46 = vsel %vm5728_vm1, %v5697_v29, 0  ;;  %v12785_v6 = vsub.f32 %v5820_v0, %v12755_v11 }
 0x396   :  { %14679 = vst [vmem:[#allocation39_spill] sm:$0xff] %v12763_v19  ;;  %v12781_v40 = vadd.f32 %v5491_v52, %v5131_v57  ;;  %v5814_v45 = vsel %vm5728_vm1, %v5696_v22, 0  ;;  %v5647_v1 = vmul.f32 0.01, %v5444_v56  ;;  %v14106_v59 = vand.u32 4294901760, %v12773_v61  ;;  %v14703_v19 = vld [vmem:[#allocation23_spill] sm:$0xff] }
 0x397   :  { %8058 = vmatprep.subr.mxu0 %v12767_v10  ;;  %v12790_v16 = vsub.f32 %v5823_v5, %v12767_v10  ;;  %vm5599_vm9 = vcmp.gt.f32.partialorder %v5444_v56, 0.0  ;;  %v5988_v58 = vsub.f32 %v12720_v50, %v14105_v48  ;;  %v12795_v7 = vand.u32 4294901760, %v5769_v25  ;;  %v14682_v5 = vld [vmem:[#allocation11_spill] sm:$0xff] }
 0x398   :  { %14680 = vst [vmem:[#allocation58_spill] sm:$0xff] %v12781_v40  ;;  %v14115_v49 = vand.u32 4294901760, %v12761_v12  ;;  %vm5598_vm10 = vcmp.gt.f32.partialorder %v5438_v3, 0.0  ;;  %v5646_v0 = vmul.f32 0.01, %v5438_v3  ;;  %v5071_v38 = vadd.f32 %v12666_v53, %v14681_v23 }
 0x399   :  { %8059 = vmatpush3.xpose.msra.mxu0 %v12740_v34  ;;  %v12801_v39 = vand.u32 4294901760, %v5817_v46  ;;  %v6100_v28 = vsub.f32 %v12773_v61, %v14106_v59  ;;  %v14117_v4 = vand.u32 4294901760, %v12790_v16  ;;  %v12808_v2 = vand.u32 4294901760, %v5814_v45 }
 0x39a   :  { %8060 = vmatprep.subr.mxu0 %v12755_v11  ;;  %v5426_v29 = vadd.f32 %v12599_v42, %v5065_v62  ;;  %v5059_v53 = vadd.f32 %v12642_v24, %v14682_v5  ;;  %v5695_v22 = vsel %vm5599_vm9, %v5444_v56, %v5647_v1  ;;  %v14107_v57 = vand.u32 4294901760, %v12776_v47  ;;  %v14685_v5 = vld [vmem:[#allocation45_spill] sm:$0xff] }
 0x39b   :  { %v6101_v52 = vand.u32 4294901760, %v6100_v28  ;;  %v5989_v23 = vand.u32 4294901760, %v5988_v58  ;;  %v5995_v48 = vsub.f32 %v12761_v12, %v14115_v49  ;;  %v12820_v59 = vsub.f32 %v5769_v25, %v12795_v7  ;;  %v14684_v58 = vld [vmem:[#allocation62_spill] sm:$0xff] }
 0x39c   :  { %v5694_v15 = vsel %vm5598_vm10, %v5438_v3, %v5646_v0  ;;  %v5432_v42 = vadd.f32 %v12612_v13, %v5071_v38  ;;  %v6107_v24 = vsub.f32 %v12790_v16, %v14117_v4  ;;  %v12829_v56 = vsub.f32 %v5817_v46, %v12801_v39 }
 0x39d   :  { %8061 = vmatpush3.xpose.msra.mxu0 %v12736_v51  ;;  %v5811_v62 = vsel %vm5728_vm1, %v5695_v22, 0  ;;  %8090 = vmatprep.subr.mxu1 %v6101_v52  ;;  %v14683_v25 = vand.u32 4294901760, %v12785_v6  ;;  %v12837_v13 = vsub.f32 %v5814_v45, %v12808_v2  ;;  %v12841_v1 = vsub.f32 %v12713_v36, %v12730_v26 }
 0x39e   :  { %8062 = vmatprep.subr.mxu0 %v12801_v39  ;;  %v5053_v46 = vadd.f32 %v12618_v31, %v14684_v58  ;;  %8091 = vmatpush3.xpose.msra.mxu1 %v5989_v23  ;;  %v6108_v0 = vand.u32 4294901760, %v6107_v24  ;;  %v6002_v38 = vsub.f32 %v12776_v47, %v14107_v57  ;;  %v14108_v28 = vand.u32 4294901760, %v12829_v56 }
 0x39f   :  { %v6114_v3 = vsub.f32 %v12785_v6, %v14683_v25  ;;  %v5047_v22 = vadd.f32 %v12624_v60, %v14685_v5  ;;  %v5644_v45 = vmul.f32 0.01, %v5426_v29  ;;  %v5420_v52 = vadd.f32 %v12602_v33, %v5059_v53 }
 0x3a0   :  { %v5808_v36 = vsel %vm5728_vm1, %v5694_v15, 0  ;;  %v5645_v25 = vmul.f32 0.01, %v5432_v42  ;;  %8092 = vmatprep.subr.mxu1 %v6108_v0  ;;  %v5996_v31 = vand.u32 4294901760, %v5995_v48  ;;  %v12854_v23 = vand.u32 4294901760, %v5811_v62 }
 0x3a1   :  { %8063 = vmatpush3.xpose.msra.mxu0 %v12795_v7  ;;  %v14112_v24 = vand.u32 4294901760, %v12820_v59  ;;  %vm5597_vm11 = vcmp.gt.f32.partialorder %v5432_v42, 0.0  ;;  %v6115_v58 = vand.u32 4294901760, %v6114_v3  ;;  %v6121_v60 = vsub.f32 %v12829_v56, %v14108_v28 }
 0x3a2   :  { %8064 = vmatprep.subr.mxu0 %v12808_v2  ;;  %v14111_v33 = vand.u32 4294901760, %v12837_v13  ;;  %v5414_v15 = vadd.f32 %v12595_v44, %v5053_v46  ;;  %vm5596_vm12 = vcmp.gt.f32.partialorder %v5426_v29, 0.0  ;;  %8093 = vmatpush3.xpose.msra.mxu1 %v5996_v31  ;;  %v12863_v53 = vand.u32 4294901760, %v5808_v36 }
 0x3a3   :  { %v14109_v48 = vand.u32 4294901760, %v12841_v1  ;;  %v5408_v0 = vadd.f32 %v12597_v41, %v5047_v22  ;;  %vm5595_vm13 = vcmp.gt.f32.partialorder %v5420_v52, 0.0  ;;  %v5643_v5 = vmul.f32 0.01, %v5420_v52  ;;  %8094 = vmatprep.subr.mxu1 %v6115_v58 }
 0x3a4   :  { %v6003_v3 = vand.u32 4294901760, %v6002_v38  ;;  %v5693_v57 = vsel %vm5597_vm11, %v5432_v42, %v5645_v25  ;;  %v6009_v28 = vsub.f32 %v12820_v59, %v14112_v24  ;;  %v12872_v44 = vsub.f32 %v5811_v62, %v12854_v23 }
 0x3a5   :  { %8065 = vmatpush3.xpose.msra.mxu0 %v12730_v26  ;;  %v12876_v46 = vsub.f32 %v12716_v9, %v12733_v54  ;;  %v5757_v41 = vsel %vm5728_vm1, %v12710_v8, 0  ;;  %v5692_v22 = vsel %vm5596_vm12, %v5426_v29, %v5644_v45  ;;  %v6122_v42 = vand.u32 4294901760, %v6121_v60 }
 0x3a6   :  { %8066 = vmatprep.subr.mxu0 %v12854_v23  ;;  %v6128_v38 = vsub.f32 %v12837_v13, %v14111_v33  ;;  %vm5594_vm14 = vcmp.gt.f32.partialorder %v5414_v15, 0.0  ;;  %8095 = vmatpush3.xpose.msra.mxu1 %v6003_v3  ;;  %v14110_v62 = vand.u32 4294901760, %v12872_v44  ;;  %v12886_v25 = vsub.f32 %v5808_v36, %v12863_v53 }
 0x3a7   :  { %v12890_v9 = vsub.f32 %v12702_v17, %v12726_v43  ;;  %v5642_v8 = vmul.f32 0.01, %v5414_v15  ;;  %v5641_v29 = vmul.f32 0.01, %v5408_v0  ;;  %v5691_v45 = vsel %vm5595_vm13, %v5420_v52, %v5643_v5  ;;  %8096 = vmatprep.subr.mxu1 %v6122_v42 }
 0x3a8   :  { %v5805_v31 = vsel %vm5728_vm1, %v5693_v57, 0  ;;  %v5802_v58 = vsel %vm5728_vm1, %v5692_v22, 0  ;;  %v6010_v60 = vand.u32 4294901760, %v6009_v28  ;;  %v6016_v36 = vsub.f32 %v12841_v1, %v14109_v48 }
 0x3a9   :  { %8067 = vmatpush3.xpose.msra.mxu0 %v12733_v54  ;;  %v14113_v3 = vand.u32 4294901760, %v12876_v46  ;;  %vm5593_vm15 = vcmp.gt.f32.partialorder %v5408_v0, 0.0  ;;  %v6129_v17 = vand.u32 4294901760, %v6128_v38  ;;  %v6135_v57 = vsub.f32 %v12872_v44, %v14110_v62 }
 0x3aa   :  { %8068 = vmatprep.subr.mxu0 %v12863_v53  ;;  %v14114_v52 = vand.u32 4294901760, %v12886_v25  ;;  %v5640_v5 = vmul.f32 0.01, %v12615_v14  ;;  %v5799_v28 = vsel %vm5728_vm1, %v5691_v45, 0  ;;  %8097 = vmatpush3.xpose.msra.mxu1 %v6010_v60  ;;  %v12907_v22 = vand.u32 4294901760, %v5805_v31 }
 0x3ab   :  { %v12909_v42 = vand.u32 4294901760, %v5757_v41  ;;  %v5690_v38 = vsel %vm5594_vm14, %v5414_v15, %v5642_v8  ;;  %8098 = vmatprep.subr.mxu1 %v6129_v17  ;;  %v12914_v48 = vand.u32 4294901760, %v5802_v58  ;;  %v12917_v62 = vand.u32 4294901760, %v12699_v21 }
 0x3ac   :  { %14686 = vst [vmem:[#allocation8_spill] sm:$0xff] %v12907_v22  ;;  %v5689_v33 = vsel %vm5593_vm15, %v5408_v0, %v5641_v29  ;;  %v6017_v45 = vand.u32 4294901760, %v6016_v36  ;;  %v6023_v60 = vsub.f32 %v12876_v46, %v14113_v3  ;;  %v14116_v24 = vand.u32 4294901760, %v12890_v9 }
 0x3ad   :  { %14687 = vst [vmem:[#allocation64_spill] sm:$0xff] %v12909_v42  ;;  %14688 = vst [vmem:[#allocation16_spill] sm:$0xff] %v12914_v48  ;;  %8069 = vmatpush3.xpose.msra.mxu0 %v12726_v43  ;;  %v6136_v15 = vand.u32 4294901760, %v6135_v57  ;;  %v6142_v8 = vsub.f32 %v12886_v25, %v14114_v52  ;;  %v12929_v17 = vand.u32 4294901760, %v5799_v28  ;;  %v12933_v0 = vsub.f32 %v12684_v63, %v12693_v32 }
 0x3ae   :  { %14689 = vst [vmem:[#allocation28_spill] sm:$0xff] %v12917_v62  ;;  %8070 = vmatprep.subr.mxu0 %v12907_v22  ;;  %v5688_v29 = vsel %vm5592_vm2, %v12615_v14, %v5640_v5  ;;  %v5796_v36 = vsel %vm5728_vm1, %v5690_v38, 0  ;;  %8099 = vmatpush3.xpose.msra.mxu1 %v6017_v45  ;;  %v12938_v3 = vsub.f32 %v5805_v31, %v12907_v22  ;;  %v5639_v52 = vmul.f32 0.01, %v12622_v20  ;;  %v14695_v5 = vld [vmem:[#allocation25_spill] sm:$0xff] }
 0x3af   :  { %14690 = vst [vmem:[#allocation27_spill] sm:$0xff] %v12929_v17  ;;  %v12941_v57 = vsub.f32 %v5757_v41, %v12909_v42  ;;  %v5793_v49 = vsel %vm5728_vm1, %v5689_v33, 0  ;;  %8100 = vmatprep.subr.mxu1 %v6136_v15  ;;  %v12947_v63 = vsub.f32 %v5802_v58, %v12914_v48  ;;  %v6024_v14 = vand.u32 4294901760, %v6023_v60 }
 0x3b0   :  { %v6030_v31 = vsub.f32 %v12890_v9, %v14116_v24  ;;  %v14118_v41 = vand.u32 4294901760, %v12938_v3  ;;  %v6143_v38 = vand.u32 4294901760, %v6142_v8  ;;  %v12956_v45 = vand.u32 4294901760, %v5796_v36  ;;  %v14693_v24 = vld [vmem:[#allocation32_spill] sm:$0xff] }
 0x3b1   :  { %8071 = vmatpush3.xpose.msra.mxu0 %v12909_v42  ;;  %v12960_v58 = vsub.f32 %v5799_v28, %v12929_v17  ;;  %v5745_v60 = vsel %vm5728_vm1, %v12680_v55, 0  ;;  %v12968_v4 = vand.u32 4294901760, %v14693_v24  ;;  %vm5590_vm4 = vcmp.gt.f32.partialorder %v14695_v5, 0.0 }
 0x3b2   :  { %8072 = vmatprep.subr.mxu0 %v12914_v48  ;;  %14691 = vst [vmem:[#allocation33_spill] sm:$0xff] %v12956_v45  ;;  %8101 = vmatpush3.xpose.msra.mxu1 %v6024_v14  ;;  %v6149_v15 = vsub.f32 %v12938_v3, %v14118_v41  ;;  %v5638_v33 = vmul.f32 0.01, %v14695_v5  ;;  %v5790_v28 = vsel %vm5728_vm1, %v5688_v29, 0  ;;  %v5687_v55 = vsel %vm5591_vm3, %v12622_v20, %v5639_v52  ;;  %v14706_v52 = vld [vmem:[#allocation42_spill] sm:$0xff] }
 0x3b3   :  { %14692 = vst [vmem:[#allocation68_spill] sm:$0xff] %v12960_v58  ;;  %14694 = vst [vmem:[#allocation38_spill] sm:$0xff] %v12968_v4  ;;  %8102 = vmatprep.subr.mxu1 %v6143_v38  ;;  %v6031_v14 = vand.u32 4294901760, %v6030_v31  ;;  %v14696_v41 = vand.u32 4294901760, %v12941_v57  ;;  %v12981_v35 = vand.u32 4294901760, %v5793_v49  ;;  %v12985_v8 = vsub.f32 %v12699_v21, %v12917_v62  ;;  %v14701_v38 = vld [vmem:[#allocation47_spill] sm:$0xff] }
 0x3b4   :  { %v6150_v29 = vand.u32 4294901760, %v6149_v15  ;;  %v14699_v40 = vand.u32 4294901760, %v12947_v63  ;;  %v12993_v31 = vsub.f32 %v5796_v36, %v12956_v45  ;;  %v12999_v21 = vand.u32 4294901760, %v5745_v60 }
 0x3b5   :  { %8073 = vmatpush3.xpose.msra.mxu0 %v12693_v32  ;;  %v6037_v30 = vsub.f32 %v12941_v57, %v14696_v41  ;;  %14697 = vst [vmem:[#allocation29_spill] sm:$0xff] %v12981_v35  ;;  %14698 = vst [vmem:[#allocation41_spill] sm:$0xff] %v12985_v8  ;;  %v5671_v41 = vsel %vm5575_vm0, %v12561_v18, %v14701_v38  ;;  %v13003_v15 = vsub.f32 %v14693_v24, %v12968_v4  ;;  %vm9586_vm13 = vmmov 0  }
 0x3b6   :  { %8074 = vmatprep.subr.mxu0 %v12929_v17  ;;  %v6156_v20 = vsub.f32 %v12947_v63, %v14699_v40  ;;  %14700 = vst [vmem:[#allocation40_spill] sm:$0xff] %v12993_v31  ;;  %8103 = vmatpush3.xpose.msra.mxu1 %v6031_v14  ;;  %14702 = vst [vmem:[#allocation46_spill] sm:$0xff] %v12999_v21  ;;  %v14704_v17 = vld [vmem:[#allocation75_spill] sm:$0xff]  ;;  %v5686_v36 = vsel %vm5590_vm4, %v14695_v5, %v5638_v33  ;;  %vm5589_vm5 = vcmp.gt.f32.partialorder %v14706_v52, 0.0 }
 0x3b7   :  { %v13007_v40 = vsub.f32 %v14704_v17, %v14703_v19  ;;  %v5637_v32 = vmul.f32 0.01, %v14706_v52  ;;  %8104 = vmatprep.subr.mxu1 %v6150_v29  ;;  %v14707_v18 = vand.u32 4294901760, %v12933_v0  ;;  %v5787_v24 = vsel %vm5728_vm1, %v5687_v55, 0  ;;  %v14710_v55 = vld [vmem:[#allocation20_spill] sm:$0xff] }
 0x3b8   :  { %v6038_v38 = vand.u32 4294901760, %v6037_v30  ;;  %v13020_v48 = vand.u32 4294901760, %v5790_v28  ;;  %v6157_v5 = vand.u32 4294901760, %v6156_v20  ;;  %v14709_v33 = vand.u32 4294901760, %v12960_v58 }
 0x3b9   :  { %14705 = vst [vmem:[#allocation43_spill] sm:$0xff] %v13007_v40  ;;  %v6044_v14 = vsub.f32 %v12933_v0, %v14707_v18  ;;  %8075 = vmatpush3.xpose.msra.mxu0 %v12917_v62  ;;  %v13028_v18 = vsub.f32 %v5793_v49, %v12981_v35  ;;  %vm5573_vm6 = vcmp.gt.f32.partialorder %v14710_v55, 0.0  ;;  %v5621_v30 = vmul.f32 0.01, %v14710_v55  ;;  %v14711_v62 = vld [vmem:[#allocation51_spill] sm:$0xff] }
 0x3ba   :  { %14708 = vst [vmem:[#allocation49_spill] sm:$0xff] %v13020_v48  ;;  %8076 = vmatprep.subr.mxu0 %v12956_v45  ;;  %v6163_v29 = vsub.f32 %v12960_v58, %v14709_v33  ;;  %v5739_v17 = vsel %vm5728_vm1, %v5671_v41, 0  ;;  %8105 = vmatpush3.xpose.msra.mxu1 %v6038_v38  ;;  %v13034_v22 = vand.u32 4294901760, %v14711_v62  ;;  %v5784_v20 = vsel %vm5728_vm1, %v5686_v36, 0 }
 0x3bb   :  { %v5685_v33 = vsel %vm5589_vm5, %v14706_v52, %v5637_v32  ;;  %8106 = vmatprep.subr.mxu1 %v6157_v5  ;;  %v6045_v42 = vand.u32 4294901760, %v6044_v14  ;;  %v14712_v45 = vand.u32 4294901760, %v12985_v8  ;;  %v13045_v38 = vand.u32 4294901760, %v5787_v24 }
 0x3bc   :  { %v13048_v43 = vsub.f32 %v5745_v60, %v12999_v21  ;;  %v13051_v36 = vand.u32 4294901760, %v13007_v40  ;;  %v6164_v32 = vand.u32 4294901760, %v6163_v29  ;;  %v14714_v52 = vand.u32 4294901760, %v12993_v31 }
 0x3bd   :  { %8077 = vmatpush3.xpose.msra.mxu0 %v12968_v4  ;;  %v6051_v41 = vsub.f32 %v12985_v8, %v14712_v45  ;;  %14713 = vst [vmem:[#allocation35_spill] sm:$0xff] %v13045_v38  ;;  %v13059_v49 = vsub.f32 %v5790_v28, %v13020_v48  ;;  %v14715_v45 = vld [vmem:[#allocation30_spill] sm:$0xff]  ;;  %v5669_v60 = vsel %vm5573_vm6, %v14710_v55, %v5621_v30  ;;  %v13066_v8 = vand.u32 4294901760, %v5739_v17 }
 0x3be   :  { %8078 = vmatprep.subr.mxu0 %v12981_v35  ;;  %v6170_v14 = vsub.f32 %v12993_v31, %v14714_v52  ;;  %v5736_v4 = vsel %vm5728_vm1, %v14715_v45, 0  ;;  %8107 = vmatpush3.xpose.msra.mxu1 %v6045_v42  ;;  %v5976_v29 = vsub.f32 %v13007_v40, %v13051_v36  ;;  %v5718_v35 = vld [vmem:[#allocation2] sm:$0x1]  ;;  %v5781_v52 = vsel %vm5728_vm1, %v5685_v33, 0 }
 0x3bf   :  { %8108 = vmatprep.subr.mxu1 %v6164_v32  ;;  %v14716_v28 = vand.u32 4294901760, %v13003_v15  ;;  %v13076_v45 = vsub.f32 %v14711_v62, %v13034_v22  ;;  %v6052_v42 = vand.u32 4294901760, %v6051_v41  ;;  %v14151_v55 = vand.u32 4294901760, %v13048_v43 }
 0x3c0   :  { %v13080_v30 = vand.u32 4294901760, %v5784_v20  ;;  %v13082_v31 = vand.u32 4294901760, %v5976_v29  ;;  %v9584_v58 = vmov 0   ;;  %v6171_v33 = vand.u32 4294901760, %v6170_v14 }
 0x3c1   :  { %v6058_v5 = vsub.f32 %v13003_v15, %v14716_v28  ;;  %14717 = vst [vmem:[#allocation14_spill] sm:$0xff] %v13076_v45  ;;  %8079 = vmatpush3.xpose.msra.mxu0 %v12999_v21  ;;  %9561 = vset.pattern.permute.xlu0 %v9584_v58  ;;  %v14720_v32 = vand.u32 4294901760, %v13028_v18  ;;  %v14154_v62 = vand.u32 4294901760, %v13059_v49  ;;  %v13090_v21 = vsub.f32 %v5787_v24, %v13045_v38 }
 0x3c2   :  { %14718 = vst [vmem:[#allocation53_spill] sm:$0xff] %v13080_v30  ;;  %14719 = vst [vmem:[#allocation10_spill] sm:$0xff] %v13082_v31  ;;  %8080 = vmatprep.subr.mxu0 %v13020_v48  ;;  %5721 = vperm.xlu0 %9561, %v5718_v35   ;;  %v5733_v41 = vsel %vm5728_vm1, %v5669_v60, 0  ;;  %v13094_v58 = vand.u32 4294901760, %v5736_v4  ;;  %v14155_v14 = vand.u32 4294901760, %v13076_v45  ;;  %v13101_v24 = vand.u32 4294901760, %v5781_v52 }
 0x3c3   :  { %v6177_v28 = vsub.f32 %v13028_v18, %v14720_v32  ;;  %14721 = vst [vmem:[#allocation21_spill] sm:$0xff] %v13090_v21  ;;  %8109 = vmatpush3.xpose.msra.mxu1 %v6052_v42  ;;  %8088 = vmatprep.mubr.f32.mxu0 %v13082_v31  ;;  %v6059_v29 = vand.u32 4294901760, %v6058_v5  ;;  %v6065_v32 = vsub.f32 %v13048_v43, %v14151_v55  ;;  %v13114_v55 = vand.u32 4294901760, %v5733_v41 }
 0x3c4   :  { %8110 = vmatprep.subr.mxu1 %v6171_v33  ;;  %v13104_v35 = vsub.f32 %v5739_v17, %v13066_v8  ;;  %v6184_v42 = vsub.f32 %v13059_v49, %v14154_v62  ;;  %v14158_v33 = vand.u32 4294901760, %v13090_v21  ;;  %v13112_v5 = vsub.f32 %v5784_v20, %v13080_v30 }
 0x3c5   :  { %8081 = vmatpush3.xpose.msra.mxu0 %v13034_v22  ;;  %v6178_v60 = vand.u32 4294901760, %v6177_v28  ;;  %v6066_v17 = vand.u32 4294901760, %v6065_v32  ;;  %v6072_v28 = vsub.f32 %v13076_v45, %v14155_v14  ;;  %v13122_v62 = vsub.f32 %v5736_v4, %v13094_v58 }
 0x3c6   :  { %14722 = vst [vmem:[#allocation18_spill] sm:$0xff] %v13104_v35  ;;  %8082 = vmatprep.subr.mxu0 %v13045_v38  ;;  %v14159_v38 = vand.u32 4294901760, %v13104_v35  ;;  %v6185_v20 = vand.u32 4294901760, %v6184_v42  ;;  %v13130_v32 = vsub.f32 %v5781_v52, %v13101_v24 }
 0x3c7   :  { %8111 = vmatpush3.xpose.msra.mxu1 %v6059_v29  ;;  %v6191_v29 = vsub.f32 %v13090_v21, %v14158_v33  ;;  %v6073_v14 = vand.u32 4294901760, %v6072_v28  ;;  %v14162_v42 = vand.u32 4294901760, %v13122_v62 }
 0x3c8   :  { %8112 = vmatprep.subr.mxu1 %v6178_v60  ;;  %v14163_v60 = vand.u32 4294901760, %v13112_v5  ;;  %14723 = vst [vmem:[#allocation55_spill] sm:$0xff] %v13130_v32  ;;  %v6079_v4 = vsub.f32 %v13104_v35, %v14159_v38 }
 0x3c9   :  { %8083 = vmatpush3.xpose.msra.mxu0 %v13066_v8  ;;  %v6192_v33 = vand.u32 4294901760, %v6191_v29 }
 0x3ca   :  { %8084 = vmatprep.subr.mxu0 %v13080_v30  ;;  %v13138_v30 = vsub.f32 %v5733_v41, %v13114_v55  ;;  %v6198_v52 = vsub.f32 %v13112_v5, %v14163_v60  ;;  %v6080_v28 = vand.u32 4294901760, %v6079_v4  ;;  %v14736_v60 = vld [vmem:[#allocation38_spill] sm:$0xff] }
 0x3cb   :  { %8113 = vmatpush3.xpose.msra.mxu1 %v6066_v17  ;;  %v14161_v17 = vand.u32 4294901760, %v13130_v32 }
 0x3cc   :  { %8114 = vmatprep.subr.mxu1 %v6185_v20  ;;  %14724 = vst [vmem:[#allocation24_spill] sm:$0xff] %v13138_v30  ;;  %v6086_v20 = vsub.f32 %v13122_v62, %v14162_v42  ;;  %v14160_v41 = vand.u32 4294901760, %v13138_v30  ;;  %v6199_v38 = vand.u32 4294901760, %v6198_v52  ;;  %v14735_v42 = vld [vmem:[#allocation33_spill] sm:$0xff] }
 0x3cd   :  { %8085 = vmatpush3.xpose.msra.mxu0 %v13094_v58  ;;  %v6205_v29 = vsub.f32 %v13130_v32, %v14161_v17  ;;  %v14734_v17 = vld [vmem:[#allocation28_spill] sm:$0xff] }
 0x3ce   :  { %8086 = vmatprep.subr.mxu0 %v13101_v24 }
 0x3cf   :  { %8115 = vmatpush3.xpose.msra.mxu1 %v6073_v14  ;;  %v6087_v14 = vand.u32 4294901760, %v6086_v20  ;;  %v6206_v4 = vand.u32 4294901760, %v6205_v29  ;;  %v14727_v20 = vld [vmem:[#allocation8_spill] sm:$0xff]  ;;  %v14728_v29 = vld [vmem:[#allocation41_spill] sm:$0xff] }
 0x3d0   :  { %8116 = vmatprep.subr.mxu1 %v6192_v33  ;;  %v6093_v33 = vsub.f32 %v13138_v30, %v14160_v41  ;;  %v14733_v41 = vld [vmem:[#allocation27_spill] sm:$0xff] }
 0x3d1   :  { %8087 = vmatpush3.xpose.msra.mxu0 %v13114_v55 }
 0x3d2   :  { %8124 = vmatprep.subr.mxu0 %v12773_v61  ;;  %v6094_v52 = vand.u32 4294901760, %v6093_v33  ;;  %v14730_v33 = vld [vmem:[#allocation64_spill] sm:$0xff] }
 0x3d3   :  { %8117 = vmatpush3.xpose.msra.mxu1 %v6080_v28  ;;  %v14726_v28 = vld [vmem:[#allocation44_spill] sm:$0xff] }
 0x3d4   :  { %8118 = vmatprep.subr.mxu1 %v6199_v38  ;;  %8089 = vmatmul.mubr.f32.vlgmr.msra.gmra.mxu0 %v13082_v31  ;;  %v14725_v38 = vld [vmem:[#allocation68_spill] sm:$0xff]  ;;  %v14737_v31 = vld [vmem:[#allocation29_spill] sm:$0xff] }
 0x3d5   :  { %8125 = vmatpush3.xpose.msra.mxu0 %v12720_v50  ;;  %8156 = vmatprep.mubr.f32.mxu0 %v13007_v40 }
 0x3d6   :  { %8126 = vmatprep.subr.mxu0 %v12790_v16 }
 0x3d7   :  { %8119 = vmatpush3.xpose.msra.mxu1 %v6087_v14  ;;  %v14729_v14 = vld [vmem:[#allocation40_spill] sm:$0xff] }
 0x3d8   :  { %8120 = vmatprep.subr.mxu1 %v6206_v4  ;;  %v14731_v4 = vld [vmem:[#allocation16_spill] sm:$0xff] }
 0x3d9   :  { %8127 = vmatpush3.xpose.msra.mxu0 %v12761_v12 }
 0x3da   :  { %8128 = vmatprep.subr.mxu0 %v12785_v6 }
 0x3db   :  { %8121 = vmatpush3.xpose.msra.mxu1 %v6094_v52  ;;  %v14732_v52 = vld [vmem:[#allocation54_spill] sm:$0xff] }
 0x3dc   :  { %8158 = vmatprep.subr.mxu1 %v12753_v37 }
 0x3dd   :  { %8129 = vmatpush3.xpose.msra.mxu0 %v12776_v47 }
 0x3de   :  { %8123 = vmatmul.mubr.f32.vlgmr.msra.gmra.mxu1 %v14703_v19  ;;  %8130 = vmatprep.subr.mxu0 %v12829_v56 }
 0x3df   :  { %8159 = vmatpush3.xpose.msra.mxu1 %v12696_v27  ;;  %8190 = vmatprep.mubr.f32.mxu1 %v13051_v36 }
 0x3e0   :  { %8160 = vmatprep.subr.mxu1 %v12767_v10 }
 0x3e1   :  { %8131 = vmatpush3.xpose.msra.mxu0 %v12820_v59 }
 0x3e2   :  { %8132 = vmatprep.subr.mxu0 %v12837_v13 }
 0x3e3   :  { %8161 = vmatpush3.xpose.msra.mxu1 %v12740_v34 }
 0x3e4   :  { %8162 = vmatprep.subr.mxu1 %v12755_v11 }
 0x3e5   :  { %8133 = vmatpush3.xpose.msra.mxu0 %v12841_v1 }
 0x3e6   :  { %8134 = vmatprep.subr.mxu0 %v12872_v44 }
 0x3e7   :  { %8163 = vmatpush3.xpose.msra.mxu1 %v12736_v51 }
 0x3e8   :  { %8164 = vmatprep.subr.mxu1 %v12801_v39 }
 0x3e9   :  { %8135 = vmatpush3.xpose.msra.mxu0 %v12876_v46 }
 0x3ea   :  { %8136 = vmatprep.subr.mxu0 %v12886_v25 }
 0x3eb   :  { %8165 = vmatpush3.xpose.msra.mxu1 %v12795_v7 }
 0x3ec   :  { %8166 = vmatprep.subr.mxu1 %v12808_v2 }
 0x3ed   :  { %8137 = vmatpush3.xpose.msra.mxu0 %v12890_v9 }
 0x3ee   :  { %8138 = vmatprep.subr.mxu0 %v12938_v3 }
 0x3ef   :  { %8167 = vmatpush3.xpose.msra.mxu1 %v12730_v26 }
 0x3f0   :  { %8168 = vmatprep.subr.mxu1 %v12854_v23 }
 0x3f1   :  { %8139 = vmatpush3.xpose.msra.mxu0 %v12941_v57 }
 0x3f2   :  { %8140 = vmatprep.subr.mxu0 %v12947_v63 }
 0x3f3   :  { %8169 = vmatpush3.xpose.msra.mxu1 %v12733_v54 }
 0x3f4   :  { %8170 = vmatprep.subr.mxu1 %v12863_v53 }
 0x3f5   :  { %8141 = vmatpush3.xpose.msra.mxu0 %v12933_v0 }
 0x3f6   :  { %8142 = vmatprep.subr.mxu0 %v14725_v38 }
 0x3f7   :  { %8171 = vmatpush3.xpose.msra.mxu1 %v14726_v28 }
 0x3f8   :  { %8172 = vmatprep.subr.mxu1 %v14727_v20 }
 0x3f9   :  { %8143 = vmatpush3.xpose.msra.mxu0 %v14728_v29 }
 0x3fa   :  { %8144 = vmatprep.subr.mxu0 %v14729_v14 }
 0x3fb   :  { %8173 = vmatpush3.xpose.msra.mxu1 %v14730_v33 }
 0x3fc   :  { %8174 = vmatprep.subr.mxu1 %v14731_v4 }
 0x3fd   :  { %8145 = vmatpush3.xpose.msra.mxu0 %v13003_v15 }
 0x3fe   :  { %8146 = vmatprep.subr.mxu0 %v13028_v18 }
 0x3ff   :  { %8175 = vmatpush3.xpose.msra.mxu1 %v14732_v52 }
 0x400   :  { %8176 = vmatprep.subr.mxu1 %v14733_v41  ;;  %v14738_v41 = vld [vmem:[#allocation46_spill] sm:$0xff] }
 0x401   :  { %8147 = vmatpush3.xpose.msra.mxu0 %v13048_v43 }
 0x402   :  { %8148 = vmatprep.subr.mxu0 %v13059_v49 }
 0x403   :  { %8177 = vmatpush3.xpose.msra.mxu1 %v14734_v17 }
 0x404   :  { %8178 = vmatprep.subr.mxu1 %v14735_v42 }
 0x405   :  { %8149 = vmatpush3.xpose.msra.mxu0 %v13076_v45  ;;  %v13217_v45 = vpop.f32.mrf.mxu0 }
 0x406   :  { %8150 = vmatprep.subr.mxu0 %v13090_v21  ;;  %14739 = vst [vmem:[#allocation57_spill] sm:$0xff] %v13217_v45  ;;  %v14740_v21 = vld [vmem:[#allocation35_spill] sm:$0xff]  ;;  %v13231_v45 = vpop.f32.mrf.mxu1 }
 0x407   :  { %8179 = vmatpush3.xpose.msra.mxu1 %v14736_v60 }
 0x408   :  { %8180 = vmatprep.subr.mxu1 %v14737_v31 }
 0x409   :  { %8151 = vmatpush3.xpose.msra.mxu0 %v13104_v35  ;;  %v14741_v35 = vand.u32 4294901760, %v12773_v61 }
 0x40a   :  { %8152 = vmatprep.subr.mxu0 %v13112_v5 }
 0x40b   :  { %8181 = vmatpush3.xpose.msra.mxu1 %v14738_v41  ;;  %v13224_v41 = vpop.f32.mrf.mxu0 }
 0x40c   :  { %8182 = vmatprep.subr.mxu1 %v13020_v48  ;;  %v14742_v48 = vld [vmem:[#allocation53_spill] sm:$0xff] }
 0x40d   :  { %8153 = vmatpush3.xpose.msra.mxu0 %v13122_v62  ;;  %v13236_v61 = vpop.f32.mrf.mxu0 }
 0x40e   :  { %8154 = vmatprep.subr.mxu0 %v13130_v32  ;;  %v14743_v32 = vand.u32 4294901760, %v12720_v50  ;;  %v14746_v50 = vand.u32 4294901760, %v12785_v6 }
 0x40f   :  { %8183 = vmatpush3.xpose.msra.mxu1 %v13034_v22 }
 0x410   :  { %8184 = vmatprep.subr.mxu1 %v14740_v21 }
 0x411   :  { %8155 = vmatpush3.xpose.msra.mxu0 %v13138_v30  ;;  %v14744_v30 = vand.u32 4294901760, %v12790_v16  ;;  %v14747_v16 = vand.u32 4294901760, %v12776_v47 }
 0x412   :  { %8192 = vmatprep.subr.mxu0 %v14741_v35  ;;  %v14745_v35 = vand.u32 4294901760, %v12761_v12  ;;  %v14748_v12 = vand.u32 4294901760, %v12829_v56 }
 0x413   :  { %8185 = vmatpush3.xpose.msra.mxu1 %v13066_v8 }
 0x414   :  { %8186 = vmatprep.subr.mxu1 %v14742_v48  ;;  %8157 = vmatmul.mubr.f32.vlgmr.msra.gmra.mxu0 %v13007_v40  ;;  %v13241_v40 = vpop.f32.mrf.mxu1 }
 0x415   :  { %8193 = vmatpush3.xpose.msra.mxu0 %v14743_v32  ;;  %8224 = vmatprep.mubr.f32.mxu0 %v14703_v19  ;;  %v13246_v32 = vpop.f32.mrf.mxu0 }
 0x416   :  { %8194 = vmatprep.subr.mxu0 %v14744_v30  ;;  %v13251_v30 = vpop.f32.mrf.mxu1 }
 0x417   :  { %8187 = vmatpush3.xpose.msra.mxu1 %v13094_v58  ;;  %v13258_v6 = vpop.f32.mrf.mxu0 }
 0x418   :  { %8188 = vmatprep.subr.mxu1 %v13101_v24  ;;  %v13263_v47 = vpop.f32.mrf.mxu1 }
 0x419   :  { %8195 = vmatpush3.xpose.msra.mxu0 %v14745_v35  ;;  %v14750_v35 = vand.u32 4294901760, %v12837_v13  ;;  %v13268_v56 = vpop.f32.mrf.mxu0  ;;  %v14753_v13 = vand.u32 4294901760, %v12876_v46  ;;  %v14757_v46 = vand.u32 4294901760, %v12941_v57  ;;  %v14761_v57 = vand.u32 4294901760, %v14728_v29 }
 0x41a   :  { %8196 = vmatprep.subr.mxu0 %v14746_v50  ;;  %v13273_v50 = vpop.f32.mrf.mxu1 }
 0x41b   :  { %8189 = vmatpush3.xpose.msra.mxu1 %v13114_v55 }
 0x41c   :  { %8226 = vmatprep.subr.mxu1 %v12753_v37  ;;  %v14749_v37 = vand.u32 4294901760, %v12820_v59  ;;  %v9251_v59 = vpop.f32.mrf.mxu0 }
 0x41d   :  { %8197 = vmatpush3.xpose.msra.mxu0 %v14747_v16  ;;  %v14756_v16 = vand.u32 4294901760, %v12938_v3  ;;  %v14760_v3 = vand.u32 4294901760, %v14725_v38  ;;  %v14764_v38 = vand.u32 4294901760, %v13003_v15  ;;  %v14770_v15 = vld [vmem:[#allocation34_spill] sm:$0xff] }
 0x41e   :  { %8191 = vmatmul.mubr.f32.vlgmr.msra.gmra.mxu1 %v13051_v36  ;;  %8198 = vmatprep.subr.mxu0 %v14748_v12 }
 0x41f   :  { %8227 = vmatpush3.xpose.msra.mxu1 %v12696_v27  ;;  %8258 = vmatprep.mubr.f32.mxu1 %v14703_v19  ;;  %v14751_v27 = vand.u32 4294901760, %v12841_v1  ;;  %v5178_v1 = vpop.f32.mrf.mxu0 }
 0x420   :  { %8228 = vmatprep.subr.mxu1 %v12767_v10  ;;  %v14752_v10 = vand.u32 4294901760, %v12872_v44  ;;  %v14755_v44 = vand.u32 4294901760, %v12890_v9  ;;  %v14759_v9 = vand.u32 4294901760, %v12933_v0 }
 0x421   :  { %8199 = vmatpush3.xpose.msra.mxu0 %v14749_v37  ;;  %v14766_v37 = vld [vmem:[#allocation66_spill] sm:$0xff] }
 0x422   :  { %8200 = vmatprep.subr.mxu0 %v14750_v35 }
 0x423   :  { %8229 = vmatpush3.xpose.msra.mxu1 %v12740_v34  ;;  %v13281_v34 = vpop.f32.mrf.mxu1 }
 0x424   :  { %8230 = vmatprep.subr.mxu1 %v12755_v11  ;;  %v14754_v11 = vand.u32 4294901760, %v12886_v25 }
 0x425   :  { %8201 = vmatpush3.xpose.msra.mxu0 %v14751_v27  ;;  %v14768_v27 = vand.u32 4294901760, %v13048_v43 }
 0x426   :  { %8202 = vmatprep.subr.mxu0 %v14752_v10 }
 0x427   :  { %8231 = vmatpush3.xpose.msra.mxu1 %v12736_v51  ;;  %v9339_v51 = vpop.f32.mrf.mxu1 }
 0x428   :  { %8232 = vmatprep.subr.mxu1 %v12801_v39  ;;  %v9254_v39 = vpop.f32.mrf.mxu0 }
 0x429   :  { %8203 = vmatpush3.xpose.msra.mxu0 %v14753_v13  ;;  %v13295_v25 = vpop.f32.mrf.mxu1  ;;  %v5197_v10 = vadd.f32 %v9254_v39, %v14770_v15  ;;  %v14776_v39 = vld [vmem:[#allocation19_spill] sm:$0xff] }
 0x42a   :  { %8204 = vmatprep.subr.mxu0 %v14754_v11 }
 0x42b   :  { %8233 = vmatpush3.xpose.msra.mxu1 %v12795_v7  ;;  %v14758_v7 = vand.u32 4294901760, %v12947_v63 }
 0x42c   :  { %8234 = vmatprep.subr.mxu1 %v12808_v2  ;;  %v5190_v2 = vpop.f32.mrf.mxu0 }
 0x42d   :  { %8205 = vmatpush3.xpose.msra.mxu0 %v14755_v44  ;;  %v14773_v44 = vld [vmem:[#allocation21_spill] sm:$0xff] }
 0x42e   :  { %8206 = vmatprep.subr.mxu0 %v14756_v16  ;;  %v14774_v16 = vand.u32 4294901760, %v14773_v44 }
 0x42f   :  { %8235 = vmatpush3.xpose.msra.mxu1 %v12730_v26  ;;  %v9342_v26 = vpop.f32.mrf.mxu1 }
 0x430   :  { %8236 = vmatprep.subr.mxu1 %v12854_v23  ;;  %v9257_v23 = vpop.f32.mrf.mxu0  ;;  %v5558_v43 = vadd.f32 %v9342_v26, %v5197_v10 }
 0x431   :  { %8207 = vmatpush3.xpose.msra.mxu0 %v14757_v46  ;;  %v5551_v63 = vpop.f32.mrf.mxu1  ;;  %v14775_v46 = vld [vmem:[#allocation17_spill] sm:$0xff] }
 0x432   :  { %8208 = vmatprep.subr.mxu0 %v14758_v7  ;;  %v5202_v0 = vpop.f32.mrf.mxu0  ;;  %v5191_v7 = vadd.f32 %v5190_v2, %v14775_v46  ;;  %v5666_v26 = vmul.f32 0.01, %v5558_v43  ;;  %vm5618_vm9 = vcmp.gt.f32.partialorder %v5558_v43, 0.0 }
 0x433   :  { %8237 = vmatpush3.xpose.msra.mxu1 %v12733_v54  ;;  %v14762_v54 = vand.u32 4294901760, %v14729_v14  ;;  %v5203_v35 = vadd.f32 %v5202_v0, %v14766_v37  ;;  %v14767_v14 = vld [vmem:[#allocation27_spill] sm:$0xff] }
 0x434   :  { %8238 = vmatprep.subr.mxu1 %v12863_v53  ;;  %v14763_v53 = vld [vmem:[#allocation22_spill] sm:$0xff]  ;;  %v5714_v37 = vsel %vm5618_vm9, %v5558_v43, %v5666_v26 }
 0x435   :  { %8209 = vmatpush3.xpose.msra.mxu0 %v14759_v9  ;;  %v5209_v12 = vadd.f32 %v9257_v23, %v14763_v53  ;;  %v14780_v53 = vld [vmem:[#allocation46_spill] sm:$0xff] }
 0x436   :  { %8210 = vmatprep.subr.mxu0 %v14760_v3  ;;  %v5185_v3 = vadd.f32 %v9251_v59, %v14776_v39  ;;  %v14782_v59 = vld [vmem:[#allocation49_spill] sm:$0xff] }
 0x437   :  { %8239 = vmatpush3.xpose.msra.mxu1 %v14726_v28  ;;  %v9345_v28 = vpop.f32.mrf.mxu1 }
 0x438   :  { %8240 = vmatprep.subr.mxu1 %v14727_v20  ;;  %v14765_v20 = vand.u32 4294901760, %v13028_v18  ;;  %v5570_v29 = vadd.f32 %v9345_v28, %v5209_v12  ;;  %v14771_v18 = vld [vmem:[#allocation14_spill] sm:$0xff]  ;;  %v5546_v12 = vadd.f32 %v9339_v51, %v5185_v3 }
 0x439   :  { %8211 = vmatpush3.xpose.msra.mxu0 %v14761_v57  ;;  %v14779_v57 = vand.u32 4294901760, %v13112_v5  ;;  %v14784_v5 = vld [vmem:[#allocation55_spill] sm:$0xff] }
 0x43a   :  { %8212 = vmatprep.subr.mxu0 %v14762_v54  ;;  %v5668_v13 = vmul.f32 0.01, %v5570_v29  ;;  %vm5620_vm7 = vcmp.gt.f32.partialorder %v5570_v29, 0.0  ;;  %v5552_v54 = vadd.f32 %v5551_v63, %v5191_v7  ;;  %v14786_v63 = vld [vmem:[#allocation31_spill] sm:$0xff]  ;;  %vm5616_vm11 = vcmp.gt.f32.partialorder %v5546_v12, 0.0 }
 0x43b   :  { %8241 = vmatpush3.xpose.msra.mxu1 %v14730_v33  ;;  %v5563_v33 = vpop.f32.mrf.mxu1 }
 0x43c   :  { %8242 = vmatprep.subr.mxu1 %v14731_v4  ;;  %v14769_v4 = vand.u32 4294901760, %v13059_v49  ;;  %v5564_v11 = vadd.f32 %v5563_v33, %v5203_v35  ;;  %v5716_v49 = vsel %vm5620_vm7, %v5570_v29, %v5668_v13  ;;  %v5173_v29 = vadd.f32 %v13258_v6, %v14786_v63 }
 0x43d   :  { %8213 = vmatpush3.xpose.msra.mxu0 %v14764_v38  ;;  %v5874_v23 = vsel %vm5728_vm1, %v5716_v49, 0  ;;  %v5665_v51 = vmul.f32 0.01, %v5552_v54  ;;  %vm5617_vm10 = vcmp.gt.f32.partialorder %v5552_v54, 0.0  ;;  %v5868_v6 = vsel %vm5728_vm1, %v5714_v37, 0  ;;  %v14791_v49 = vld [vmem:[#allocation12_spill] sm:$0xff] }
 0x43e   :  { %8214 = vmatprep.subr.mxu0 %v14765_v20  ;;  %v5667_v9 = vmul.f32 0.01, %v5564_v11  ;;  %vm5619_vm8 = vcmp.gt.f32.partialorder %v5564_v11, 0.0  ;;  %v13346_v38 = vand.u32 4294901760, %v5874_v23  ;;  %v14785_v20 = vand.u32 4294901760, %v14784_v5  ;;  %v14794_v5 = vld [vmem:[#allocation6_spill] sm:$0xff] }
 0x43f   :  { %8243 = vmatpush3.xpose.msra.mxu1 %v14732_v52  ;;  %v14772_v52 = vand.u32 4294901760, %v14771_v18 }
 0x440   :  { %8244 = vmatprep.subr.mxu1 %v14767_v14  ;;  %v5715_v2 = vsel %vm5619_vm8, %v5564_v11, %v5667_v9  ;;  %v13361_v33 = vsub.f32 %v5874_v23, %v13346_v38  ;;  %v13372_v11 = vand.u32 4294901760, %v5868_v6 }
 0x441   :  { %8215 = vmatpush3.xpose.msra.mxu0 %v14768_v27  ;;  %v5871_v28 = vsel %vm5728_vm1, %v5715_v2, 0 }
 0x442   :  { %8216 = vmatprep.subr.mxu0 %v14769_v4  ;;  %v13358_v27 = vand.u32 4294901760, %v5871_v28  ;;  %v9585_v4 = vmov 0.0   ;;  %v6825_v18 = vand.u32 4294901760, %v13361_v33 }
 0x443   :  { %8245 = vmatpush3.xpose.msra.mxu1 %v14734_v17  ;;  %v14777_v17 = vld [vmem:[#allocation18_spill] sm:$0xff] }
 0x444   :  { %8246 = vmatprep.subr.mxu1 %v14735_v42  ;;  %v14778_v42 = vand.u32 4294901760, %v14777_v17  ;;  %v6826_v46 = vsub.f32 %v13361_v33, %v6825_v18 }
 0x445   :  { %8217 = vmatpush3.xpose.msra.mxu0 %v14772_v52 }
 0x446   :  { %8218 = vmatprep.subr.mxu0 %v14774_v16 }
 0x447   :  { %8247 = vmatpush3.xpose.msra.mxu1 %v14736_v60  ;;  %v14781_v60 = vld [vmem:[#allocation60_spill] sm:$0xff] }
 0x448   :  { %8248 = vmatprep.subr.mxu1 %v14737_v31  ;;  %v5179_v0 = vadd.f32 %v5178_v1, %v14781_v60  ;;  %v14783_v31 = vand.u32 4294901760, %v13122_v62  ;;  %v5664_v1 = vmul.f32 0.01, %v5546_v12  ;;  %v14787_v62 = vld [vmem:[#allocation24_spill] sm:$0xff] }
 0x449   :  { %8219 = vmatpush3.xpose.msra.mxu0 %v14778_v42  ;;  %v14788_v14 = vand.u32 4294901760, %v14787_v62  ;;  %v6827_v42 = vand.u32 4294901760, %v6826_v46  ;;  %v14795_v46 = vld [vmem:[#allocation39_spill] sm:$0xff] }
 0x44a   :  { %8220 = vmatprep.subr.mxu0 %v14779_v57  ;;  %v5540_v35 = vadd.f32 %v13295_v25, %v5179_v0  ;;  %v5713_v25 = vsel %vm5617_vm10, %v5552_v54, %v5665_v51  ;;  %v5712_v10 = vsel %vm5616_vm11, %v5546_v12, %v5664_v1  ;;  %v14793_v57 = vld [vmem:[#allocation57_spill] sm:$0xff]  ;;  %vm5608_vm5 = vcmp.gt.f32.partialorder %v14795_v46, 0.0 }
 0x44b   :  { %8249 = vmatpush3.xpose.msra.mxu1 %v14780_v53  ;;  %v5862_v16 = vsel %vm5728_vm1, %v5712_v10, 0 }
 0x44c   :  { %8250 = vmatprep.subr.mxu1 %v14782_v59  ;;  %v5663_v13 = vmul.f32 0.01, %v5540_v35  ;;  %vm5615_vm12 = vcmp.gt.f32.partialorder %v5540_v35, 0.0  ;;  %v13405_v17 = vand.u32 4294901760, %v5862_v16 }
 0x44d   :  { %8221 = vmatpush3.xpose.msra.mxu0 %v14783_v31 }
 0x44e   :  { %8222 = vmatprep.subr.mxu0 %v14785_v20  ;;  %v5711_v43 = vsel %vm5615_vm12, %v5540_v35, %v5663_v13  ;;  %v5143_v20 = vadd.f32 %v13224_v41, %v14794_v5 }
 0x44f   :  { %8251 = vmatpush3.xpose.msra.mxu1 %v13034_v22  ;;  %v5534_v22 = vadd.f32 %v13273_v50, %v5173_v29  ;;  %v13376_v50 = vsub.f32 %v5871_v28, %v13358_v27  ;;  %v5859_v3 = vsel %vm5728_vm1, %v5711_v43, 0  ;;  %v13433_v28 = vsub.f32 %v5862_v16, %v13405_v17 }
 0x450   :  { %8252 = vmatprep.subr.mxu1 %v14740_v21  ;;  %v14789_v21 = vld [vmem:[#allocation13_spill] sm:$0xff]  ;;  %v13425_v60 = vand.u32 4294901760, %v5859_v3 }
 0x451   :  { %8223 = vmatpush3.xpose.msra.mxu0 %v14788_v14  ;;  %v5167_v15 = vadd.f32 %v13268_v56, %v14789_v21  ;;  %v5662_v52 = vmul.f32 0.01, %v5534_v22  ;;  %vm5614_vm14 = vcmp.gt.f32.partialorder %v5534_v22, 0.0  ;;  %v6853_v41 = vand.u32 4294901760, %v13433_v28 }
 0x452   :  { %9346 = vmatprep.subr.mxu0 %v9585_v4  ;;  %v13450_v35 = vsub.f32 %v5859_v3, %v13425_v60  ;;  %v5504_v14 = vadd.f32 %v13241_v40, %v5143_v20 }
 0x453   :  { %8253 = vmatpush3.xpose.msra.mxu1 %v13066_v8  ;;  %v5865_v8 = vsel %vm5728_vm1, %v5713_v25, 0  ;;  %v5528_v44 = vadd.f32 %v13281_v34, %v5167_v15  ;;  %v5710_v9 = vsel %vm5614_vm14, %v5534_v22, %v5662_v52  ;;  %v6854_v15 = vsub.f32 %v13433_v28, %v6853_v41 }
 0x454   :  { %8254 = vmatprep.subr.mxu1 %v14742_v48  ;;  %8225 = vmatmul.mubr.f32.vlgmr.msra.gmra.mxu0 %v14703_v19  ;;  %v14790_v48 = vld [vmem:[#allocation15_spill] sm:$0xff]  ;;  %v13392_v7 = vand.u32 4294901760, %v5865_v8  ;;  %v5856_v53 = vsel %vm5728_vm1, %v5710_v9, 0  ;;  %v6860_v10 = vand.u32 4294901760, %v13450_v35  ;;  %vm5609_vm4 = vcmp.gt.f32.partialorder %v5504_v14, 0.0 }
 0x455   :  { %9347 = vmatpush3.xpose.msra.mxu0 %v13346_v38  ;;  %9378 = vmatprep.mubr.msk.f32.mxu0 %vm9586_vm13, %v9585_v4  ;;  %v5161_v56 = vadd.f32 %v13236_v61, %v14790_v48  ;;  %v6832_v61 = vand.u32 4294901760, %v13376_v50  ;;  %vm5613_vm15 = vcmp.gt.f32.partialorder %v5528_v44, 0.0  ;;  %v5661_v39 = vmul.f32 0.01, %v5528_v44 }
 0x456   :  { %9348 = vmatprep.subr.mxu0 %v9585_v4  ;;  %v13413_v23 = vsub.f32 %v5865_v8, %v13392_v7  ;;  %v13442_v51 = vand.u32 4294901760, %v5856_v53  ;;  %v5657_v8 = vmul.f32 0.01, %v5504_v14  ;;  %v6855_v52 = vand.u32 4294901760, %v6854_v15 }
 0x457   :  { %8255 = vmatpush3.xpose.msra.mxu1 %v13094_v58  ;;  %v13396_v58 = vsub.f32 %v5868_v6, %v13372_v11  ;;  %v5522_v34 = vadd.f32 %v13251_v30, %v5161_v56  ;;  %v6833_v30 = vsub.f32 %v13376_v50, %v6832_v61  ;;  %v5709_v12 = vsel %vm5613_vm15, %v5528_v44, %v5661_v39 }
 0x458   :  { %8256 = vmatprep.subr.mxu1 %v13101_v24  ;;  %v5155_v24 = vadd.f32 %v13246_v32, %v14791_v49  ;;  %v6846_v31 = vand.u32 4294901760, %v13413_v23  ;;  %v5853_v37 = vsel %vm5728_vm1, %v5709_v12, 0  ;;  %v13465_v13 = vsub.f32 %v5856_v53, %v13442_v51 }
 0x459   :  { %9349 = vmatpush3.xpose.msra.mxu0 %v13358_v27  ;;  %v6839_v32 = vand.u32 4294901760, %v13396_v58  ;;  %vm5612_vm0 = vcmp.gt.f32.partialorder %v5522_v34, 0.0  ;;  %v5660_v54 = vmul.f32 0.01, %v5522_v34  ;;  %v6834_v0 = vand.u32 4294901760, %v6833_v30 }
 0x45a   :  { %9350 = vmatprep.subr.mxu0 %v9585_v4  ;;  %v5516_v2 = vadd.f32 %v13263_v47, %v5155_v24  ;;  %v13457_v25 = vand.u32 4294901760, %v5853_v37  ;;  %v6861_v44 = vsub.f32 %v13450_v35, %v6860_v10  ;;  %v6867_v16 = vand.u32 4294901760, %v13465_v13 }
 0x45b   :  { %8257 = vmatpush3.xpose.msra.mxu1 %v13114_v55  ;;  %v14792_v55 = vld [vmem:[#allocation70_spill] sm:$0xff]  ;;  %v6840_v59 = vsub.f32 %v13396_v58, %v6839_v32  ;;  %v5708_v63 = vsel %vm5612_vm0, %v5522_v34, %v5660_v54  ;;  %v5656_v34 = vmul.f32 0.01, %v14795_v46  ;;  %v5705_v24 = vsel %vm5609_vm4, %v5504_v14, %v5657_v8 }
 0x45c   :  { %9381 = vmatprep.subr.mxu1 %v9585_v4  ;;  %v5149_v26 = vadd.f32 %v14793_v57, %v14792_v55  ;;  %vm5611_vm2 = vcmp.gt.f32.partialorder %v5516_v2, 0.0  ;;  %v5659_v29 = vmul.f32 0.01, %v5516_v2  ;;  %v5850_v6 = vsel %vm5728_vm1, %v5708_v63, 0  ;;  %v14796_v57 = vld [vmem:[#allocation58_spill] sm:$0xff] }
 0x45d   :  { %9351 = vmatpush3.xpose.msra.mxu0 %v13372_v11  ;;  %v6841_v1 = vand.u32 4294901760, %v6840_v59  ;;  %v13470_v56 = vand.u32 4294901760, %v5850_v6  ;;  %v13478_v43 = vsub.f32 %v5853_v37, %v13457_v25  ;;  %v6862_v39 = vand.u32 4294901760, %v6861_v44 }
 0x45e   :  { %8259 = vmatmul.mubr.f32.vlgmr.msra.gmra.mxu1 %v14703_v19  ;;  %9352 = vmatprep.subr.mxu0 %v9585_v4  ;;  %v5510_v47 = vadd.f32 %v13231_v45, %v5149_v26  ;;  %v6847_v45 = vsub.f32 %v13413_v23, %v6846_v31  ;;  %v5707_v22 = vsel %vm5611_vm2, %v5516_v2, %v5659_v29  ;;  %vm5607_vm6 = vcmp.gt.f32.partialorder %v14796_v57, 0.0 }
 0x45f   :  { %9382 = vmatpush3.xpose.msra.mxu1 %v6827_v42  ;;  %9413 = vmatprep.mubr.msk.f32.mxu1 %vm9586_vm13, %v9585_v4  ;;  %v5847_v48 = vsel %vm5728_vm1, %v5707_v22, 0  ;;  %v6868_v3 = vsub.f32 %v13465_v13, %v6867_v16  ;;  %v6874_v42 = vand.u32 4294901760, %v13478_v43  ;;  %v13493_v30 = vsub.f32 %v5850_v6, %v13470_v56  ;;  %v14798_v6 = vld [vmem:[#allocation50_spill] sm:$0xff] }
 0x460   :  { %9383 = vmatprep.subr.mxu1 %v9585_v4  ;;  %vm5610_vm3 = vcmp.gt.f32.partialorder %v5510_v47, 0.0  ;;  %v5658_v62 = vmul.f32 0.01, %v5510_v47  ;;  %v6848_v21 = vand.u32 4294901760, %v6847_v45  ;;  %v13485_v9 = vand.u32 4294901760, %v5847_v48 }
 0x461   :  { %9353 = vmatpush3.xpose.msra.mxu0 %v13392_v7  ;;  %v5704_v55 = vsel %vm5608_vm5, %v14795_v46, %v5656_v34  ;;  %v5655_v26 = vmul.f32 0.01, %v14796_v57  ;;  %v5841_v54 = vsel %vm5728_vm1, %v5705_v24, 0  ;;  %v6869_v53 = vand.u32 4294901760, %v6868_v3 }
 0x462   :  { %9354 = vmatprep.subr.mxu0 %v9585_v4  ;;  %v5706_v40 = vsel %vm5610_vm3, %v5510_v47, %v5658_v62  ;;  %v6875_v12 = vsub.f32 %v13478_v43, %v6874_v42  ;;  %v13509_v59 = vsub.f32 %v5847_v48, %v13485_v9  ;;  %v14797_v47 = vld [vmem:[#allocation36_spill] sm:$0xff]  ;;  %v5838_v20 = vsel %vm5728_vm1, %v5704_v55, 0 }
 0x463   :  { %9384 = vmatpush3.xpose.msra.mxu1 %v6834_v0  ;;  %v5844_v49 = vsel %vm5728_vm1, %v5706_v40, 0  ;;  %v6881_v0 = vand.u32 4294901760, %v13493_v30  ;;  %v5654_v5 = vmul.f32 0.01, %v14797_v47  ;;  %vm5606_vm7 = vcmp.gt.f32.partialorder %v14797_v47, 0.0 }
 0x464   :  { %9385 = vmatprep.subr.mxu1 %v9585_v4  ;;  %v13501_v2 = vand.u32 4294901760, %v5844_v49  ;;  %v5703_v63 = vsel %vm5607_vm6, %v14796_v57, %v5655_v26  ;;  %v13517_v29 = vand.u32 4294901760, %v5841_v54  ;;  %v6876_v37 = vand.u32 4294901760, %v6875_v12 }
 0x465   :  { %9355 = vmatpush3.xpose.msra.mxu0 %v13405_v17  ;;  %v6888_v45 = vand.u32 4294901760, %v13509_v59  ;;  %v5702_v14 = vsel %vm5606_vm7, %v14797_v47, %v5654_v5  ;;  %vm5605_vm8 = vcmp.gt.f32.partialorder %v14798_v6, 0.0  ;;  %v5653_v22 = vmul.f32 0.01, %v14798_v6 }
 0x466   :  { %9356 = vmatprep.subr.mxu0 %v9585_v4  ;;  %v13525_v62 = vsub.f32 %v5844_v49, %v13501_v2  ;;  %v13533_v15 = vand.u32 4294901760, %v5838_v20  ;;  %v5832_v44 = vsel %vm5728_vm1, %v5702_v14, 0 }
 0x467   :  { %9386 = vmatpush3.xpose.msra.mxu1 %v6841_v1  ;;  %v6882_v1 = vsub.f32 %v13493_v30, %v6881_v0  ;;  %v6889_v8 = vsub.f32 %v13509_v59, %v6888_v45  ;;  %v5701_v46 = vsel %vm5605_vm8, %v14798_v6, %v5653_v22  ;;  %v13560_v57 = vand.u32 4294901760, %v5832_v44 }
 0x468   :  { %9387 = vmatprep.subr.mxu1 %v9585_v4  ;;  %v6895_v48 = vand.u32 4294901760, %v13525_v62  ;;  %v13555_v3 = vsub.f32 %v5838_v20, %v13533_v15  ;;  %v5829_v55 = vsel %vm5728_vm1, %v5701_v46, 0 }
 0x469   :  { %9357 = vmatpush3.xpose.msra.mxu0 %v13425_v60  ;;  %v6883_v40 = vand.u32 4294901760, %v6882_v1  ;;  %v6890_v49 = vand.u32 4294901760, %v6889_v8  ;;  %v13572_v47 = vand.u32 4294901760, %v5829_v55  ;;  %v5724_v1 = vlaneseq }
 0x46a   :  { %9358 = vmatprep.subr.mxu0 %v9585_v4  ;;  %v6896_v24 = vsub.f32 %v13525_v62, %v6895_v48 }
 0x46b   :  { %9388 = vmatpush3.xpose.msra.mxu1 %v6848_v21  ;;  %v5835_v21 = vsel %vm5728_vm1, %v5703_v63, 0  ;;  %vm7401_vm1 = vcmp.lt.s32.totalorder %v5724_v1, 384 }
 0x46c   :  { %9389 = vmatprep.subr.mxu1 %v9585_v4  ;;  %v13547_v34 = vand.u32 4294901760, %v5835_v21  ;;  %v6897_v26 = vand.u32 4294901760, %v6896_v24  ;;  %v14799_v24 = vld [vmem:[#allocation10_spill] sm:$0xff] }
 0x46d   :  { %9359 = vmatpush3.xpose.msra.mxu0 %v13442_v51 }
 0x46e   :  { %9360 = vmatprep.subr.mxu0 %v9585_v4  ;;  %v13568_v12 = vsub.f32 %v5835_v21, %v13547_v34  ;;  %v13590_v21 = vsub.f32 %v5829_v55, %v13572_v47  ;;  %v5722_v55 = vpop.permute.xlu0 %5721 }
 0x46f   :  { %9390 = vmatpush3.xpose.msra.mxu1 %v6855_v52  ;;  %v13541_v52 = vsub.f32 %v5841_v54, %v13517_v29 }
 0x470   :  { %9391 = vmatprep.subr.mxu1 %v9585_v4  ;;  %v6916_v63 = vand.u32 4294901760, %v13568_v12  ;;  %v6930_v46 = vand.u32 4294901760, %v13590_v21 }
 0x471   :  { %9361 = vmatpush3.xpose.msra.mxu0 %v13457_v25 }
 0x472   :  { %9362 = vmatprep.subr.mxu0 %v9585_v4  ;;  %v6917_v6 = vsub.f32 %v13568_v12, %v6916_v63 }
 0x473   :  { %9392 = vmatpush3.xpose.msra.mxu1 %v6862_v39  ;;  %v6902_v39 = vand.u32 4294901760, %v13541_v52 }
 0x474   :  { %9393 = vmatprep.subr.mxu1 %v9585_v4  ;;  %v6918_v8 = vand.u32 4294901760, %v6917_v6 }
 0x475   :  { %9363 = vmatpush3.xpose.msra.mxu0 %v13470_v56  ;;  %v6903_v54 = vsub.f32 %v13541_v52, %v6902_v39 }
 0x476   :  { %9364 = vmatprep.subr.mxu0 %v9585_v4 }
 0x477   :  { %9394 = vmatpush3.xpose.msra.mxu1 %v6869_v53  ;;  %v6909_v53 = vand.u32 4294901760, %v13555_v3  ;;  %v6904_v5 = vand.u32 4294901760, %v6903_v54  ;;  %v6931_v54 = vsub.f32 %v13590_v21, %v6930_v46 }
 0x478   :  { %9395 = vmatprep.subr.mxu1 %v9585_v4 }
 0x479   :  { %9365 = vmatpush3.xpose.msra.mxu0 %v13485_v9  ;;  %v6910_v20 = vsub.f32 %v13555_v3, %v6909_v53 }
 0x47a   :  { %9366 = vmatprep.subr.mxu0 %v9585_v4 }
 0x47b   :  { %9396 = vmatpush3.xpose.msra.mxu1 %v6876_v37  ;;  %v13580_v37 = vsub.f32 %v5832_v44, %v13560_v57  ;;  %v6911_v14 = vand.u32 4294901760, %v6910_v20 }
 0x47c   :  { %9397 = vmatprep.subr.mxu1 %v9585_v4 }
 0x47d   :  { %9367 = vmatpush3.xpose.msra.mxu0 %v13501_v2  ;;  %v6923_v22 = vand.u32 4294901760, %v13580_v37 }
 0x47e   :  { %9368 = vmatprep.subr.mxu0 %v9585_v4 }
 0x47f   :  { %9398 = vmatpush3.xpose.msra.mxu1 %v6883_v40  ;;  %v13594_v40 = vshrl.u32 %v5724_v1, 7  ;;  %v6924_v44 = vsub.f32 %v13580_v37, %v6923_v22 }
 0x480   :  { %9399 = vmatprep.subr.mxu1 %v9585_v4 }
 0x481   :  { %9369 = vmatpush3.xpose.msra.mxu0 %v13517_v29 }
 0x482   :  { %9370 = vmatprep.subr.mxu0 %v9585_v4 }
 0x483   :  { %9400 = vmatpush3.xpose.msra.mxu1 %v6890_v49  ;;  %v5726_v49 = vsub.s32 0, %v13594_v40 }
 0x484   :  { %9401 = vmatprep.subr.mxu1 %v9585_v4 }
 0x485   :  { %9371 = vmatpush3.xpose.msra.mxu0 %v13533_v15  ;;  %v13613_v20 = vrot.slane %v5722_v55, %v5726_v49 }
 0x486   :  { %9372 = vmatprep.subr.mxu0 %v9585_v4 }
 0x487   :  { %9402 = vmatpush3.xpose.msra.mxu1 %v6897_v26  ;;  %v6925_v26 = vand.u32 4294901760, %v6924_v44 }
 0x488   :  { %9403 = vmatprep.subr.mxu1 %v9585_v4 }
 0x489   :  { %9373 = vmatpush3.xpose.msra.mxu0 %v13547_v34 }
 0x48a   :  { %9374 = vmatprep.subr.mxu0 %v9585_v4 }
 0x48b   :  { %9404 = vmatpush3.xpose.msra.mxu1 %v6904_v5 }
 0x48c   :  { %9405 = vmatprep.subr.mxu1 %v9585_v4 }
 0x48d   :  { %9375 = vmatpush3.xpose.msra.mxu0 %v13560_v57 }
 0x48e   :  { %9376 = vmatprep.subr.mxu0 %v9585_v4 }
 0x48f   :  { %9406 = vmatpush3.xpose.msra.mxu1 %v6911_v14  ;;  %v6932_v14 = vand.u32 4294901760, %v6931_v54 }
 0x490   :  { %9407 = vmatprep.subr.mxu1 %v9585_v4 }
 0x491   :  { %9377 = vmatpush3.xpose.msra.mxu0 %v13572_v47 }
 0x492   :  { %9416 = vmatprep.subr.mxu0 %v9585_v4 }
 0x493   :  { %9408 = vmatpush3.xpose.msra.mxu1 %v6918_v8 }
 0x494   :  { %9409 = vmatprep.subr.mxu1 %v9585_v4  ;;  %9379 = vmatmul.mubr.f32.vlgmr.msra.gmra.mxu0 %v14799_v24  ;;  %v5979_v5 = vpop.f32.mrf.mxu0 }
 0x495   :  { %9417 = vmatpush3.xpose.msra.mxu0 %v13361_v33  ;;  %9448 = vmatprep.mubr.msk.f32.mxu0 %vm9586_vm13, %v9585_v4  ;;  %v5980_v8 = vadd.f32 %v5979_v5, %v13613_v20  ;;  %v14800_v5 = vld [vmem:[#allocation43_spill] sm:$0xff] }
 0x496   :  { %9418 = vmatprep.subr.mxu0 %v9585_v4  ;;  %v5981_v6 = vpop.f32.mrf.mxu0 }
 0x497   :  { %9410 = vmatpush3.xpose.msra.mxu1 %v6925_v26  ;;  %v5982_v44 = vadd.f32 %v5981_v6, %v13613_v20 }
 0x498   :  { %9411 = vmatprep.subr.mxu1 %v9585_v4 }
 0x499   :  { %9419 = vmatpush3.xpose.msra.mxu0 %v13376_v50 }
 0x49a   :  { %9420 = vmatprep.subr.mxu0 %v9585_v4 }
 0x49b   :  { %9412 = vmatpush3.xpose.msra.mxu1 %v6932_v14 }
 0x49c   :  { %9451 = vmatprep.subr.mxu1 %v9585_v4 }
 0x49d   :  { %9421 = vmatpush3.xpose.msra.mxu0 %v13396_v58 }
 0x49e   :  { %9414 = vmatmul.mubr.f32.vlgmr.msra.gmra.mxu1 %v14703_v19  ;;  %9422 = vmatprep.subr.mxu0 %v9585_v4  ;;  %v6211_v49 = vpop.f32.mrf.mxu1 }
 0x49f   :  { %9452 = vmatpush3.xpose.msra.mxu1 %v13346_v38  ;;  %v6212_v24 = vadd.f32 %v6211_v49, %v5980_v8  ;;  %9483 = vmatprep.mubr.msk.f32.mxu1 %vm9586_vm13, %v9585_v4 }
 0x4a0   :  { %9453 = vmatprep.subr.mxu1 %v9585_v4  ;;  %v6213_v55 = vpop.f32.mrf.mxu1 }
 0x4a1   :  { %9423 = vmatpush3.xpose.msra.mxu0 %v13413_v23  ;;  %v6214_v26 = vadd.f32 %v6213_v55, %v5982_v44 }
 0x4a2   :  { %9424 = vmatprep.subr.mxu0 %v9585_v4 }
 0x4a3   :  { %9454 = vmatpush3.xpose.msra.mxu1 %v13358_v27 }
 0x4a4   :  { %9455 = vmatprep.subr.mxu1 %v9585_v4 }
 0x4a5   :  { %9425 = vmatpush3.xpose.msra.mxu0 %v13433_v28 }
 0x4a6   :  { %9426 = vmatprep.subr.mxu0 %v9585_v4 }
 0x4a7   :  { %9456 = vmatpush3.xpose.msra.mxu1 %v13372_v11 }
 0x4a8   :  { %9457 = vmatprep.subr.mxu1 %v9585_v4 }
 0x4a9   :  { %9427 = vmatpush3.xpose.msra.mxu0 %v13450_v35 }
 0x4aa   :  { %9428 = vmatprep.subr.mxu0 %v9585_v4 }
 0x4ab   :  { %9458 = vmatpush3.xpose.msra.mxu1 %v13392_v7 }
 0x4ac   :  { %9459 = vmatprep.subr.mxu1 %v9585_v4 }
 0x4ad   :  { %9429 = vmatpush3.xpose.msra.mxu0 %v13465_v13 }
 0x4ae   :  { %9430 = vmatprep.subr.mxu0 %v9585_v4 }
 0x4af   :  { %9460 = vmatpush3.xpose.msra.mxu1 %v13405_v17 }
 0x4b0   :  { %9461 = vmatprep.subr.mxu1 %v9585_v4 }
 0x4b1   :  { %9431 = vmatpush3.xpose.msra.mxu0 %v13478_v43  ;;  %v9587_v43 = vmov 1966171168  }
 0x4b2   :  { %9432 = vmatprep.subr.mxu0 %v9585_v4 }
 0x4b3   :  { %9462 = vmatpush3.xpose.msra.mxu1 %v13425_v60 }
 0x4b4   :  { %9463 = vmatprep.subr.mxu1 %v9585_v4 }
 0x4b5   :  { %9433 = vmatpush3.xpose.msra.mxu0 %v13493_v30 }
 0x4b6   :  { %9434 = vmatprep.subr.mxu0 %v9585_v4 }
 0x4b7   :  { %9464 = vmatpush3.xpose.msra.mxu1 %v13442_v51 }
 0x4b8   :  { %9465 = vmatprep.subr.mxu1 %v9585_v4 }
 0x4b9   :  { %9435 = vmatpush3.xpose.msra.mxu0 %v13509_v59 }
 0x4ba   :  { %9436 = vmatprep.subr.mxu0 %v9585_v4 }
 0x4bb   :  { %9466 = vmatpush3.xpose.msra.mxu1 %v13457_v25 }
 0x4bc   :  { %9467 = vmatprep.subr.mxu1 %v9585_v4 }
 0x4bd   :  { %9437 = vmatpush3.xpose.msra.mxu0 %v13525_v62 }
 0x4be   :  { %9438 = vmatprep.subr.mxu0 %v9585_v4 }
 0x4bf   :  { %9468 = vmatpush3.xpose.msra.mxu1 %v13470_v56 }
 0x4c0   :  { %9469 = vmatprep.subr.mxu1 %v9585_v4 }
 0x4c1   :  { %9439 = vmatpush3.xpose.msra.mxu0 %v13541_v52 }
 0x4c2   :  { %9440 = vmatprep.subr.mxu0 %v9585_v4 }
 0x4c3   :  { %9470 = vmatpush3.xpose.msra.mxu1 %v13485_v9 }
 0x4c4   :  { %9471 = vmatprep.subr.mxu1 %v9585_v4 }
 0x4c5   :  { %9441 = vmatpush3.xpose.msra.mxu0 %v13555_v3 }
 0x4c6   :  { %9442 = vmatprep.subr.mxu0 %v9585_v4 }
 0x4c7   :  { %9472 = vmatpush3.xpose.msra.mxu1 %v13501_v2 }
 0x4c8   :  { %9473 = vmatprep.subr.mxu1 %v9585_v4 }
 0x4c9   :  { %9443 = vmatpush3.xpose.msra.mxu0 %v13568_v12 }
 0x4ca   :  { %9444 = vmatprep.subr.mxu0 %v9585_v4 }
 0x4cb   :  { %9474 = vmatpush3.xpose.msra.mxu1 %v13517_v29 }
 0x4cc   :  { %9475 = vmatprep.subr.mxu1 %v9585_v4 }
 0x4cd   :  { %9445 = vmatpush3.xpose.msra.mxu0 %v13580_v37 }
 0x4ce   :  { %9446 = vmatprep.subr.mxu0 %v9585_v4 }
 0x4cf   :  { %9476 = vmatpush3.xpose.msra.mxu1 %v13533_v15 }
 0x4d0   :  { %9477 = vmatprep.subr.mxu1 %v9585_v4 }
 0x4d1   :  { %9447 = vmatpush3.xpose.msra.mxu0 %v13590_v21 }
 0x4d2   :  { %9486 = vmatprep.subr.mxu0 %v9585_v4 }
 0x4d3   :  { %9478 = vmatpush3.xpose.msra.mxu1 %v13547_v34 }
 0x4d4   :  { %v6348_v54 = vpop.f32.mrf.mxu0  ;;  %9449 = vmatmul.mubr.f32.vlgmr.msra.gmra.mxu0 %v14800_v5  ;;  %9479 = vmatprep.subr.mxu1 %v9585_v4 }
 0x4d5   :  { %v6349_v14 = vadd.f32 %v6348_v54, %v6212_v24  ;;  %9487 = vmatpush3.xpose.msra.mxu0 %v6825_v18  ;;  %9518 = vmatprep.mubr.msk.f32.mxu0 %vm9586_vm13, %v9585_v4 }
 0x4d6   :  { %v6350_v6 = vpop.f32.mrf.mxu0  ;;  %9488 = vmatprep.subr.mxu0 %v9585_v4 }
 0x4d7   :  { %9480 = vmatpush3.xpose.msra.mxu1 %v13560_v57  ;;  %v6351_v8 = vadd.f32 %v6350_v6, %v6214_v26 }
 0x4d8   :  { %9481 = vmatprep.subr.mxu1 %v9585_v4 }
 0x4d9   :  { %9489 = vmatpush3.xpose.msra.mxu0 %v6832_v61 }
 0x4da   :  { %9490 = vmatprep.subr.mxu0 %v9585_v4 }
 0x4db   :  { %9482 = vmatpush3.xpose.msra.mxu1 %v13572_v47 }
 0x4dc   :  { %9521 = vmatprep.subr.mxu1 %v9585_v4 }
 0x4dd   :  { %9491 = vmatpush3.xpose.msra.mxu0 %v6839_v32 }
 0x4de   :  { %v6454_v33 = vpop.f32.mrf.mxu1  ;;  %9484 = vmatmul.mubr.f32.vlgmr.msra.gmra.mxu1 %v13051_v36  ;;  %9492 = vmatprep.subr.mxu0 %v9585_v4 }
 0x4df   :  { %v6455_v18 = vadd.f32 %v6454_v33, %v6349_v14  ;;  %9522 = vmatpush3.xpose.msra.mxu1 %v13346_v38  ;;  %9553 = vmatprep.mubr.msk.f32.mxu1 %vm9586_vm13, %v9585_v4 }
 0x4e0   :  { %v6456_v50 = vpop.f32.mrf.mxu1  ;;  %9523 = vmatprep.subr.mxu1 %v9585_v4 }
 0x4e1   :  { %v6457_v61 = vadd.f32 %v6456_v50, %v6351_v8  ;;  %9493 = vmatpush3.xpose.msra.mxu0 %v6846_v31 }
 0x4e2   :  { %9494 = vmatprep.subr.mxu0 %v9585_v4 }
 0x4e3   :  { %9524 = vmatpush3.xpose.msra.mxu1 %v13358_v27 }
 0x4e4   :  { %9525 = vmatprep.subr.mxu1 %v9585_v4 }
 0x4e5   :  { %9495 = vmatpush3.xpose.msra.mxu0 %v6853_v41 }
 0x4e6   :  { %9496 = vmatprep.subr.mxu0 %v9585_v4 }
 0x4e7   :  { %9526 = vmatpush3.xpose.msra.mxu1 %v13372_v11 }
 0x4e8   :  { %9527 = vmatprep.subr.mxu1 %v9585_v4 }
 0x4e9   :  { %9497 = vmatpush3.xpose.msra.mxu0 %v6860_v10 }
 0x4ea   :  { %9498 = vmatprep.subr.mxu0 %v9585_v4 }
 0x4eb   :  { %9528 = vmatpush3.xpose.msra.mxu1 %v13392_v7 }
 0x4ec   :  { %9529 = vmatprep.subr.mxu1 %v9585_v4 }
 0x4ed   :  { %9499 = vmatpush3.xpose.msra.mxu0 %v6867_v16 }
 0x4ee   :  { %9500 = vmatprep.subr.mxu0 %v9585_v4 }
 0x4ef   :  { %9530 = vmatpush3.xpose.msra.mxu1 %v13405_v17 }
 0x4f0   :  { %9531 = vmatprep.subr.mxu1 %v9585_v4 }
 0x4f1   :  { %9501 = vmatpush3.xpose.msra.mxu0 %v6874_v42 }
 0x4f2   :  { %9502 = vmatprep.subr.mxu0 %v9585_v4 }
 0x4f3   :  { %9532 = vmatpush3.xpose.msra.mxu1 %v13425_v60 }
 0x4f4   :  { %9533 = vmatprep.subr.mxu1 %v9585_v4 }
 0x4f5   :  { %9503 = vmatpush3.xpose.msra.mxu0 %v6881_v0 }
 0x4f6   :  { %9504 = vmatprep.subr.mxu0 %v9585_v4 }
 0x4f7   :  { %9534 = vmatpush3.xpose.msra.mxu1 %v13442_v51 }
 0x4f8   :  { %9535 = vmatprep.subr.mxu1 %v9585_v4 }
 0x4f9   :  { %9505 = vmatpush3.xpose.msra.mxu0 %v6888_v45 }
 0x4fa   :  { %9506 = vmatprep.subr.mxu0 %v9585_v4 }
 0x4fb   :  { %9536 = vmatpush3.xpose.msra.mxu1 %v13457_v25 }
 0x4fc   :  { %9537 = vmatprep.subr.mxu1 %v9585_v4 }
 0x4fd   :  { %9507 = vmatpush3.xpose.msra.mxu0 %v6895_v48 }
 0x4fe   :  { %9508 = vmatprep.subr.mxu0 %v9585_v4 }
 0x4ff   :  { %9538 = vmatpush3.xpose.msra.mxu1 %v13470_v56 }
 0x500   :  { %9539 = vmatprep.subr.mxu1 %v9585_v4 }
 0x501   :  { %9509 = vmatpush3.xpose.msra.mxu0 %v6902_v39 }
 0x502   :  { %9510 = vmatprep.subr.mxu0 %v9585_v4 }
 0x503   :  { %9540 = vmatpush3.xpose.msra.mxu1 %v13485_v9  ;;  %v7377_v9 = vunpack.c.l.s4 %v9587_v43 }
 0x504   :  { %9541 = vmatprep.subr.mxu1 %v9585_v4 }
 0x505   :  { %9511 = vmatpush3.xpose.msra.mxu0 %v6909_v53  ;;  %v7378_v42 = vunpack.c.0.s8 %v7377_v9 }
 0x506   :  { %9512 = vmatprep.subr.mxu0 %v9585_v4 }
 0x507   :  { %9542 = vmatpush3.xpose.msra.mxu1 %v13501_v2  ;;  %v7381_v2 = vsub.s32 %v7378_v42, %v13594_v40 }
 0x508   :  { %9543 = vmatprep.subr.mxu1 %v9585_v4 }
 0x509   :  { %9513 = vmatpush3.xpose.msra.mxu0 %v6916_v63 }
 0x50a   :  { %9514 = vmatprep.subr.mxu0 %v9585_v4 }
 0x50b   :  { %9544 = vmatpush3.xpose.msra.mxu1 %v13517_v29 }
 0x50c   :  { %9545 = vmatprep.subr.mxu1 %v9585_v4 }
 0x50d   :  { %9515 = vmatpush3.xpose.msra.mxu0 %v6923_v22 }
 0x50e   :  { %9516 = vmatprep.subr.mxu0 %v9585_v4 }
 0x50f   :  { %9546 = vmatpush3.xpose.msra.mxu1 %v13533_v15 }
 0x510   :  { %9547 = vmatprep.subr.mxu1 %v9585_v4 }
 0x511   :  { %9517 = vmatpush3.xpose.msra.mxu0 %v6930_v46 }
 0x513   :  { %9548 = vmatpush3.xpose.msra.mxu1 %v13547_v34 }
 0x514   :  { %v6622_v36 = vpop.f32.mrf.mxu0  ;;  %9519 = vmatmul.mubr.f32.vlgmr.msra.gmra.mxu0 %v14703_v19  ;;  %9549 = vmatprep.subr.mxu1 %v9585_v4 }
 0x515   :  { %v6623_v38 = vadd.f32 %v6622_v36, %v6455_v18 }
 0x516   :  { %v6624_v27 = vpop.f32.mrf.mxu0 }
 0x517   :  { %9550 = vmatpush3.xpose.msra.mxu1 %v13560_v57  ;;  %v6625_v11 = vadd.f32 %v6624_v27, %v6457_v61 }
 0x518   :  { %9551 = vmatprep.subr.mxu1 %v9585_v4 }
 0x51b   :  { %9552 = vmatpush3.xpose.msra.mxu1 %v13572_v47 }
 0x51e   :  { %v6726_v7 = vpop.f32.mrf.mxu1  ;;  %9554 = vmatmul.mubr.f32.vlgmr.msra.gmra.mxu1 %v14703_v19 }
 0x51f   :  { %v6727_v58 = vadd.f32 %v6726_v7, %v6623_v38 }
 0x520   :  { %v6728_v17 = vpop.f32.mrf.mxu1 }
 0x521   :  { %v6729_v32 = vadd.f32 %v6728_v17, %v6625_v11 }
 0x523   :  { %v7375_v23 = vcombine.low %v6727_v58, %v6729_v32 }
 0x525   :  { %v7382_v62 = vrot.slane %v7375_v23, %v7381_v2 }
 0x554   :  { %v6818_v60 = vpop.f32.mrf.mxu0 }
 0x555   :  { %v6819_v28 = vadd.f32 %v6818_v60, %v13613_v20 }
 0x556   :  { %v9380_v31 = vpop.f32.mrf.mxu0 }
 0x55e   :  { %v6969_v51 = vpop.f32.mrf.mxu1 }
 0x55f   :  { %v6970_v41 = vadd.f32 %v6969_v51, %v6819_v28 }
 0x560   :  { %v9415_v35 = vpop.f32.mrf.mxu1 }
 0x594   :  { %v7073_v25 = vpop.f32.mrf.mxu0 }
 0x595   :  { %v7074_v10 = vadd.f32 %v7073_v25, %v6970_v41 }
 0x596   :  { %v9450_v13 = vpop.f32.mrf.mxu0 }
 0x59e   :  { %v7162_v4 = vpop.f32.mrf.mxu1 }
 0x59f   :  { %v7163_v30 = vadd.f32 %v7162_v4, %v7074_v10 }
 0x5a0   :  { %v9485_v56 = vpop.f32.mrf.mxu1 }
 0x5d4   :  { %v7281_v16 = vpop.f32.mrf.mxu0 }
 0x5d5   :  { %v7282_v0 = vadd.f32 %v7281_v16, %v7163_v30 }
 0x5d6   :  { %v9520_v19 = vpop.f32.mrf.mxu0 }
 0x5de   :  { %v7368_v59 = vpop.f32.mrf.mxu1 }
 0x5df   :  { %v7369_v29 = vadd.f32 %v7368_v59, %v7282_v0 }
 0x5e0   :  { %v9555_v45 = vpop.f32.mrf.mxu1 }
 0x5e1   :  { %v7389_v15 = vrot.slane %v7369_v29, %v7381_v2 }
 0x5e3   :  { %v7390_v48 = vcombine.low %v7382_v62, %v7389_v15 }
 0x5e5   :  { %v7397_v52 = vrot.slane %v7390_v48, %v7381_v2 }
 0x5e7   :  { %7403 = vst.msk [vmem:[#allocation3] sm:$0x7] %vm7401_vm1, %v7397_v52 }
 0x5e8   :  { %9573 = shalt.err (!%p9570_p4)
}
 0x5e9   :  { %7413 = dma.vmem_to_hbm [thread:$0]  %s7411_s19, 48, %s13783_s7, [#allocation4]  }
 0x5ea   :  { %9582 = dma.done.wait [#allocation4], 48  }
 0x5eb   :  { %9583 = vsyncadd [#allocation4], 4294967248 }
 0x5ec   :  { %7417 = vsyncpa [#allocation4], 1 }

</bundles_post_ra>
